<compile_context>
chip_gen: v7x
topology: tpu7x:2x2x1
jax: 0.10.0
libtpu: 0.0.40
codegen_flags: <defaults>
</compile_context>

<pallas_src>
import functools

import jax
import jax.numpy as jnp
import numpy as np
from jax.experimental import pallas as pl
from jax.experimental.pallas import tpu as pltpu

TOKEN_DIM = 9
NUM_HEADS = 9          # head_dim = 9 // 9 = 1
MAX_SEQ_LEN = 6
LAYER_COUNT = 4
COND_DIM = 7           # module concatenates the timestep -> cond_dim + 1 = 8
COND_LEN = 5
BATCH = 2


def _diffuser_kernel(B, Sp, Lp, Lc, D, L,
                     x_ref, c_ref, t_ref,
                     wqx_ref, bqx_ref, wao_ref,
                     wkvc_ref, wkvt_ref, bkv_ref,
                     o_ref):
    """All layers & batches in one grid step.

    x_ref:    (B*Sp, D)      tokens, S padded to a sublane tile per batch
    c_ref:    (B*Lp, Cc)     conditioning (zero-padded rows), no timestep col
    t_ref:    (B*Lp, 1)      timestep channel
    wqx_ref:  (L, D, 2*D)    per-layer [wq_fused | wout]
    bqx_ref:  (L, 1, 2*D)    per-layer [bq_fused | bo_fused]
    wao_ref:  (L, D, D)      per-layer wom @ wout
    wkvc_ref: (Cc, L*2*D)    fused k/v weights for ALL layers (lane-packed)
    wkvt_ref: (1,  L*2*D)    timestep rows of the fused k/v weights
    bkv_ref:  (1,  L*2*D)    fused k/v biases
    """
    f32 = jnp.float32
    x2 = x_ref[...].astype(f32)          # (B*Sp, D)
    c2 = c_ref[...].astype(f32)          # (B*Lp, Cc)
    t2 = t_ref[...].astype(f32)          # (B*Lp, 1)

    # --- layer-invariant k/v for all layers: a single up-front MXU push -----
    kv_all = (jnp.dot(c2, wkvc_ref[...], preferred_element_type=f32)
              + t2 * wkvt_ref[...] + bkv_ref[...])          # (B*Lp, L*2*D)

    # Per-layer lane slices, hoisted out of the dependent layer chain.
    ks = [kv_all[:, 2 * D * l: 2 * D * l + D] for l in range(L)]
    vs = [kv_all[:, 2 * D * l + D: 2 * D * (l + 1)] for l in range(L)]

    # Additive softmax mask for the padded key rows (Lc -> Lp), hoisted.
    row_ids = jax.lax.broadcasted_iota(jnp.int32, (Lp, 1), 0)
    neg = jnp.where(row_ids < Lc, 0.0, -1e30).astype(f32)   # (Lp, 1)
    neg = jnp.broadcast_to(neg, (Lp, D))[None, :, :]        # (1, Lp, D)

    for l in range(L):                   # L static & small -> unrolled
        # One push yields q (cols :D) and the residual-path x@wout (cols D:),
        # with both biases folded into the same broadcast add.
        qx = jnp.dot(x2, wqx_ref[l], preferred_element_type=f32) + bqx_ref[l]
        q2 = qx[:, :D]                   # lane offset 0 -> free view
        xr = qx[:, D:2 * D]              # overlaps with attention compute

        # Attention, all heads at once (head_dim == 1 -> scores are an
        # elementwise outer product, scale = 1). Pure VPU/EUP/XLU work.
        attn_parts = []
        for b in range(B):               # B == 2, unrolled; slices tile-aligned
            qb = q2[b * Sp:(b + 1) * Sp, :]        # (Sp, D)
            kb = ks[l][b * Lp:(b + 1) * Lp, :]     # (Lp, D)
            vb = vs[l][b * Lp:(b + 1) * Lp, :]     # (Lp, D)
            s = qb[:, None, :] * kb[None, :, :] + neg       # (Sp, Lp, D)
            s = s - jnp.max(s, axis=1, keepdims=True)
            p = jnp.exp(s)
            inv = pl.reciprocal(jnp.sum(p, axis=1, keepdims=True), approx=True)
            attn_parts.append(jnp.sum(p * inv * vb[None, :, :], axis=1))
        attn2 = jnp.concatenate(attn_parts, axis=0)         # (B*Sp, D), aligned

        # Fused tail: x <- attn @ (wom@wout) + (x @ wout + bo_fused)
        x2 = jnp.dot(attn2, wao_ref[l], preferred_element_type=f32) + xr

    o_ref[...] = x2.astype(o_ref.dtype)


def pack_params(params, cond_dim):
    """One-time algebraic fusion + packing (run at init, NOT per forward).

    Folds q_proj∘MHA-in-proj (and k/v/out analogues) into single affine maps,
    lane-concats [wq|wout] per layer, and lane-packs all layers' k/v weights.
    """
    mm = lambda a, b: jnp.einsum('lij,ljk->lik', a, b)
    vm = lambda a, b: jnp.einsum('lj,ljk->lk', a, b)

    wq_f = mm(params["wq0"], params["wqi"])
    bq_f = vm(params["bq0"], params["wqi"]) + params["bqi"]
    wk_f = mm(params["wk0"], params["wki"])
    bk_f = vm(params["bk0"], params["wki"]) + params["bki"]
    wv_f = mm(params["wv0"], params["wvi"])
    bv_f = vm(params["bv0"], params["wvi"]) + params["bvi"]
    w_ao = mm(params["wom"], params["wout"])
    b_o = vm(params["bom"], params["wout"]) + params["bout"]
    w_x = params["wout"]

    L, D, _ = wq_f.shape

    w_qx = jnp.concatenate([wq_f, w_x], axis=-1)                  # (L, D, 2D)
    b_qx = jnp.concatenate([bq_f, b_o], axis=-1)[:, None, :]      # (L, 1, 2D)

    # Split the timestep row off the fused k/v weights; pack layers on lanes.
    wk_c, wk_t = wk_f[:, :cond_dim, :], wk_f[:, cond_dim:, :]
    wv_c, wv_t = wv_f[:, :cond_dim, :], wv_f[:, cond_dim:, :]
    kv_c = jnp.concatenate([wk_c, wv_c], axis=-1)                 # (L, Cc, 2D)
    kv_t = jnp.concatenate([wk_t, wv_t], axis=-1)                 # (L, 1, 2D)
    kv_b = jnp.concatenate([bk_f, bv_f], axis=-1)                 # (L, 2D)

    w_kvc = jnp.transpose(kv_c, (1, 0, 2)).reshape(cond_dim, L * 2 * D)
    w_kvt = jnp.transpose(kv_t, (1, 0, 2)).reshape(1, L * 2 * D)
    b_kv = kv_b.reshape(1, L * 2 * D)

    f32 = jnp.float32
    return {"w_qx": w_qx.astype(f32), "b_qx": b_qx.astype(f32),
            "w_ao": w_ao.astype(f32), "w_kvc": w_kvc.astype(f32),
            "w_kvt": w_kvt.astype(f32), "b_kv": b_kv.astype(f32)}


@jax.jit
def conditional_transformer_diffuser(x, c, t, packed):
    """x: (B, S, token_dim), c: (B, Lc, cond_dim), t: (B, Lc, 1).
    `packed` comes from pack_params() (precomputed once)."""
    B, S, D = x.shape
    Lc, Cc = c.shape[1], c.shape[2]
    L = packed["w_qx"].shape[0]
    # Kernel is specialized to the module defaults: num_heads == token_dim,
    # i.e. head_dim == 1.
    assert D == NUM_HEADS

    Sp = ((S + 7) // 8) * 8       # pad token rows to a sublane tile per batch
    Lp = ((Lc + 7) // 8) * 8      # pad key rows (masked in-kernel)

    x2 = jnp.pad(x, ((0, 0), (0, Sp - S), (0, 0))).reshape(B * Sp, D)
    c2 = jnp.pad(c, ((0, 0), (0, Lp - Lc), (0, 0))).reshape(B * Lp, Cc)
    t2 = jnp.pad(t, ((0, 0), (0, Lp - Lc), (0, 0))).reshape(B * Lp, 1)

    kernel = functools.partial(_diffuser_kernel, B, Sp, Lp, Lc, D, L)
    out2 = pl.pallas_call(
        kernel,
        out_shape=jax.ShapeDtypeStruct((B * Sp, D), jnp.float32),
        grid=(1,),
        in_specs=[
            pl.BlockSpec((B * Sp, D), lambda i: (0, 0)),
            pl.BlockSpec((B * Lp, Cc), lambda i: (0, 0)),
            pl.BlockSpec((B * Lp, 1), lambda i: (0, 0)),
            pl.BlockSpec((L, D, 2 * D), lambda i: (0, 0, 0)),
            pl.BlockSpec((L, 1, 2 * D), lambda i: (0, 0, 0)),
            pl.BlockSpec((L, D, D), lambda i: (0, 0, 0)),
            pl.BlockSpec((Cc, L * 2 * D), lambda i: (0, 0)),
            pl.BlockSpec((1, L * 2 * D), lambda i: (0, 0)),
            pl.BlockSpec((1, L * 2 * D), lambda i: (0, 0)),
        ],
        out_specs=pl.BlockSpec((B * Sp, D), lambda i: (0, 0)),
        compiler_params=pltpu.CompilerParams(
            dimension_semantics=("arbitrary",)),
    )(x2, c2, t2, packed["w_qx"], packed["b_qx"], packed["w_ao"],
      packed["w_kvc"], packed["w_kvt"], packed["b_kv"])
    return out2.reshape(B, Sp, D)[:, :S, :]


def init_params(key, layer_count, token_dim, cond_in_dim):
    """Deterministic synthetic weights; shapes mirror the PyTorch module
    (pre-transposed to (in, out))."""
    def unif(k, shape, fan_in):
        bound = 1.0 / float(np.sqrt(fan_in))
        return jax.random.uniform(k, shape, jnp.float32, -bound, bound)

    spec = [
        ("wq0",  (layer_count, token_dim, token_dim), token_dim),
        ("bq0",  (layer_count, token_dim),            token_dim),
        ("wk0",  (layer_count, cond_in_dim, token_dim), cond_in_dim),
        ("bk0",  (layer_count, token_dim),            cond_in_dim),
        ("wv0",  (layer_count, cond_in_dim, token_dim), cond_in_dim),
        ("bv0",  (layer_count, token_dim),            cond_in_dim),
        ("wqi",  (layer_count, token_dim, token_dim), token_dim),
        ("bqi",  (layer_count, token_dim),            token_dim),
        ("wki",  (layer_count, token_dim, token_dim), token_dim),
        ("bki",  (layer_count, token_dim),            token_dim),
        ("wvi",  (layer_count, token_dim, token_dim), token_dim),
        ("bvi",  (layer_count, token_dim),            token_dim),
        ("wom",  (layer_count, token_dim, token_dim), token_dim),
        ("bom",  (layer_count, token_dim),            token_dim),
        ("wout", (layer_count, token_dim, token_dim), token_dim),
        ("bout", (layer_count, token_dim),            token_dim),
    ]
    keys = jax.random.split(key, len(spec))
    return {name: unif(k, shape, fan)
            for k, (name, shape, fan) in zip(keys, spec)}


def reference_forward(x, c, t, params, num_heads=NUM_HEADS):
    """Pure-JAX reference with the original (unfused) math, for correctness."""
    cc = jnp.concatenate([c, t], axis=-1)
    D = x.shape[-1]
    hd = D // num_heads
    scale = 1.0 / float(np.sqrt(hd))
    L = params["wq0"].shape[0]
    for l in range(L):
        q0 = x @ params["wq0"][l] + params["bq0"][l]
        k0 = cc @ params["wk0"][l] + params["bk0"][l]
        v0 = cc @ params["wv0"][l] + params["bv0"][l]
        q = q0 @ params["wqi"][l] + params["bqi"][l]
        k = k0 @ params["wki"][l] + params["bki"][l]
        v = v0 @ params["wvi"][l] + params["bvi"][l]
        B, S, _ = q.shape
        Lc = k.shape[1]
        qh = q.reshape(B, S, num_heads, hd)
        kh = k.reshape(B, Lc, num_heads, hd)
        vh = v.reshape(B, Lc, num_heads, hd)
        s = jnp.einsum('bshd,blhd->bhsl', qh, kh) * scale
        p = jax.nn.softmax(s, axis=-1)
        o = jnp.einsum('bhsl,blhd->bshd', p, vh).reshape(B, S, D)
        o = o @ params["wom"][l] + params["bom"][l]
        x = (o + x) @ params["wout"][l] + params["bout"][l]
    return x


if __name__ == "__main__":
    key = jax.random.PRNGKey(0)
    kx, kc, kp = jax.random.split(key, 3)

    x = jax.random.normal(kx, (BATCH, MAX_SEQ_LEN, TOKEN_DIM), jnp.float32)
    c = jax.random.normal(kc, (BATCH, COND_LEN, COND_DIM), jnp.float32)
    t = jnp.ones((BATCH, COND_LEN, 1), jnp.float32)   # timestep channel

    params = init_params(kp, LAYER_COUNT, TOKEN_DIM, COND_DIM + 1)

    # One-time weight fusion/packing — outside the per-call path (review #3).
    packed = jax.block_until_ready(pack_params(params, COND_DIM))

    out = conditional_transformer_diffuser(x, c, t, packed)
    out = jax.block_until_ready(out)

    ref = jax.block_until_ready(reference_forward(x, c, t, params))
    # Tolerance relaxed vs. 1e-4: approx reciprocal (EUP vrcp) in the softmax
    # plus the algebraic weight fusion add ~1e-4-level relative error/layer.
    np.testing.assert_allclose(np.asarray(out), np.asarray(ref),
                               rtol=2e-3, atol=2e-3)
    print("KERNEL_OK")
</pallas_src>

<mosaic_0001>
module attributes {stable_mosaic.version = 11 : i64} {
  func.func @_diffuser_kernel(%arg0: i32, %arg1: memref<16x9xf32, #tpu.memory_space<vmem>>, %arg2: memref<16x7xf32, #tpu.memory_space<vmem>>, %arg3: memref<16x1xf32, #tpu.memory_space<vmem>>, %arg4: memref<4x9x18xf32, #tpu.memory_space<vmem>>, %arg5: memref<4x1x18xf32, #tpu.memory_space<vmem>>, %arg6: memref<4x9x9xf32, #tpu.memory_space<vmem>>, %arg7: memref<7x72xf32, #tpu.memory_space<vmem>>, %arg8: memref<1x72xf32, #tpu.memory_space<vmem>>, %arg9: memref<1x72xf32, #tpu.memory_space<vmem>>, %arg10: memref<16x9xf32, #tpu.memory_space<vmem>>) attributes {dimension_semantics = [#tpu.dimension_semantics<arbitrary>], iteration_bounds = array<i64: 1>, scalar_prefetch = 0 : i64, scratch_operands = 0 : i64, tpu.core_type = #tpu.core_type<tc>, window_params = [{pipeline_mode = #tpu.pipeline_mode<synchronous>, transform_indices = @transform_0, window_bounds = array<i64: 16, 9>}, {pipeline_mode = #tpu.pipeline_mode<synchronous>, transform_indices = @transform_1, window_bounds = array<i64: 16, 7>}, {pipeline_mode = #tpu.pipeline_mode<synchronous>, transform_indices = @transform_2, window_bounds = array<i64: 16, 1>}, {pipeline_mode = #tpu.pipeline_mode<synchronous>, transform_indices = @transform_3, window_bounds = array<i64: 4, 9, 18>}, {pipeline_mode = #tpu.pipeline_mode<synchronous>, transform_indices = @transform_4, window_bounds = array<i64: 4, 1, 18>}, {pipeline_mode = #tpu.pipeline_mode<synchronous>, transform_indices = @transform_5, window_bounds = array<i64: 4, 9, 9>}, {pipeline_mode = #tpu.pipeline_mode<synchronous>, transform_indices = @transform_6, window_bounds = array<i64: 7, 72>}, {pipeline_mode = #tpu.pipeline_mode<synchronous>, transform_indices = @transform_7, window_bounds = array<i64: 1, 72>}, {pipeline_mode = #tpu.pipeline_mode<synchronous>, transform_indices = @transform_8, window_bounds = array<i64: 1, 72>}, {pipeline_mode = #tpu.pipeline_mode<synchronous>, transform_indices = @transform_9, window_bounds = array<i64: 16, 9>}]} {
    %c0 = arith.constant 0 : index
    %c0_0 = arith.constant 0 : index
    %0 = vector.load %arg1[%c0, %c0_0] : memref<16x9xf32, #tpu.memory_space<vmem>>, vector<16x9xf32>
    %c0_1 = arith.constant 0 : index
    %c0_2 = arith.constant 0 : index
    %1 = vector.load %arg2[%c0_1, %c0_2] : memref<16x7xf32, #tpu.memory_space<vmem>>, vector<16x7xf32>
    %c0_3 = arith.constant 0 : index
    %c0_4 = arith.constant 0 : index
    %2 = vector.load %arg3[%c0_3, %c0_4] : memref<16x1xf32, #tpu.memory_space<vmem>>, vector<16x1xf32>
    %c0_5 = arith.constant 0 : index
    %c0_6 = arith.constant 0 : index
    %3 = vector.load %arg7[%c0_5, %c0_6] : memref<7x72xf32, #tpu.memory_space<vmem>>, vector<7x72xf32>
    %cst = arith.constant dense<0.000000e+00> : vector<16x72xf32>
    %4 = tpu.matmul %1, %3, %cst {dimension_numbers = #tpu.dot_dimension_numbers<[1], [0], [0], [1], [0, 0, 1, 1], [], []>} : vector<16x7xf32>, vector<7x72xf32>, vector<16x72xf32> -> vector<16x72xf32>
    %c0_7 = arith.constant 0 : index
    %c0_8 = arith.constant 0 : index
    %5 = vector.load %arg8[%c0_7, %c0_8] : memref<1x72xf32, #tpu.memory_space<vmem>>, vector<1x72xf32>
    %6 = vector.broadcast %2 : vector<16x1xf32> to vector<16x72xf32>
    %7 = vector.broadcast %5 : vector<1x72xf32> to vector<16x72xf32>
    %8 = arith.mulf %6, %7 : vector<16x72xf32>
    %9 = arith.addf %4, %8 : vector<16x72xf32>
    %c0_9 = arith.constant 0 : index
    %c0_10 = arith.constant 0 : index
    %10 = vector.load %arg9[%c0_9, %c0_10] : memref<1x72xf32, #tpu.memory_space<vmem>>, vector<1x72xf32>
    %11 = vector.broadcast %10 : vector<1x72xf32> to vector<16x72xf32>
    %12 = arith.addf %9, %11 : vector<16x72xf32>
    %13 = vector.extract_strided_slice %12 {offsets = [0, 0], sizes = [16, 9], strides = [1, 1]} : vector<16x72xf32> to vector<16x9xf32>
    %14 = vector.extract_strided_slice %12 {offsets = [0, 18], sizes = [16, 9], strides = [1, 1]} : vector<16x72xf32> to vector<16x9xf32>
    %15 = vector.extract_strided_slice %12 {offsets = [0, 36], sizes = [16, 9], strides = [1, 1]} : vector<16x72xf32> to vector<16x9xf32>
    %16 = vector.extract_strided_slice %12 {offsets = [0, 54], sizes = [16, 9], strides = [1, 1]} : vector<16x72xf32> to vector<16x9xf32>
    %17 = vector.extract_strided_slice %12 {offsets = [0, 9], sizes = [16, 9], strides = [1, 1]} : vector<16x72xf32> to vector<16x9xf32>
    %18 = vector.extract_strided_slice %12 {offsets = [0, 27], sizes = [16, 9], strides = [1, 1]} : vector<16x72xf32> to vector<16x9xf32>
    %19 = vector.extract_strided_slice %12 {offsets = [0, 45], sizes = [16, 9], strides = [1, 1]} : vector<16x72xf32> to vector<16x9xf32>
    %20 = vector.extract_strided_slice %12 {offsets = [0, 63], sizes = [16, 9], strides = [1, 1]} : vector<16x72xf32> to vector<16x9xf32>
    %21 = tpu.iota {dimensions = array<i32: 0>} : vector<8x1xi32>
    %c5_i32 = arith.constant 5 : i32
    %22 = vector.broadcast %c5_i32 : i32 to vector<8x1xi32>
    %23 = arith.cmpi slt, %21, %22 : vector<8x1xi32>
    %cst_11 = arith.constant 0.000000e+00 : f32
    %cst_12 = arith.constant -1.000000e+30 : f32
    %24 = vector.broadcast %cst_11 : f32 to vector<8x1xf32>
    %25 = vector.broadcast %cst_12 : f32 to vector<8x1xf32>
    %26 = arith.select %23, %24, %25 : vector<8x1xi1>, vector<8x1xf32>
    %27 = vector.shape_cast %26 : vector<8x1xf32> to vector<8x1xf32>
    %28 = vector.broadcast %27 : vector<8x1xf32> to vector<8x9xf32>
    %29 = vector.shape_cast %28 : vector<8x9xf32> to vector<1x8x9xf32>
    %c0_13 = arith.constant 0 : index
    %c0_14 = arith.constant 0 : index
    %c0_15 = arith.constant 0 : index
    %30 = vector.load %arg4[%c0_13, %c0_14, %c0_15] : memref<4x9x18xf32, #tpu.memory_space<vmem>>, vector<1x9x18xf32>
    %31 = vector.shape_cast %30 : vector<1x9x18xf32> to vector<9x18xf32>
    %cst_16 = arith.constant dense<0.000000e+00> : vector<16x18xf32>
    %32 = tpu.matmul %0, %31, %cst_16 {dimension_numbers = #tpu.dot_dimension_numbers<[1], [0], [0], [1], [0, 0, 1, 1], [], []>} : vector<16x9xf32>, vector<9x18xf32>, vector<16x18xf32> -> vector<16x18xf32>
    %c0_17 = arith.constant 0 : index
    %c0_18 = arith.constant 0 : index
    %c0_19 = arith.constant 0 : index
    %33 = vector.load %arg5[%c0_17, %c0_18, %c0_19] : memref<4x1x18xf32, #tpu.memory_space<vmem>>, vector<1x1x18xf32>
    %34 = vector.shape_cast %33 : vector<1x1x18xf32> to vector<1x18xf32>
    %35 = vector.broadcast %34 : vector<1x18xf32> to vector<16x18xf32>
    %36 = arith.addf %32, %35 : vector<16x18xf32>
    %37 = vector.extract_strided_slice %36 {offsets = [0, 0], sizes = [16, 9], strides = [1, 1]} : vector<16x18xf32> to vector<16x9xf32>
    %38 = vector.extract_strided_slice %36 {offsets = [0, 9], sizes = [16, 9], strides = [1, 1]} : vector<16x18xf32> to vector<16x9xf32>
    %39 = vector.extract_strided_slice %37 {offsets = [0, 0], sizes = [8, 9], strides = [1, 1]} : vector<16x9xf32> to vector<8x9xf32>
    %40 = vector.extract_strided_slice %13 {offsets = [0, 0], sizes = [8, 9], strides = [1, 1]} : vector<16x9xf32> to vector<8x9xf32>
    %41 = vector.extract_strided_slice %17 {offsets = [0, 0], sizes = [8, 9], strides = [1, 1]} : vector<16x9xf32> to vector<8x9xf32>
    %42 = vector.shape_cast %39 : vector<8x9xf32> to vector<8x1x9xf32>
    %43 = vector.shape_cast %40 : vector<8x9xf32> to vector<1x8x9xf32>
    %44 = vector.broadcast %42 : vector<8x1x9xf32> to vector<8x8x9xf32>
    %45 = vector.broadcast %43 : vector<1x8x9xf32> to vector<8x8x9xf32>
    %46 = arith.mulf %44, %45 : vector<8x8x9xf32>
    %47 = vector.broadcast %29 : vector<1x8x9xf32> to vector<8x8x9xf32>
    %48 = arith.addf %46, %47 : vector<8x8x9xf32>
    %cst_20 = arith.constant dense<0xFF800000> : vector<8x9xf32>
    %49 = vector.multi_reduction <maximumf>, %48, %cst_20 [1] : vector<8x8x9xf32> to vector<8x9xf32>
    %50 = vector.shape_cast %49 : vector<8x9xf32> to vector<8x1x9xf32>
    %51 = vector.broadcast %50 : vector<8x1x9xf32> to vector<8x8x9xf32>
    %52 = arith.subf %48, %51 : vector<8x8x9xf32>
    %53 = math.exp %52 : vector<8x8x9xf32>
    %cst_21 = arith.constant dense<0.000000e+00> : vector<8x9xf32>
    %54 = vector.multi_reduction <add>, %53, %cst_21 [1] : vector<8x8x9xf32> to vector<8x9xf32>
    %55 = vector.shape_cast %54 : vector<8x9xf32> to vector<8x1x9xf32>
    %56 = tpu.reciprocal %55 {approx = true} : vector<8x1x9xf32> -> vector<8x1x9xf32>
    %57 = vector.broadcast %56 : vector<8x1x9xf32> to vector<8x8x9xf32>
    %58 = arith.mulf %53, %57 : vector<8x8x9xf32>
    %59 = vector.shape_cast %41 : vector<8x9xf32> to vector<1x8x9xf32>
    %60 = vector.broadcast %59 : vector<1x8x9xf32> to vector<8x8x9xf32>
    %61 = arith.mulf %58, %60 : vector<8x8x9xf32>
    %cst_22 = arith.constant dense<0.000000e+00> : vector<8x9xf32>
    %62 = vector.multi_reduction <add>, %61, %cst_22 [1] : vector<8x8x9xf32> to vector<8x9xf32>
    %63 = vector.extract_strided_slice %37 {offsets = [8, 0], sizes = [8, 9], strides = [1, 1]} : vector<16x9xf32> to vector<8x9xf32>
    %64 = vector.extract_strided_slice %13 {offsets = [8, 0], sizes = [8, 9], strides = [1, 1]} : vector<16x9xf32> to vector<8x9xf32>
    %65 = vector.extract_strided_slice %17 {offsets = [8, 0], sizes = [8, 9], strides = [1, 1]} : vector<16x9xf32> to vector<8x9xf32>
    %66 = vector.shape_cast %63 : vector<8x9xf32> to vector<8x1x9xf32>
    %67 = vector.shape_cast %64 : vector<8x9xf32> to vector<1x8x9xf32>
    %68 = vector.broadcast %66 : vector<8x1x9xf32> to vector<8x8x9xf32>
    %69 = vector.broadcast %67 : vector<1x8x9xf32> to vector<8x8x9xf32>
    %70 = arith.mulf %68, %69 : vector<8x8x9xf32>
    %71 = vector.broadcast %29 : vector<1x8x9xf32> to vector<8x8x9xf32>
    %72 = arith.addf %70, %71 : vector<8x8x9xf32>
    %cst_23 = arith.constant dense<0xFF800000> : vector<8x9xf32>
    %73 = vector.multi_reduction <maximumf>, %72, %cst_23 [1] : vector<8x8x9xf32> to vector<8x9xf32>
    %74 = vector.shape_cast %73 : vector<8x9xf32> to vector<8x1x9xf32>
    %75 = vector.broadcast %74 : vector<8x1x9xf32> to vector<8x8x9xf32>
    %76 = arith.subf %72, %75 : vector<8x8x9xf32>
    %77 = math.exp %76 : vector<8x8x9xf32>
    %cst_24 = arith.constant dense<0.000000e+00> : vector<8x9xf32>
    %78 = vector.multi_reduction <add>, %77, %cst_24 [1] : vector<8x8x9xf32> to vector<8x9xf32>
    %79 = vector.shape_cast %78 : vector<8x9xf32> to vector<8x1x9xf32>
    %80 = tpu.reciprocal %79 {approx = true} : vector<8x1x9xf32> -> vector<8x1x9xf32>
    %81 = vector.broadcast %80 : vector<8x1x9xf32> to vector<8x8x9xf32>
    %82 = arith.mulf %77, %81 : vector<8x8x9xf32>
    %83 = vector.shape_cast %65 : vector<8x9xf32> to vector<1x8x9xf32>
    %84 = vector.broadcast %83 : vector<1x8x9xf32> to vector<8x8x9xf32>
    %85 = arith.mulf %82, %84 : vector<8x8x9xf32>
    %cst_25 = arith.constant dense<0.000000e+00> : vector<8x9xf32>
    %86 = vector.multi_reduction <add>, %85, %cst_25 [1] : vector<8x8x9xf32> to vector<8x9xf32>
    %87 = tpu.concatenate %62, %86 in 0 : vector<8x9xf32>, vector<8x9xf32> -> vector<16x9xf32>
    %c0_26 = arith.constant 0 : index
    %c0_27 = arith.constant 0 : index
    %c0_28 = arith.constant 0 : index
    %88 = vector.load %arg6[%c0_26, %c0_27, %c0_28] : memref<4x9x9xf32, #tpu.memory_space<vmem>>, vector<1x9x9xf32>
    %89 = vector.shape_cast %88 : vector<1x9x9xf32> to vector<9x9xf32>
    %cst_29 = arith.constant dense<0.000000e+00> : vector<16x9xf32>
    %90 = tpu.matmul %87, %89, %cst_29 {dimension_numbers = #tpu.dot_dimension_numbers<[1], [0], [0], [1], [0, 0, 1, 1], [], []>} : vector<16x9xf32>, vector<9x9xf32>, vector<16x9xf32> -> vector<16x9xf32>
    %91 = arith.addf %90, %38 : vector<16x9xf32>
    %c1 = arith.constant 1 : index
    %c0_30 = arith.constant 0 : index
    %c0_31 = arith.constant 0 : index
    %92 = vector.load %arg4[%c1, %c0_30, %c0_31] : memref<4x9x18xf32, #tpu.memory_space<vmem>>, vector<1x9x18xf32>
    %93 = vector.shape_cast %92 : vector<1x9x18xf32> to vector<9x18xf32>
    %cst_32 = arith.constant dense<0.000000e+00> : vector<16x18xf32>
    %94 = tpu.matmul %91, %93, %cst_32 {dimension_numbers = #tpu.dot_dimension_numbers<[1], [0], [0], [1], [0, 0, 1, 1], [], []>} : vector<16x9xf32>, vector<9x18xf32>, vector<16x18xf32> -> vector<16x18xf32>
    %c1_33 = arith.constant 1 : index
    %c0_34 = arith.constant 0 : index
    %c0_35 = arith.constant 0 : index
    %95 = vector.load %arg5[%c1_33, %c0_34, %c0_35] : memref<4x1x18xf32, #tpu.memory_space<vmem>>, vector<1x1x18xf32>
    %96 = vector.shape_cast %95 : vector<1x1x18xf32> to vector<1x18xf32>
    %97 = vector.broadcast %96 : vector<1x18xf32> to vector<16x18xf32>
    %98 = arith.addf %94, %97 : vector<16x18xf32>
    %99 = vector.extract_strided_slice %98 {offsets = [0, 0], sizes = [16, 9], strides = [1, 1]} : vector<16x18xf32> to vector<16x9xf32>
    %100 = vector.extract_strided_slice %98 {offsets = [0, 9], sizes = [16, 9], strides = [1, 1]} : vector<16x18xf32> to vector<16x9xf32>
    %101 = vector.extract_strided_slice %99 {offsets = [0, 0], sizes = [8, 9], strides = [1, 1]} : vector<16x9xf32> to vector<8x9xf32>
    %102 = vector.extract_strided_slice %14 {offsets = [0, 0], sizes = [8, 9], strides = [1, 1]} : vector<16x9xf32> to vector<8x9xf32>
    %103 = vector.extract_strided_slice %18 {offsets = [0, 0], sizes = [8, 9], strides = [1, 1]} : vector<16x9xf32> to vector<8x9xf32>
    %104 = vector.shape_cast %101 : vector<8x9xf32> to vector<8x1x9xf32>
    %105 = vector.shape_cast %102 : vector<8x9xf32> to vector<1x8x9xf32>
    %106 = vector.broadcast %104 : vector<8x1x9xf32> to vector<8x8x9xf32>
    %107 = vector.broadcast %105 : vector<1x8x9xf32> to vector<8x8x9xf32>
    %108 = arith.mulf %106, %107 : vector<8x8x9xf32>
    %109 = vector.broadcast %29 : vector<1x8x9xf32> to vector<8x8x9xf32>
    %110 = arith.addf %108, %109 : vector<8x8x9xf32>
    %cst_36 = arith.constant dense<0xFF800000> : vector<8x9xf32>
    %111 = vector.multi_reduction <maximumf>, %110, %cst_36 [1] : vector<8x8x9xf32> to vector<8x9xf32>
    %112 = vector.shape_cast %111 : vector<8x9xf32> to vector<8x1x9xf32>
    %113 = vector.broadcast %112 : vector<8x1x9xf32> to vector<8x8x9xf32>
    %114 = arith.subf %110, %113 : vector<8x8x9xf32>
    %115 = math.exp %114 : vector<8x8x9xf32>
    %cst_37 = arith.constant dense<0.000000e+00> : vector<8x9xf32>
    %116 = vector.multi_reduction <add>, %115, %cst_37 [1] : vector<8x8x9xf32> to vector<8x9xf32>
    %117 = vector.shape_cast %116 : vector<8x9xf32> to vector<8x1x9xf32>
    %118 = tpu.reciprocal %117 {approx = true} : vector<8x1x9xf32> -> vector<8x1x9xf32>
    %119 = vector.broadcast %118 : vector<8x1x9xf32> to vector<8x8x9xf32>
    %120 = arith.mulf %115, %119 : vector<8x8x9xf32>
    %121 = vector.shape_cast %103 : vector<8x9xf32> to vector<1x8x9xf32>
    %122 = vector.broadcast %121 : vector<1x8x9xf32> to vector<8x8x9xf32>
    %123 = arith.mulf %120, %122 : vector<8x8x9xf32>
    %cst_38 = arith.constant dense<0.000000e+00> : vector<8x9xf32>
    %124 = vector.multi_reduction <add>, %123, %cst_38 [1] : vector<8x8x9xf32> to vector<8x9xf32>
    %125 = vector.extract_strided_slice %99 {offsets = [8, 0], sizes = [8, 9], strides = [1, 1]} : vector<16x9xf32> to vector<8x9xf32>
    %126 = vector.extract_strided_slice %14 {offsets = [8, 0], sizes = [8, 9], strides = [1, 1]} : vector<16x9xf32> to vector<8x9xf32>
    %127 = vector.extract_strided_slice %18 {offsets = [8, 0], sizes = [8, 9], strides = [1, 1]} : vector<16x9xf32> to vector<8x9xf32>
    %128 = vector.shape_cast %125 : vector<8x9xf32> to vector<8x1x9xf32>
    %129 = vector.shape_cast %126 : vector<8x9xf32> to vector<1x8x9xf32>
    %130 = vector.broadcast %128 : vector<8x1x9xf32> to vector<8x8x9xf32>
    %131 = vector.broadcast %129 : vector<1x8x9xf32> to vector<8x8x9xf32>
    %132 = arith.mulf %130, %131 : vector<8x8x9xf32>
    %133 = vector.broadcast %29 : vector<1x8x9xf32> to vector<8x8x9xf32>
    %134 = arith.addf %132, %133 : vector<8x8x9xf32>
    %cst_39 = arith.constant dense<0xFF800000> : vector<8x9xf32>
    %135 = vector.multi_reduction <maximumf>, %134, %cst_39 [1] : vector<8x8x9xf32> to vector<8x9xf32>
    %136 = vector.shape_cast %135 : vector<8x9xf32> to vector<8x1x9xf32>
    %137 = vector.broadcast %136 : vector<8x1x9xf32> to vector<8x8x9xf32>
    %138 = arith.subf %134, %137 : vector<8x8x9xf32>
    %139 = math.exp %138 : vector<8x8x9xf32>
    %cst_40 = arith.constant dense<0.000000e+00> : vector<8x9xf32>
    %140 = vector.multi_reduction <add>, %139, %cst_40 [1] : vector<8x8x9xf32> to vector<8x9xf32>
    %141 = vector.shape_cast %140 : vector<8x9xf32> to vector<8x1x9xf32>
    %142 = tpu.reciprocal %141 {approx = true} : vector<8x1x9xf32> -> vector<8x1x9xf32>
    %143 = vector.broadcast %142 : vector<8x1x9xf32> to vector<8x8x9xf32>
    %144 = arith.mulf %139, %143 : vector<8x8x9xf32>
    %145 = vector.shape_cast %127 : vector<8x9xf32> to vector<1x8x9xf32>
    %146 = vector.broadcast %145 : vector<1x8x9xf32> to vector<8x8x9xf32>
    %147 = arith.mulf %144, %146 : vector<8x8x9xf32>
    %cst_41 = arith.constant dense<0.000000e+00> : vector<8x9xf32>
    %148 = vector.multi_reduction <add>, %147, %cst_41 [1] : vector<8x8x9xf32> to vector<8x9xf32>
    %149 = tpu.concatenate %124, %148 in 0 : vector<8x9xf32>, vector<8x9xf32> -> vector<16x9xf32>
    %c1_42 = arith.constant 1 : index
    %c0_43 = arith.constant 0 : index
    %c0_44 = arith.constant 0 : index
    %150 = vector.load %arg6[%c1_42, %c0_43, %c0_44] : memref<4x9x9xf32, #tpu.memory_space<vmem>>, vector<1x9x9xf32>
    %151 = vector.shape_cast %150 : vector<1x9x9xf32> to vector<9x9xf32>
    %cst_45 = arith.constant dense<0.000000e+00> : vector<16x9xf32>
    %152 = tpu.matmul %149, %151, %cst_45 {dimension_numbers = #tpu.dot_dimension_numbers<[1], [0], [0], [1], [0, 0, 1, 1], [], []>} : vector<16x9xf32>, vector<9x9xf32>, vector<16x9xf32> -> vector<16x9xf32>
    %153 = arith.addf %152, %100 : vector<16x9xf32>
    %c2 = arith.constant 2 : index
    %c0_46 = arith.constant 0 : index
    %c0_47 = arith.constant 0 : index
    %154 = vector.load %arg4[%c2, %c0_46, %c0_47] : memref<4x9x18xf32, #tpu.memory_space<vmem>>, vector<1x9x18xf32>
    %155 = vector.shape_cast %154 : vector<1x9x18xf32> to vector<9x18xf32>
    %cst_48 = arith.constant dense<0.000000e+00> : vector<16x18xf32>
    %156 = tpu.matmul %153, %155, %cst_48 {dimension_numbers = #tpu.dot_dimension_numbers<[1], [0], [0], [1], [0, 0, 1, 1], [], []>} : vector<16x9xf32>, vector<9x18xf32>, vector<16x18xf32> -> vector<16x18xf32>
    %c2_49 = arith.constant 2 : index
    %c0_50 = arith.constant 0 : index
    %c0_51 = arith.constant 0 : index
    %157 = vector.load %arg5[%c2_49, %c0_50, %c0_51] : memref<4x1x18xf32, #tpu.memory_space<vmem>>, vector<1x1x18xf32>
    %158 = vector.shape_cast %157 : vector<1x1x18xf32> to vector<1x18xf32>
    %159 = vector.broadcast %158 : vector<1x18xf32> to vector<16x18xf32>
    %160 = arith.addf %156, %159 : vector<16x18xf32>
    %161 = vector.extract_strided_slice %160 {offsets = [0, 0], sizes = [16, 9], strides = [1, 1]} : vector<16x18xf32> to vector<16x9xf32>
    %162 = vector.extract_strided_slice %160 {offsets = [0, 9], sizes = [16, 9], strides = [1, 1]} : vector<16x18xf32> to vector<16x9xf32>
    %163 = vector.extract_strided_slice %161 {offsets = [0, 0], sizes = [8, 9], strides = [1, 1]} : vector<16x9xf32> to vector<8x9xf32>
    %164 = vector.extract_strided_slice %15 {offsets = [0, 0], sizes = [8, 9], strides = [1, 1]} : vector<16x9xf32> to vector<8x9xf32>
    %165 = vector.extract_strided_slice %19 {offsets = [0, 0], sizes = [8, 9], strides = [1, 1]} : vector<16x9xf32> to vector<8x9xf32>
    %166 = vector.shape_cast %163 : vector<8x9xf32> to vector<8x1x9xf32>
    %167 = vector.shape_cast %164 : vector<8x9xf32> to vector<1x8x9xf32>
    %168 = vector.broadcast %166 : vector<8x1x9xf32> to vector<8x8x9xf32>
    %169 = vector.broadcast %167 : vector<1x8x9xf32> to vector<8x8x9xf32>
    %170 = arith.mulf %168, %169 : vector<8x8x9xf32>
    %171 = vector.broadcast %29 : vector<1x8x9xf32> to vector<8x8x9xf32>
    %172 = arith.addf %170, %171 : vector<8x8x9xf32>
    %cst_52 = arith.constant dense<0xFF800000> : vector<8x9xf32>
    %173 = vector.multi_reduction <maximumf>, %172, %cst_52 [1] : vector<8x8x9xf32> to vector<8x9xf32>
    %174 = vector.shape_cast %173 : vector<8x9xf32> to vector<8x1x9xf32>
    %175 = vector.broadcast %174 : vector<8x1x9xf32> to vector<8x8x9xf32>
    %176 = arith.subf %172, %175 : vector<8x8x9xf32>
    %177 = math.exp %176 : vector<8x8x9xf32>
    %cst_53 = arith.constant dense<0.000000e+00> : vector<8x9xf32>
    %178 = vector.multi_reduction <add>, %177, %cst_53 [1] : vector<8x8x9xf32> to vector<8x9xf32>
    %179 = vector.shape_cast %178 : vector<8x9xf32> to vector<8x1x9xf32>
    %180 = tpu.reciprocal %179 {approx = true} : vector<8x1x9xf32> -> vector<8x1x9xf32>
    %181 = vector.broadcast %180 : vector<8x1x9xf32> to vector<8x8x9xf32>
    %182 = arith.mulf %177, %181 : vector<8x8x9xf32>
    %183 = vector.shape_cast %165 : vector<8x9xf32> to vector<1x8x9xf32>
    %184 = vector.broadcast %183 : vector<1x8x9xf32> to vector<8x8x9xf32>
    %185 = arith.mulf %182, %184 : vector<8x8x9xf32>
    %cst_54 = arith.constant dense<0.000000e+00> : vector<8x9xf32>
    %186 = vector.multi_reduction <add>, %185, %cst_54 [1] : vector<8x8x9xf32> to vector<8x9xf32>
    %187 = vector.extract_strided_slice %161 {offsets = [8, 0], sizes = [8, 9], strides = [1, 1]} : vector<16x9xf32> to vector<8x9xf32>
    %188 = vector.extract_strided_slice %15 {offsets = [8, 0], sizes = [8, 9], strides = [1, 1]} : vector<16x9xf32> to vector<8x9xf32>
    %189 = vector.extract_strided_slice %19 {offsets = [8, 0], sizes = [8, 9], strides = [1, 1]} : vector<16x9xf32> to vector<8x9xf32>
    %190 = vector.shape_cast %187 : vector<8x9xf32> to vector<8x1x9xf32>
    %191 = vector.shape_cast %188 : vector<8x9xf32> to vector<1x8x9xf32>
    %192 = vector.broadcast %190 : vector<8x1x9xf32> to vector<8x8x9xf32>
    %193 = vector.broadcast %191 : vector<1x8x9xf32> to vector<8x8x9xf32>
    %194 = arith.mulf %192, %193 : vector<8x8x9xf32>
    %195 = vector.broadcast %29 : vector<1x8x9xf32> to vector<8x8x9xf32>
    %196 = arith.addf %194, %195 : vector<8x8x9xf32>
    %cst_55 = arith.constant dense<0xFF800000> : vector<8x9xf32>
    %197 = vector.multi_reduction <maximumf>, %196, %cst_55 [1] : vector<8x8x9xf32> to vector<8x9xf32>
    %198 = vector.shape_cast %197 : vector<8x9xf32> to vector<8x1x9xf32>
    %199 = vector.broadcast %198 : vector<8x1x9xf32> to vector<8x8x9xf32>
    %200 = arith.subf %196, %199 : vector<8x8x9xf32>
    %201 = math.exp %200 : vector<8x8x9xf32>
    %cst_56 = arith.constant dense<0.000000e+00> : vector<8x9xf32>
    %202 = vector.multi_reduction <add>, %201, %cst_56 [1] : vector<8x8x9xf32> to vector<8x9xf32>
    %203 = vector.shape_cast %202 : vector<8x9xf32> to vector<8x1x9xf32>
    %204 = tpu.reciprocal %203 {approx = true} : vector<8x1x9xf32> -> vector<8x1x9xf32>
    %205 = vector.broadcast %204 : vector<8x1x9xf32> to vector<8x8x9xf32>
    %206 = arith.mulf %201, %205 : vector<8x8x9xf32>
    %207 = vector.shape_cast %189 : vector<8x9xf32> to vector<1x8x9xf32>
    %208 = vector.broadcast %207 : vector<1x8x9xf32> to vector<8x8x9xf32>
    %209 = arith.mulf %206, %208 : vector<8x8x9xf32>
    %cst_57 = arith.constant dense<0.000000e+00> : vector<8x9xf32>
    %210 = vector.multi_reduction <add>, %209, %cst_57 [1] : vector<8x8x9xf32> to vector<8x9xf32>
    %211 = tpu.concatenate %186, %210 in 0 : vector<8x9xf32>, vector<8x9xf32> -> vector<16x9xf32>
    %c2_58 = arith.constant 2 : index
    %c0_59 = arith.constant 0 : index
    %c0_60 = arith.constant 0 : index
    %212 = vector.load %arg6[%c2_58, %c0_59, %c0_60] : memref<4x9x9xf32, #tpu.memory_space<vmem>>, vector<1x9x9xf32>
    %213 = vector.shape_cast %212 : vector<1x9x9xf32> to vector<9x9xf32>
    %cst_61 = arith.constant dense<0.000000e+00> : vector<16x9xf32>
    %214 = tpu.matmul %211, %213, %cst_61 {dimension_numbers = #tpu.dot_dimension_numbers<[1], [0], [0], [1], [0, 0, 1, 1], [], []>} : vector<16x9xf32>, vector<9x9xf32>, vector<16x9xf32> -> vector<16x9xf32>
    %215 = arith.addf %214, %162 : vector<16x9xf32>
    %c3 = arith.constant 3 : index
    %c0_62 = arith.constant 0 : index
    %c0_63 = arith.constant 0 : index
    %216 = vector.load %arg4[%c3, %c0_62, %c0_63] : memref<4x9x18xf32, #tpu.memory_space<vmem>>, vector<1x9x18xf32>
    %217 = vector.shape_cast %216 : vector<1x9x18xf32> to vector<9x18xf32>
    %cst_64 = arith.constant dense<0.000000e+00> : vector<16x18xf32>
    %218 = tpu.matmul %215, %217, %cst_64 {dimension_numbers = #tpu.dot_dimension_numbers<[1], [0], [0], [1], [0, 0, 1, 1], [], []>} : vector<16x9xf32>, vector<9x18xf32>, vector<16x18xf32> -> vector<16x18xf32>
    %c3_65 = arith.constant 3 : index
    %c0_66 = arith.constant 0 : index
    %c0_67 = arith.constant 0 : index
    %219 = vector.load %arg5[%c3_65, %c0_66, %c0_67] : memref<4x1x18xf32, #tpu.memory_space<vmem>>, vector<1x1x18xf32>
    %220 = vector.shape_cast %219 : vector<1x1x18xf32> to vector<1x18xf32>
    %221 = vector.broadcast %220 : vector<1x18xf32> to vector<16x18xf32>
    %222 = arith.addf %218, %221 : vector<16x18xf32>
    %223 = vector.extract_strided_slice %222 {offsets = [0, 0], sizes = [16, 9], strides = [1, 1]} : vector<16x18xf32> to vector<16x9xf32>
    %224 = vector.extract_strided_slice %222 {offsets = [0, 9], sizes = [16, 9], strides = [1, 1]} : vector<16x18xf32> to vector<16x9xf32>
    %225 = vector.extract_strided_slice %223 {offsets = [0, 0], sizes = [8, 9], strides = [1, 1]} : vector<16x9xf32> to vector<8x9xf32>
    %226 = vector.extract_strided_slice %16 {offsets = [0, 0], sizes = [8, 9], strides = [1, 1]} : vector<16x9xf32> to vector<8x9xf32>
    %227 = vector.extract_strided_slice %20 {offsets = [0, 0], sizes = [8, 9], strides = [1, 1]} : vector<16x9xf32> to vector<8x9xf32>
    %228 = vector.shape_cast %225 : vector<8x9xf32> to vector<8x1x9xf32>
    %229 = vector.shape_cast %226 : vector<8x9xf32> to vector<1x8x9xf32>
    %230 = vector.broadcast %228 : vector<8x1x9xf32> to vector<8x8x9xf32>
    %231 = vector.broadcast %229 : vector<1x8x9xf32> to vector<8x8x9xf32>
    %232 = arith.mulf %230, %231 : vector<8x8x9xf32>
    %233 = vector.broadcast %29 : vector<1x8x9xf32> to vector<8x8x9xf32>
    %234 = arith.addf %232, %233 : vector<8x8x9xf32>
    %cst_68 = arith.constant dense<0xFF800000> : vector<8x9xf32>
    %235 = vector.multi_reduction <maximumf>, %234, %cst_68 [1] : vector<8x8x9xf32> to vector<8x9xf32>
    %236 = vector.shape_cast %235 : vector<8x9xf32> to vector<8x1x9xf32>
    %237 = vector.broadcast %236 : vector<8x1x9xf32> to vector<8x8x9xf32>
    %238 = arith.subf %234, %237 : vector<8x8x9xf32>
    %239 = math.exp %238 : vector<8x8x9xf32>
    %cst_69 = arith.constant dense<0.000000e+00> : vector<8x9xf32>
    %240 = vector.multi_reduction <add>, %239, %cst_69 [1] : vector<8x8x9xf32> to vector<8x9xf32>
    %241 = vector.shape_cast %240 : vector<8x9xf32> to vector<8x1x9xf32>
    %242 = tpu.reciprocal %241 {approx = true} : vector<8x1x9xf32> -> vector<8x1x9xf32>
    %243 = vector.broadcast %242 : vector<8x1x9xf32> to vector<8x8x9xf32>
    %244 = arith.mulf %239, %243 : vector<8x8x9xf32>
    %245 = vector.shape_cast %227 : vector<8x9xf32> to vector<1x8x9xf32>
    %246 = vector.broadcast %245 : vector<1x8x9xf32> to vector<8x8x9xf32>
    %247 = arith.mulf %244, %246 : vector<8x8x9xf32>
    %cst_70 = arith.constant dense<0.000000e+00> : vector<8x9xf32>
    %248 = vector.multi_reduction <add>, %247, %cst_70 [1] : vector<8x8x9xf32> to vector<8x9xf32>
    %249 = vector.extract_strided_slice %223 {offsets = [8, 0], sizes = [8, 9], strides = [1, 1]} : vector<16x9xf32> to vector<8x9xf32>
    %250 = vector.extract_strided_slice %16 {offsets = [8, 0], sizes = [8, 9], strides = [1, 1]} : vector<16x9xf32> to vector<8x9xf32>
    %251 = vector.extract_strided_slice %20 {offsets = [8, 0], sizes = [8, 9], strides = [1, 1]} : vector<16x9xf32> to vector<8x9xf32>
    %252 = vector.shape_cast %249 : vector<8x9xf32> to vector<8x1x9xf32>
    %253 = vector.shape_cast %250 : vector<8x9xf32> to vector<1x8x9xf32>
    %254 = vector.broadcast %252 : vector<8x1x9xf32> to vector<8x8x9xf32>
    %255 = vector.broadcast %253 : vector<1x8x9xf32> to vector<8x8x9xf32>
    %256 = arith.mulf %254, %255 : vector<8x8x9xf32>
    %257 = vector.broadcast %29 : vector<1x8x9xf32> to vector<8x8x9xf32>
    %258 = arith.addf %256, %257 : vector<8x8x9xf32>
    %cst_71 = arith.constant dense<0xFF800000> : vector<8x9xf32>
    %259 = vector.multi_reduction <maximumf>, %258, %cst_71 [1] : vector<8x8x9xf32> to vector<8x9xf32>
    %260 = vector.shape_cast %259 : vector<8x9xf32> to vector<8x1x9xf32>
    %261 = vector.broadcast %260 : vector<8x1x9xf32> to vector<8x8x9xf32>
    %262 = arith.subf %258, %261 : vector<8x8x9xf32>
    %263 = math.exp %262 : vector<8x8x9xf32>
    %cst_72 = arith.constant dense<0.000000e+00> : vector<8x9xf32>
    %264 = vector.multi_reduction <add>, %263, %cst_72 [1] : vector<8x8x9xf32> to vector<8x9xf32>
    %265 = vector.shape_cast %264 : vector<8x9xf32> to vector<8x1x9xf32>
    %266 = tpu.reciprocal %265 {approx = true} : vector<8x1x9xf32> -> vector<8x1x9xf32>
    %267 = vector.broadcast %266 : vector<8x1x9xf32> to vector<8x8x9xf32>
    %268 = arith.mulf %263, %267 : vector<8x8x9xf32>
    %269 = vector.shape_cast %251 : vector<8x9xf32> to vector<1x8x9xf32>
    %270 = vector.broadcast %269 : vector<1x8x9xf32> to vector<8x8x9xf32>
    %271 = arith.mulf %268, %270 : vector<8x8x9xf32>
    %cst_73 = arith.constant dense<0.000000e+00> : vector<8x9xf32>
    %272 = vector.multi_reduction <add>, %271, %cst_73 [1] : vector<8x8x9xf32> to vector<8x9xf32>
    %273 = tpu.concatenate %248, %272 in 0 : vector<8x9xf32>, vector<8x9xf32> -> vector<16x9xf32>
    %c3_74 = arith.constant 3 : index
    %c0_75 = arith.constant 0 : index
    %c0_76 = arith.constant 0 : index
    %274 = vector.load %arg6[%c3_74, %c0_75, %c0_76] : memref<4x9x9xf32, #tpu.memory_space<vmem>>, vector<1x9x9xf32>
    %275 = vector.shape_cast %274 : vector<1x9x9xf32> to vector<9x9xf32>
    %cst_77 = arith.constant dense<0.000000e+00> : vector<16x9xf32>
    %276 = tpu.matmul %273, %275, %cst_77 {dimension_numbers = #tpu.dot_dimension_numbers<[1], [0], [0], [1], [0, 0, 1, 1], [], []>} : vector<16x9xf32>, vector<9x9xf32>, vector<16x9xf32> -> vector<16x9xf32>
    %277 = arith.addf %276, %224 : vector<16x9xf32>
    %c0_78 = arith.constant 0 : index
    %c0_79 = arith.constant 0 : index
    %278 = vector.load %arg10[%c0_78, %c0_79] : memref<16x9xf32, #tpu.memory_space<vmem>>, vector<16x9xf32>
    tpu.vector_store %arg10[%c0_78, %c0_79], %277 {strides = array<i32>} : memref<16x9xf32, #tpu.memory_space<vmem>>, vector<16x9xf32>,
    return
  }
  func.func @transform_0(%arg0: i32) -> (i32, i32) {
    %c0_i32 = arith.constant 0 : i32
    %c0_i32_0 = arith.constant 0 : i32
    %c0_i32_1 = arith.constant 0 : i32
    return %c0_i32, %c0_i32_0 : i32, i32
  }
  func.func @transform_1(%arg0: i32) -> (i32, i32) {
    %c0_i32 = arith.constant 0 : i32
    %c0_i32_0 = arith.constant 0 : i32
    %c0_i32_1 = arith.constant 0 : i32
    return %c0_i32, %c0_i32_0 : i32, i32
  }
  func.func @transform_2(%arg0: i32) -> (i32, i32) {
    %c0_i32 = arith.constant 0 : i32
    %c0_i32_0 = arith.constant 0 : i32
    %c0_i32_1 = arith.constant 0 : i32
    return %c0_i32, %c0_i32_0 : i32, i32
  }
  func.func @transform_3(%arg0: i32) -> (i32, i32, i32) {
    %c0_i32 = arith.constant 0 : i32
    %c0_i32_0 = arith.constant 0 : i32
    %c0_i32_1 = arith.constant 0 : i32
    %c0_i32_2 = arith.constant 0 : i32
    return %c0_i32, %c0_i32_0, %c0_i32_1 : i32, i32, i32
  }
  func.func @transform_4(%arg0: i32) -> (i32, i32, i32) {
    %c0_i32 = arith.constant 0 : i32
    %c0_i32_0 = arith.constant 0 : i32
    %c0_i32_1 = arith.constant 0 : i32
    %c0_i32_2 = arith.constant 0 : i32
    return %c0_i32, %c0_i32_0, %c0_i32_1 : i32, i32, i32
  }
  func.func @transform_5(%arg0: i32) -> (i32, i32, i32) {
    %c0_i32 = arith.constant 0 : i32
    %c0_i32_0 = arith.constant 0 : i32
    %c0_i32_1 = arith.constant 0 : i32
    %c0_i32_2 = arith.constant 0 : i32
    return %c0_i32, %c0_i32_0, %c0_i32_1 : i32, i32, i32
  }
  func.func @transform_6(%arg0: i32) -> (i32, i32) {
    %c0_i32 = arith.constant 0 : i32
    %c0_i32_0 = arith.constant 0 : i32
    %c0_i32_1 = arith.constant 0 : i32
    return %c0_i32, %c0_i32_0 : i32, i32
  }
  func.func @transform_7(%arg0: i32) -> (i32, i32) {
    %c0_i32 = arith.constant 0 : i32
    %c0_i32_0 = arith.constant 0 : i32
    %c0_i32_1 = arith.constant 0 : i32
    return %c0_i32, %c0_i32_0 : i32, i32
  }
  func.func @transform_8(%arg0: i32) -> (i32, i32) {
    %c0_i32 = arith.constant 0 : i32
    %c0_i32_0 = arith.constant 0 : i32
    %c0_i32_1 = arith.constant 0 : i32
    return %c0_i32, %c0_i32_0 : i32, i32
  }
  func.func @transform_9(%arg0: i32) -> (i32, i32) {
    %c0_i32 = arith.constant 0 : i32
    %c0_i32_0 = arith.constant 0 : i32
    %c0_i32_1 = arith.constant 0 : i32
    return %c0_i32, %c0_i32_0 : i32, i32
  }
}

</mosaic_0001>

<bundles_post_ra>
// kernel: conditional_transformer_diffuser.1
= control target key start
LH: loop header
LB: loop body
LE: loop exit
PB: predicated region body
PF: predicated region fallthrough
CT: control target
= control target key end

     0   :  { %vm65_vm0 = vcmask 1046528   ;;  %vm58_vm1 = vcmask 56320   ;;  %vm173_vm2 = vcmask 1040384   ;;  %vm166_vm3 = vcmask 72704   ;;  %s4118_s11 = smov 110   ;;  %s4119_s12 = smov 101   ;;  %s5671_s6 = inlined_call_operand.vmem [shape: f32[7,72], index: 6, kind: input, shape index: {}]   ;;  %s5672_s1 = inlined_call_operand.vmem [shape: f32[16,7], index: 1, kind: input, shape index: {}]   ;;  %s5673_s3 = inlined_call_operand.vmem [shape: f32[4,9,18], index: 3, kind: input, shape index: {}]   ;;  %s5674_s0 = inlined_call_operand.vmem [shape: f32[16,9], index: 0, kind: input, shape index: {}]   ;;  %s5675_s2 = inlined_call_operand.vmem [shape: f32[16,1], index: 2, kind: input, shape index: {}]   ;;  %s5676_s7 = inlined_call_operand.vmem [shape: f32[1,72], index: 7, kind: input, shape index: {}]   ;;  %s5677_s8 = inlined_call_operand.vmem [shape: f32[1,72], index: 8, kind: input, shape index: {}]   ;;  %s5678_s4 = inlined_call_operand.vmem [shape: f32[4,1,18], index: 4, kind: input, shape index: {}]   ;;  %s5679_s5 = inlined_call_operand.vmem [shape: f32[4,9,9], index: 5, kind: input, shape index: {}]   ;;  %s5680_s9 = inlined_call_operand.vmem [shape: f32[16,9], index: 9, kind: output, shape index: {}]  }
   0x1   :  { %v38_v0 = vld [vmem:[%s5671_s6] sm:$0x7f]  ;;  %v35_v2 = vld [vmem:[%s5672_s1 + $0x8] sm:$0xff]  ;;  %vm4113_vm4 = vmmov 1   ;;  %v4114_v8 = vmov 0   ;;  %v153_v14 = vlaneseq  ;;  %vm912_vm7 = vcmask 1041409  }
   0x2   :  { %v34_v1 = vld [vmem:[%s5672_s1] sm:$0xff]  ;;  %3736 = vmatprep.subr.msk.mxu0 %vm65_vm0, %v38_v0  ;;  %v158_v4 = vld [vmem:[%s5673_s3 + $0x8] sm:$0x1]  ;;  %vm4191_vm5 = vmpackc.low %vm173_vm2, %vm4113_vm4  ;;  %3856 = vset.pattern.permute.xlu0 %v4114_v8  ;;  %v4115_v15 = vmov 1966171168   ;;  %vm914_vm8 = vcmask 1042434  }
   0x3   :  { %3738 = vmatprep.mubr.msk.f32.mxu0 %vm58_vm1, %v34_v1  ;;  %v157_v3 = vld [vmem:[%s5673_s3] sm:$0xff]  ;;  %3737 = vmatpush3.msk.msra.mxu0 %vm65_vm0, %v38_v0  ;;  %v33_v10 = vld [vmem:[%s5674_s0 + $0x8] sm:$0xff]  ;;  %v255_v16 = vunpack.c.l.s4 %v4115_v15  ;;  %v154_v21 = vshrl.u32 %v153_v14, 7  ;;  %v4117_v52 = vmov -1e+30   ;;  %vm916_vm9 = vcmask 1043459  }
   0x4   :  { %v3797_v6 = vpack.c.bf16 %v158_v4, %v157_v3  ;;  %v32_v7 = vld [vmem:[%s5674_s0] sm:$0xff]  ;;  %3739 = vmatmul.mubr.msk.f32.vlgmr.msra.gmra.mrb[0].mxu0 %vm58_vm1, %v35_v2  ;;  %v37_v11 = vld [vmem:[%s5675_s2 + $0x8] sm:$0xff]  ;;  %vm918_vm10 = vcmask 1044484   ;;  %vm920_vm11 = vcmask 1045509   ;;  %vm922_vm12 = vcmask 1046534   ;;  %s4120_s21 = smov 92  }
   0x5   :  { %v36_v9 = vld [vmem:[%s5675_s2] sm:$0xff]  ;;  %3745 = vmatprep.mubr.msk.f32.mxu1 %vm166_vm3, %v32_v7  ;;  %v256_v22 = vunpack.c.0.s8 %v255_v16  ;;  %vm155_vm6 = vcmp.lt.s32.totalorder %v154_v21, 5  ;;  %v4233_v37 = vsub.s32 0, %v154_v21  ;;  %v942_v41 = vld [vmem:[%s5679_s5 + $0x8] sm:$0x1]  ;;  %vm924_vm13 = vcmask 1047559  }
   0x6   :  { %3799 = vmatprep.subr.msk.bf16.mxu1 %vm4191_vm5, %v3797_v6  ;;  %42 = vperm.xlu0 %3856, %v36_v9   ;;  %v3653_v13 = vld [vmem:[%s5676_s7] ss:$0 sm:$0xff]  ;;  %s4116_s7 = smov 119   ;;  %v4255_v53 = vsel %vm155_vm6, 0.0, %v4117_v52  ;;  %s4121_s22 = smov 83  }
   0x7   :  { %3802 = vmatpush3.bf16.msk.msra.mxu1 %vm4191_vm5, %v3797_v6  ;;  %v3657_v23 = vld [vmem:[%s5677_s8] ss:$0 sm:$0xff]  ;;  %v4226_v29 = vsub.s32 %v256_v22, %v154_v21  ;;  %s4122_s30 = smov 74   ;;  %s4123_s10 = smov 65  }
   0x8   :  { %v3658_v26 = vld [vmem:[%s5678_s4] ss:$0 sm:$0xff] }
   0x9   :  { %v941_v40 = vld [vmem:[%s5679_s5] sm:$0xff] }
   0xa   :  { %3746 = vmatmul.mubr.msk.f32.vlgmr.msra.gmra.mrb[0].mxu1 %vm166_vm3, %v33_v10  ;;  %47 = vperm.xlu0 %3856, %v37_v11   ;;  %v3803_v45 = vpack.c.bf16 %v942_v41, %v941_v40 }
   0xc   :  { %3805 = vmatprep.subr.msk.bf16.mxu0 %vm4191_vm5, %v3803_v45 }
   0xd   :  { %3808 = vmatpush3.bf16.msk.msra.mxu0 %vm4191_vm5, %v3803_v45 }
  0x85   :  { %v43_v12 = vpop.permute.xlu0 %42 }
  0x86   :  { %v56_v18 = vmul.f32 %v3653_v13, %v43_v12 }
  0x89   :  { %v48_v17 = vpop.permute.xlu0 %47 }
  0x8a   :  { %v57_v19 = vmul.f32 %v3653_v13, %v48_v17 }
  0xd7   :  { %v3740_v20 = vpop.f32.mrb[0].mxu0 }
  0xd8   :  { %v135_v24 = vpop.f32.mrb[1].mxu0  ;;  %v141_v27 = vadd.f32 %v3740_v20, %v57_v19 }
  0xd9   :  { %v136_v25 = vadd.f32 %v135_v24, %v56_v18 }
  0xda   :  { %v4230_v34 = vadd.f32 %v3657_v23, %v141_v27 }
  0xdb   :  { %v4224_v28 = vadd.f32 %v3657_v23, %v136_v25 }
  0xdd   :  { %v3747_v30 = vpop.f32.mrb[0].mxu1  ;;  %511 = vrot.lane.b32.xlu1 %v4224_v28, %s4116_s7 }
  0xde   :  { %v249_v31 = vadd.f32 %v3747_v30, %v3658_v26  ;;  %v243_v32 = vpop.f32.mrb[1].mxu1 }
  0xdf   :  { %v244_v33 = vadd.f32 %v3658_v26, %v243_v32 }
  0xe0   :  { %v579_v35 = vcombine.high %v249_v31, %v249_v31  ;;  %v586_v36 = vrot.slane %v249_v31, %v4226_v29 }
  0xe1   :  { %v253_v38 = vcombine.high %v244_v33, %v244_v33  ;;  %v260_v39 = vrot.slane %v244_v33, %v4226_v29  ;;  %943 = vrot.lane.b32.xlu0 %v244_v33, %s4116_s7  ;;  %837 = vrot.lane.b32.xlu1 %v4230_v34, %s4116_s7 }
  0xe2   :  { %v593_v42 = vrot.slane %v579_v35, %v4226_v29  ;;  %v594_v43 = vcombine.high %v586_v36, %v586_v36  ;;  %v602_v44 = vrot.slane %v586_v36, %v4226_v29 }
  0xe3   :  { %v4248_v46 = vrot.slane %v253_v38, %v4226_v29  ;;  %v268_v47 = vcombine.high %v260_v39, %v260_v39  ;;  %v4261_v56 = vrot.slane %v260_v39, %v4226_v29 }
  0xe4   :  { %v595_v48 = vcombine.high %v593_v42, %v593_v42  ;;  %v609_v49 = vrot.slane %v593_v42, %v4226_v29  ;;  %v616_v50 = vrot.slane %v594_v43, %v4226_v29  ;;  %v624_v51 = vcombine.high %v602_v44, %v602_v44 }
  0xe5   :  { %v631_v54 = vrot.slane %v602_v44, %v4233_v37  ;;  %v269_v55 = vcombine.high %v4248_v46, %v4248_v46  ;;  %1216 = vrot.lane.b32.xlu0 %v4224_v28, %s4118_s11  ;;  %945 = vrot.lane.b32.xlu1 %v249_v31, %s4116_s7  ;;  %v4271_v0 = vrot.slane %v268_v47, %v4226_v29 }
  0xe6   :  { %v623_v57 = vrot.slane %v595_v48, %v4226_v29  ;;  %v625_v58 = vcombine.high %v609_v49, %v609_v49  ;;  %v626_v59 = vcombine.high %v616_v50, %v616_v50  ;;  %v635_v60 = vrot.slane %v616_v50, %v4233_v37 }
  0xe7   :  { %v639_v61 = vrot.slane %v624_v51, %v4233_v37  ;;  %v647_v62 = vrot.slane %v609_v49, %v4233_v37  ;;  %v668_v63 = vmul.f32 %v631_v54, %v4230_v34 }
  0xe8   :  { %v627_v1 = vcombine.high %v623_v57, %v623_v57  ;;  %v643_v2 = vrot.slane %v626_v59, %v4233_v37  ;;  %v651_v3 = vrot.slane %v623_v57, %v4233_v37  ;;  %v655_v4 = vrot.slane %v625_v58, %v4233_v37 }
  0xe9   :  { %v669_v6 = vmul.f32 %v635_v60, %v4230_v34  ;;  %v670_v7 = vmul.f32 %v639_v61, %v4230_v34  ;;  %v672_v8 = vmul.f32 %v647_v62, %v4230_v34  ;;  %v4282_v9 = vadd.f32 %v668_v63, %v4255_v53  ;;  %1387 = vrot.lane.b32.xlu0 %v4224_v28, %s4119_s12 }
  0xea   :  { %v659_v10 = vrot.slane %v627_v1, %v4233_v37  ;;  %v671_v11 = vmul.f32 %v643_v2, %v4230_v34  ;;  %v673_v12 = vmul.f32 %v651_v3, %v4230_v34  ;;  %v674_v13 = vmul.f32 %v655_v4, %v4230_v34  ;;  %1544 = vrot.lane.b32.xlu1 %v4230_v34, %s4118_s11 }
  0xeb   :  { %v4291_v14 = vadd.f32 %v669_v6, %v4255_v53  ;;  %v4294_v15 = vadd.f32 %v670_v7, %v4255_v53  ;;  %v4297_v16 = vadd.f32 %v672_v8, %v4255_v53  ;;  %v684_v17 = vsel %vm166_vm3, %v4282_v9, -inf }
  0xec   :  { %v675_v18 = vmul.f32 %v659_v10, %v4230_v34  ;;  %v4303_v19 = vadd.f32 %v671_v11, %v4255_v53  ;;  %v4306_v20 = vadd.f32 %v673_v12, %v4255_v53  ;;  %v4309_v21 = vadd.f32 %v674_v13, %v4255_v53 }
  0xed   :  { %v685_v22 = vrot.slane %v684_v17, 4  ;;  %v691_v23 = vsel %vm166_vm3, %v4291_v14, -inf  ;;  %v698_v24 = vsel %vm166_vm3, %v4294_v15, -inf  ;;  %v712_v25 = vsel %vm166_vm3, %v4297_v16, -inf }
  0xee   :  { %v4318_v26 = vadd.f32 %v675_v18, %v4255_v53  ;;  %v692_v27 = vrot.slane %v691_v23, 4  ;;  %v699_v30 = vrot.slane %v698_v24, 4  ;;  %v705_v31 = vsel %vm166_vm3, %v4303_v19, -inf  ;;  %1715 = vrot.lane.b32.xlu1 %v4230_v34, %s4119_s12 }
  0xef   :  { %v686_v32 = vmax.f32 %v684_v17, %v685_v22  ;;  %v706_v33 = vrot.slane %v705_v31, 4  ;;  %v713_v35 = vrot.slane %v712_v25, 4  ;;  %v719_v36 = vsel %vm166_vm3, %v4306_v20, -inf }
  0xf0   :  { %v693_v38 = vmax.f32 %v691_v23, %v692_v27  ;;  %v700_v39 = vmax.f32 %v698_v24, %v699_v30  ;;  %v720_v40 = vrot.slane %v719_v36, 4  ;;  %v726_v41 = vsel %vm166_vm3, %v4309_v21, -inf }
  0xf1   :  { %v687_v42 = vrot.slane %v686_v32, 2  ;;  %v707_v43 = vmax.f32 %v705_v31, %v706_v33  ;;  %v714_v44 = vmax.f32 %v712_v25, %v713_v35  ;;  %v727_v45 = vrot.slane %v726_v41, 4 }
  0xf2   :  { %v694_v47 = vrot.slane %v693_v38, 2  ;;  %v701_v48 = vrot.slane %v700_v39, 2  ;;  %v721_v49 = vmax.f32 %v719_v36, %v720_v40  ;;  %v733_v50 = vsel %vm166_vm3, %v4318_v26, -inf }
  0xf3   :  { %v688_v51 = vmax.f32 %v686_v32, %v687_v42  ;;  %v708_v52 = vrot.slane %v707_v43, 2  ;;  %v715_v54 = vrot.slane %v714_v44, 2  ;;  %v728_v57 = vmax.f32 %v726_v41, %v727_v45 }
  0xf4   :  { %v695_v58 = vmax.f32 %v693_v38, %v694_v47  ;;  %v702_v59 = vmax.f32 %v700_v39, %v701_v48  ;;  %v722_v60 = vrot.slane %v721_v49, 2  ;;  %v734_v61 = vrot.slane %v733_v50, 4 }
  0xf5   :  { %v689_v62 = vrot.slane %v688_v51, 1  ;;  %v709_v63 = vmax.f32 %v707_v43, %v708_v52  ;;  %v716_v1 = vmax.f32 %v714_v44, %v715_v54  ;;  %v729_v2 = vrot.slane %v728_v57, 2 }
  0xf6   :  { %v696_v3 = vrot.slane %v695_v58, 1  ;;  %v703_v4 = vrot.slane %v702_v59, 1  ;;  %v723_v6 = vmax.f32 %v721_v49, %v722_v60  ;;  %v735_v7 = vmax.f32 %v733_v50, %v734_v61 }
  0xf7   :  { %v690_v8 = vmax.f32 %v688_v51, %v689_v62  ;;  %v710_v10 = vrot.slane %v709_v63, 1  ;;  %v717_v11 = vrot.slane %v716_v1, 1  ;;  %v730_v12 = vmax.f32 %v728_v57, %v729_v2 }
  0xf8   :  { %v697_v13 = vmax.f32 %v695_v58, %v696_v3  ;;  %v704_v17 = vmax.f32 %v702_v59, %v703_v4  ;;  %v724_v18 = vrot.slane %v723_v6, 1  ;;  %v736_v22 = vrot.slane %v735_v7, 2 }
  0xf9   :  { %v711_v23 = vmax.f32 %v709_v63, %v710_v10  ;;  %v718_v24 = vmax.f32 %v716_v1, %v717_v11  ;;  %v731_v25 = vrot.slane %v730_v12, 1  ;;  %v740_v27 = vsub.f32 %v4282_v9, %v690_v8 }
  0xfa   :  { %v725_v30 = vmax.f32 %v723_v6, %v724_v18  ;;  %v737_v31 = vmax.f32 %v735_v7, %v736_v22  ;;  %v741_v32 = vsub.f32 %v4291_v14, %v697_v13  ;;  %v742_v33 = vsub.f32 %v4294_v15, %v704_v17 }
  0xfb   :  { %v732_v35 = vmax.f32 %v730_v12, %v731_v25  ;;  %v743_v36 = vsub.f32 %v4303_v19, %v711_v23  ;;  %v744_v38 = vsub.f32 %v4297_v16, %v718_v24  ;;  %v748_v39 = vmul.f32 1.442695, %v740_v27 }
  0xfc   :  { %v738_v40 = vrot.slane %v737_v31, 1  ;;  %v745_v41 = vsub.f32 %v4306_v20, %v725_v30  ;;  %v750_v42 = vmul.f32 1.442695, %v741_v32  ;;  %v752_v43 = vmul.f32 1.442695, %v742_v33 }
  0xfd   :  { %v746_v44 = vsub.f32 %v4309_v21, %v732_v35  ;;  %3857 = vpow2.f32 %v748_v39  ;;  %v754_v9 = vmul.f32 1.442695, %v743_v36  ;;  %v756_v45 = vmul.f32 1.442695, %v744_v38 }
  0xfe   :  { %v739_v47 = vmax.f32 %v737_v31, %v738_v40  ;;  %3859 = vpow2.f32 %v750_v42  ;;  %v758_v14 = vmul.f32 1.442695, %v745_v41  ;;  %v298_v15 = vcombine.high %v4261_v56, %v4261_v56 }
  0xff   :  { %3861 = vpow2.f32 %v752_v43  ;;  %v760_v19 = vmul.f32 1.442695, %v746_v44  ;;  %v283_v20 = vrot.slane %v4248_v46, %v4226_v29  ;;  %v305_v21 = vrot.slane %v4261_v56, %v4233_v37 }
 0x100   :  { %v747_v16 = vsub.f32 %v4318_v26, %v739_v47  ;;  %3863 = vpow2.f32 %v754_v9  ;;  %v297_v48 = vrot.slane %v269_v55, %v4226_v29  ;;  %v309_v49 = vrot.slane %v4271_v0, %v4233_v37 }
 0x101   :  { %3865 = vpow2.f32 %v756_v45  ;;  %v300_v26 = vcombine.high %v4271_v0, %v4271_v0  ;;  %v313_v50 = vrot.slane %v298_v15, %v4233_v37  ;;  %v342_v51 = vmul.f32 %v305_v21, %v4224_v28 }
 0x102   :  { %3867 = vpow2.f32 %v758_v14  ;;  %v762_v52 = vmul.f32 1.442695, %v747_v16  ;;  %v299_v56 = vcombine.high %v283_v20, %v283_v20  ;;  %v343_v54 = vmul.f32 %v309_v49, %v4224_v28 }
 0x103   :  { %3869 = vpow2.f32 %v760_v19  ;;  %v301_v57 = vcombine.high %v297_v48, %v297_v48  ;;  %v317_v46 = vrot.slane %v300_v26, %v4233_v37  ;;  %v344_v55 = vmul.f32 %v313_v50, %v4224_v28 }
 0x104   :  { %v4357_v58 = vadd.f32 %v342_v51, %v4255_v53  ;;  %v4360_v59 = vadd.f32 %v343_v54, %v4255_v53  ;;  %v321_v60 = vrot.slane %v283_v20, %v4233_v37  ;;  %v325_v61 = vrot.slane %v297_v48, %v4233_v37 }
 0x105   :  { %3871 = vpow2.f32 %v762_v52  ;;  %v329_v1 = vrot.slane %v299_v56, %v4233_v37  ;;  %v333_v7 = vrot.slane %v301_v57, %v4233_v37  ;;  %v345_v13 = vmul.f32 %v317_v46, %v4224_v28 }
 0x106   :  { %v358_v2 = vsel %vm166_vm3, %v4357_v58, -inf  ;;  %v365_v8 = vsel %vm166_vm3, %v4360_v59, -inf  ;;  %v4386_v17 = vadd.f32 %v344_v55, %v4255_v53  ;;  %v346_v38 = vmul.f32 %v321_v60, %v4224_v28 }
 0x107   :  { %v4362_v0 = vpop.eup %3857  ;;  %v359_v25 = vrot.slane %v358_v2, 4  ;;  %v366_v33 = vrot.slane %v365_v8, 4  ;;  %v347_v39 = vmul.f32 %v325_v61, %v4224_v28  ;;  %v348_v41 = vmul.f32 %v329_v1, %v4224_v28 }
 0x108   :  { %v4366_v62 = vpop.eup %3859  ;;  %v764_v63 = vsel %vm166_vm3, %v4362_v0, 0.0  ;;  %v349_v42 = vmul.f32 %v333_v7, %v4224_v28  ;;  %v372_v43 = vsel %vm166_vm3, %v4386_v17, -inf  ;;  %v4409_v45 = vadd.f32 %v345_v13, %v4255_v53 }
 0x109   :  { %v4373_v3 = vpop.eup %3861  ;;  %v765_v4 = vrot.slane %v764_v63, 4  ;;  %v771_v6 = vsel %vm166_vm3, %v4366_v62, 0.0  ;;  %v360_v47 = vmax.f32 %v358_v2, %v359_v25  ;;  %v367_v16 = vmax.f32 %v365_v8, %v366_v33 }
 0x10a   :  { %v4380_v10 = vpop.eup %3863  ;;  %v772_v11 = vrot.slane %v771_v6, 4  ;;  %v778_v12 = vsel %vm166_vm3, %v4373_v3, 0.0  ;;  %v373_v48 = vrot.slane %v372_v43, 4  ;;  %v4422_v26 = vadd.f32 %v346_v38, %v4255_v53 }
 0x10b   :  { %v4388_v18 = vpop.eup %3865  ;;  %v766_v22 = vadd.f32 %v765_v4, %v764_v63  ;;  %v779_v23 = vrot.slane %v778_v12, 4  ;;  %v785_v24 = vsel %vm166_vm3, %v4380_v10, 0.0  ;;  %v4425_v50 = vadd.f32 %v347_v39, %v4255_v53 }
 0x10c   :  { %v4392_v27 = vpop.eup %3867  ;;  %v773_v30 = vadd.f32 %v772_v11, %v771_v6  ;;  %v786_v31 = vrot.slane %v785_v24, 4  ;;  %v792_v32 = vsel %vm166_vm3, %v4388_v18, 0.0  ;;  %v4428_v51 = vadd.f32 %v348_v41, %v4255_v53 }
 0x10d   :  { %v4396_v35 = vpop.eup %3869  ;;  %v767_v36 = vrot.slane %v766_v22, 2  ;;  %v799_v40 = vsel %vm166_vm3, %v4392_v27, 0.0  ;;  %v4406_v44 = vadd.f32 %v779_v23, %v778_v12  ;;  %v793_v9 = vrot.slane %v792_v32, 4 }
 0x10e   :  { %v774_v14 = vrot.slane %v773_v30, 2  ;;  %v4411_v15 = vadd.f32 %v786_v31, %v785_v24  ;;  %v4415_v19 = vsel %vm166_vm3, %v4396_v35, 0.0  ;;  %v800_v21 = vrot.slane %v799_v40, 4 }
 0x10f   :  { %v4417_v20 = vadd.f32 %v767_v36, %v766_v22  ;;  %v4419_v49 = vpop.eup %3871  ;;  %v4431_v52 = vadd.f32 %v349_v42, %v4255_v53  ;;  %v781_v56 = vrot.slane %v4406_v44, 2  ;;  %v4434_v54 = vadd.f32 %v793_v9, %v792_v32 }
 0x110   :  { %v807_v57 = vrot.slane %v4415_v19, 4  ;;  %v379_v46 = vsel %vm166_vm3, %v4409_v45, -inf  ;;  %v4439_v55 = vadd.f32 %v774_v14, %v773_v30  ;;  %v788_v60 = vrot.slane %v4411_v15, 2 }
 0x111   :  { %v361_v61 = vrot.slane %v360_v47, 2  ;;  %v368_v63 = vrot.slane %v367_v16, 2  ;;  %v769_v1 = vrot.slane %v4417_v20, 1  ;;  %v4443_v2 = vadd.f32 %v800_v21, %v799_v40 }
 0x112   :  { %v4447_v4 = vsel %vm166_vm3, %v4419_v49, 0.0  ;;  %v374_v6 = vmax.f32 %v372_v43, %v373_v48  ;;  %v380_v11 = vrot.slane %v379_v46, 4  ;;  %v386_v12 = vsel %vm166_vm3, %v4422_v26, -inf }
 0x113   :  { %v362_v7 = vmax.f32 %v360_v47, %v361_v61  ;;  %v369_v8 = vmax.f32 %v367_v16, %v368_v63  ;;  %v387_v22 = vrot.slane %v386_v12, 4  ;;  %v393_v23 = vsel %vm166_vm3, %v4425_v50, -inf }
 0x114   :  { %v375_v13 = vrot.slane %v374_v6, 2  ;;  %v400_v24 = vsel %vm166_vm3, %v4428_v51, -inf  ;;  %v381_v31 = vmax.f32 %v379_v46, %v380_v11  ;;  %v394_v32 = vrot.slane %v393_v23, 4 }
 0x115   :  { %v363_v25 = vrot.slane %v362_v7, 1  ;;  %v370_v30 = vrot.slane %v369_v8, 1  ;;  %v388_v36 = vmax.f32 %v386_v12, %v387_v22  ;;  %v401_v38 = vrot.slane %v400_v24, 4 }
 0x116   :  { %v376_v33 = vmax.f32 %v374_v6, %v375_v13  ;;  %v407_v39 = vsel %vm166_vm3, %v4431_v52, -inf  ;;  %v382_v42 = vrot.slane %v381_v31, 2  ;;  %v395_v43 = vmax.f32 %v393_v23, %v394_v32 }
 0x117   :  { %v364_v40 = vmax.f32 %v362_v7, %v363_v25  ;;  %v371_v41 = vmax.f32 %v369_v8, %v370_v30  ;;  %v389_v47 = vrot.slane %v388_v36, 2  ;;  %v402_v14 = vmax.f32 %v400_v24, %v401_v38 }
 0x118   :  { %v377_v9 = vrot.slane %v376_v33, 1  ;;  %v408_v16 = vrot.slane %v407_v39, 4  ;;  %v383_v21 = vmax.f32 %v381_v31, %v382_v42  ;;  %v396_v48 = vrot.slane %v395_v43, 2 }
 0x119   :  { %v414_v61 = vsub.f32 %v4357_v58, %v364_v40  ;;  %v415_v46 = vsub.f32 %v4360_v59, %v371_v41  ;;  %v390_v6 = vmax.f32 %v388_v36, %v389_v47  ;;  %v403_v11 = vrot.slane %v402_v14, 2 }
 0x11a   :  { %v378_v63 = vmax.f32 %v376_v33, %v377_v9  ;;  %v409_v12 = vmax.f32 %v407_v39, %v408_v16  ;;  %v384_v13 = vrot.slane %v383_v21, 1  ;;  %v397_v22 = vmax.f32 %v395_v43, %v396_v48 }
 0x11b   :  { %v422_v7 = vmul.f32 1.442695, %v414_v61  ;;  %v424_v8 = vmul.f32 1.442695, %v415_v46  ;;  %v391_v25 = vrot.slane %v390_v6, 1  ;;  %v404_v23 = vmax.f32 %v402_v14, %v403_v11 }
 0x11c   :  { %v410_v30 = vrot.slane %v409_v12, 2  ;;  %v416_v24 = vsub.f32 %v4386_v17, %v378_v63  ;;  %v782_v31 = vadd.f32 %v781_v56, %v4406_v44  ;;  %v385_v32 = vmax.f32 %v383_v21, %v384_v13 }
 0x11d   :  { %v398_v38 = vrot.slane %v397_v22, 1  ;;  %3873 = vpow2.f32 %v422_v7  ;;  %v392_v58 = vmax.f32 %v390_v6, %v391_v25  ;;  %v405_v59 = vrot.slane %v404_v23, 1 }
 0x11e   :  { %v411_v33 = vmax.f32 %v409_v12, %v410_v30  ;;  %3875 = vpow2.f32 %v424_v8  ;;  %v795_v36 = vrot.slane %v4434_v54, 2  ;;  %v417_v40 = vsub.f32 %v4409_v45, %v385_v32 }
 0x11f   :  { %v399_v39 = vmax.f32 %v397_v22, %v398_v38  ;;  %v426_v41 = vmul.f32 1.442695, %v416_v24  ;;  %v808_v42 = vadd.f32 %v807_v57, %v4415_v19  ;;  %v406_v43 = vmax.f32 %v404_v23, %v405_v59 }
 0x120   :  { %v412_v9 = vrot.slane %v411_v33, 1  ;;  %v418_v17 = vsub.f32 %v4422_v26, %v392_v58  ;;  %v814_v44 = vrot.slane %v4447_v4, 4  ;;  %v428_v47 = vmul.f32 1.442695, %v417_v40 }
 0x121   :  { %v419_v56 = vsub.f32 %v4425_v50, %v399_v39  ;;  %3877 = vpow2.f32 %v426_v41  ;;  %v802_v14 = vrot.slane %v4443_v2, 2  ;;  %v420_v21 = vsub.f32 %v4428_v51, %v406_v43 }
 0x122   :  { %v413_v16 = vmax.f32 %v411_v33, %v412_v9  ;;  %v430_v48 = vmul.f32 1.442695, %v418_v17  ;;  %v789_v45 = vadd.f32 %v788_v60, %v4411_v15  ;;  %v796_v19 = vadd.f32 %v795_v36, %v4434_v54 }
 0x123   :  { %3879 = vpow2.f32 %v428_v47  ;;  %v432_v26 = vmul.f32 1.442695, %v419_v56  ;;  %v809_v57 = vrot.slane %v808_v42, 2  ;;  %v434_v50 = vmul.f32 1.442695, %v420_v21 }
 0x124   :  { %v421_v61 = vsub.f32 %v4431_v52, %v413_v16  ;;  %3881 = vpow2.f32 %v430_v48  ;;  %v776_v46 = vrot.slane %v4439_v55, 1  ;;  %v815_v63 = vadd.f32 %v814_v44, %v4447_v4 }
 0x125   :  { %3883 = vpow2.f32 %v432_v26  ;;  %v783_v51 = vrot.slane %v782_v31, 1  ;;  %v803_v6 = vadd.f32 %v802_v14, %v4443_v2  ;;  %v770_v54 = vadd.f32 %v769_v1, %v4417_v20 }
 0x126   :  { %3885 = vpow2.f32 %v434_v50  ;;  %v436_v11 = vmul.f32 1.442695, %v421_v61  ;;  %v797_v60 = vrot.slane %v796_v19, 1  ;;  %v810_v12 = vadd.f32 %v809_v57, %v808_v42 }
 0x127   :  { %v4477_v15 = vpop.eup %3873  ;;  %v790_v13 = vrot.slane %v789_v45, 1  ;;  %v777_v7 = vadd.f32 %v776_v46, %v4439_v55  ;;  %v816_v8 = vrot.slane %v815_v63, 2  ;;  %v784_v23 = vadd.f32 %v783_v51, %v782_v31 }
 0x128   :  { %v4482_v52 = vpop.eup %3875  ;;  %3887 = vpow2.f32 %v436_v11  ;;  %v438_v4 = vsel %vm166_vm3, %v4477_v15, 0.0  ;;  %v804_v30 = vrot.slane %v803_v6, 1  ;;  %v798_v24 = vadd.f32 %v797_v60, %v796_v19 }
 0x129   :  { %v439_v22 = vrot.slane %v438_v4, 4  ;;  %v445_v2 = vsel %vm166_vm3, %v4482_v52, 0.0  ;;  %3889 = vrcp.f32 %v770_v54  ;;  %v791_v58 = vadd.f32 %v790_v13, %v789_v45 }
 0x12a   :  { %v446_v25 = vrot.slane %v445_v2, 4  ;;  %v811_v59 = vrot.slane %v810_v12, 1  ;;  %3891 = vrcp.f32 %v777_v7  ;;  %v817_v55 = vadd.f32 %v816_v8, %v815_v63 }
 0x12b   :  { %v4489_v20 = vpop.eup %3877  ;;  %v440_v1 = vadd.f32 %v439_v22, %v438_v4  ;;  %v805_v42 = vadd.f32 %v804_v30, %v803_v6  ;;  %3893 = vrcp.f32 %v784_v23 }
 0x12c   :  { %v447_v32 = vadd.f32 %v446_v25, %v445_v2  ;;  %v452_v38 = vsel %vm166_vm3, %v4489_v20, 0.0  ;;  %v812_v48 = vadd.f32 %v811_v59, %v810_v12  ;;  %v818_v57 = vrot.slane %v817_v55, 1 }
 0x12d   :  { %v4493_v33 = vpop.eup %3879  ;;  %v441_v36 = vrot.slane %v440_v1, 2  ;;  %v453_v39 = vrot.slane %v452_v38, 4  ;;  %3895 = vrcp.f32 %v791_v58 }
 0x12e   :  { %v4495_v40 = vpop.eup %3881  ;;  %v448_v31 = vrot.slane %v447_v32, 2  ;;  %v459_v41 = vsel %vm166_vm3, %v4493_v33, 0.0  ;;  %3897 = vrcp.f32 %v798_v24  ;;  %v819_v8 = vadd.f32 %v818_v57, %v817_v55 }
 0x12f   :  { %v4499_v43 = vpop.eup %3883  ;;  %v442_v9 = vadd.f32 %v441_v36, %v440_v1  ;;  %v454_v17 = vadd.f32 %v453_v39, %v452_v38  ;;  %v460_v44 = vrot.slane %v459_v41, 4  ;;  %v466_v56 = vsel %vm166_vm3, %v4495_v40, 0.0 }
 0x130   :  { %v4503_v47 = vpop.eup %3885  ;;  %v449_v14 = vadd.f32 %v448_v31, %v447_v32  ;;  %v467_v16 = vrot.slane %v466_v56, 4  ;;  %v473_v21 = vsel %vm166_vm3, %v4499_v43, 0.0  ;;  %3899 = vrcp.f32 %v805_v42 }
 0x131   :  { %v455_v45 = vrot.slane %v454_v17, 2  ;;  %v461_v19 = vadd.f32 %v460_v44, %v459_v41  ;;  %v474_v26 = vrot.slane %v473_v21, 4  ;;  %v443_v50 = vrot.slane %v442_v9, 1 }
 0x132   :  { %v4507_v61 = vpop.eup %3887  ;;  %v468_v46 = vadd.f32 %v467_v16, %v466_v56  ;;  %v480_v63 = vsel %vm166_vm3, %v4503_v47, 0.0  ;;  %v450_v51 = vrot.slane %v449_v14, 1  ;;  %3901 = vrcp.f32 %v812_v48 }
 0x133   :  { %v456_v6 = vadd.f32 %v455_v45, %v454_v17  ;;  %v462_v11 = vrot.slane %v461_v19, 2  ;;  %v475_v54 = vadd.f32 %v474_v26, %v473_v21  ;;  %v481_v4 = vrot.slane %v480_v63, 4  ;;  %v3890_v13 = vpop.eup %3889 }
 0x134   :  { %v469_v60 = vrot.slane %v468_v46, 2  ;;  %v487_v12 = vsel %vm166_vm3, %v4507_v61, 0.0  ;;  %v444_v25 = vadd.f32 %v443_v50, %v442_v9  ;;  %v3892_v32 = vpop.eup %3891  ;;  %v451_v58 = vadd.f32 %v450_v51, %v449_v14 }
 0x135   :  { %v457_v22 = vrot.slane %v456_v6, 1  ;;  %v463_v2 = vadd.f32 %v462_v11, %v461_v19  ;;  %v476_v7 = vrot.slane %v475_v54, 2  ;;  %v482_v30 = vadd.f32 %v481_v4, %v480_v63  ;;  %v3894_v36 = vpop.eup %3893 }
 0x136   :  { %v470_v23 = vadd.f32 %v469_v60, %v468_v46  ;;  %v488_v1 = vrot.slane %v487_v12, 4  ;;  %3903 = vrcp.f32 %v819_v8 }
 0x137   :  { %v477_v38 = vadd.f32 %v476_v7, %v475_v54  ;;  %v464_v59 = vrot.slane %v463_v2, 1  ;;  %v483_v31 = vrot.slane %v482_v30, 2  ;;  %v458_v41 = vadd.f32 %v457_v22, %v456_v6  ;;  %v3896_v16 = vpop.eup %3895 }
 0x138   :  { %v471_v39 = vrot.slane %v470_v23, 1  ;;  %3905 = vrcp.f32 %v444_v25  ;;  %v489_v9 = vadd.f32 %v488_v1, %v487_v12  ;;  %v3898_v42 = vpop.eup %3897  ;;  %v828_v12 = vmul.f32 %v3890_v13, %v4362_v0 }
 0x139   :  { %v465_v24 = vadd.f32 %v464_v59, %v463_v2  ;;  %v478_v17 = vrot.slane %v477_v38, 1  ;;  %v484_v55 = vadd.f32 %v483_v31, %v482_v30  ;;  %3907 = vrcp.f32 %v451_v58 }
 0x13a   :  { %v472_v44 = vadd.f32 %v471_v39, %v470_v23  ;;  %3909 = vrcp.f32 %v458_v41  ;;  %v490_v14 = vrot.slane %v489_v9, 2  ;;  %v3900_v26 = vpop.eup %3899  ;;  %v829_v22 = vmul.f32 %v3892_v32, %v4366_v62 }
 0x13b   :  { %v479_v56 = vadd.f32 %v478_v17, %v477_v38  ;;  %v485_v21 = vrot.slane %v484_v55, 1  ;;  %3911 = vrcp.f32 %v465_v24  ;;  %v830_v2 = vmul.f32 %v3894_v36, %v4373_v3 }
 0x13c   :  { %3913 = vrcp.f32 %v472_v44  ;;  %v491_v19 = vadd.f32 %v490_v14, %v489_v9  ;;  %v3902_v57 = vpop.eup %3901  ;;  %v831_v7 = vmul.f32 %v3896_v16, %v4380_v10  ;;  %v832_v8 = vmul.f32 %v3898_v42, %v4388_v18 }
 0x13d   :  { %v486_v45 = vadd.f32 %v485_v21, %v484_v55  ;;  %3915 = vrcp.f32 %v479_v56  ;;  %v833_v25 = vmul.f32 %v3900_v26, %v4392_v27  ;;  %v4520_v23 = vmul.f32 %v3902_v57, %v4396_v35 }
 0x13e   :  { %v492_v48 = vrot.slane %v491_v19, 1 }
 0x13f   :  { %3917 = vrcp.f32 %v486_v45 }
 0x140   :  { %v493_v50 = vadd.f32 %v492_v48, %v491_v19  ;;  %v3904_v46 = vpop.eup %3903 }
 0x141   :  { %v4530_v27 = vmul.f32 %v3904_v46, %v4419_v49 }
 0x142   :  { %v3906_v63 = vpop.eup %3905  ;;  %3919 = vrcp.f32 %v493_v50 }
 0x143   :  { %v3908_v51 = vpop.eup %3907  ;;  %v502_v30 = vmul.f32 %v3906_v63, %v4477_v15 }
 0x144   :  { %v3910_v6 = vpop.eup %3909  ;;  %v503_v1 = vmul.f32 %v3908_v51, %v4482_v52 }
 0x145   :  { %v3912_v11 = vpop.eup %3911  ;;  %v504_v38 = vmul.f32 %v3910_v6, %v4489_v20 }
 0x146   :  { %v3914_v54 = vpop.eup %3913  ;;  %v505_v0 = vmul.f32 %v3912_v11, %v4493_v33 }
 0x147   :  { %v3916_v60 = vpop.eup %3915  ;;  %v506_v3 = vmul.f32 %v3914_v54, %v4495_v40 }
 0x148   :  { %v507_v10 = vmul.f32 %v3916_v60, %v4499_v43 }
 0x149   :  { %v3918_v4 = vpop.eup %3917 }
 0x14a   :  { %v508_v18 = vmul.f32 %v3918_v4, %v4503_v47 }
 0x14c   :  { %v3920_v35 = vpop.eup %3919 }
 0x14d   :  { %v509_v20 = vmul.f32 %v3920_v35, %v4507_v61 }
 0x14f   :  { %v512_v62 = vpop.permute.xlu1 %511 }
 0x150   :  { %v514_v13 = vmul.f32 %v512_v62, %v502_v30  ;;  %v515_v32 = vmul.f32 %v512_v62, %v503_v1  ;;  %v516_v15 = vmul.f32 %v512_v62, %v504_v38  ;;  %v517_v58 = vmul.f32 %v512_v62, %v505_v0 }
 0x151   :  { %v518_v52 = vmul.f32 %v512_v62, %v506_v3  ;;  %v519_v59 = vmul.f32 %v512_v62, %v507_v10  ;;  %v520_v33 = vmul.f32 %v512_v62, %v508_v18  ;;  %v521_v6 = vmul.f32 %v512_v62, %v509_v20 }
 0x152   :  { %v522_v36 = vsel %vm166_vm3, %v514_v13, 0.0  ;;  %v529_v40 = vsel %vm166_vm3, %v515_v32, 0.0  ;;  %v536_v43 = vsel %vm166_vm3, %v516_v15, 0.0  ;;  %v543_v47 = vsel %vm166_vm3, %v517_v58, 0.0 }
 0x153   :  { %v523_v49 = vrot.slane %v522_v36, 4  ;;  %v530_v39 = vrot.slane %v529_v40, 4  ;;  %v537_v31 = vrot.slane %v536_v43, 4  ;;  %v544_v41 = vrot.slane %v543_v47, 4  ;;  %v4537_v24 = vpop.permute.xlu1 %837 }
 0x154   :  { %v840_v17 = vmul.f32 %v4537_v24, %v828_v12  ;;  %v841_v61 = vmul.f32 %v4537_v24, %v829_v22  ;;  %v842_v44 = vmul.f32 %v4537_v24, %v830_v2  ;;  %v843_v55 = vmul.f32 %v4537_v24, %v831_v7 }
 0x155   :  { %v524_v9 = vadd.f32 %v523_v49, %v522_v36  ;;  %v531_v56 = vadd.f32 %v530_v39, %v529_v40  ;;  %v538_v16 = vadd.f32 %v537_v31, %v536_v43  ;;  %v844_v21 = vmul.f32 %v4537_v24, %v832_v8 }
 0x156   :  { %v4545_v14 = vmul.f32 %v4537_v24, %v833_v25  ;;  %v848_v42 = vsel %vm166_vm3, %v840_v17, 0.0  ;;  %v855_v45 = vsel %vm166_vm3, %v841_v61, 0.0  ;;  %v862_v19 = vsel %vm166_vm3, %v842_v44, 0.0 }
 0x157   :  { %v525_v48 = vrot.slane %v524_v9, 2  ;;  %v532_v26 = vrot.slane %v531_v56, 2  ;;  %v849_v57 = vrot.slane %v848_v42, 4  ;;  %v856_v50 = vrot.slane %v855_v45, 4 }
 0x158   :  { %v863_v46 = vrot.slane %v862_v19, 4  ;;  %v869_v63 = vsel %vm166_vm3, %v843_v55, 0.0  ;;  %v4552_v51 = vsel %vm166_vm3, %v844_v21, 0.0  ;;  %v539_v7 = vrot.slane %v538_v16, 2 }
 0x159   :  { %v850_v11 = vadd.f32 %v849_v57, %v848_v42  ;;  %v857_v54 = vadd.f32 %v856_v50, %v855_v45  ;;  %v870_v60 = vrot.slane %v869_v63, 4  ;;  %v877_v4 = vrot.slane %v4552_v51, 4 }
 0x15a   :  { %v864_v12 = vadd.f32 %v863_v46, %v862_v19  ;;  %v526_v22 = vadd.f32 %v525_v48, %v524_v9  ;;  %v533_v2 = vadd.f32 %v532_v26, %v531_v56  ;;  %v545_v1 = vadd.f32 %v544_v41, %v543_v47 }
 0x15b   :  { %v851_v8 = vrot.slane %v850_v11, 2  ;;  %v858_v25 = vrot.slane %v857_v54, 2  ;;  %v871_v30 = vadd.f32 %v870_v60, %v869_v63  ;;  %v540_v10 = vadd.f32 %v539_v7, %v538_v16 }
 0x15c   :  { %v865_v38 = vrot.slane %v864_v12, 2  ;;  %v527_v0 = vrot.slane %v526_v22, 1  ;;  %v534_v3 = vrot.slane %v533_v2, 1  ;;  %v546_v35 = vrot.slane %v545_v1, 2 }
 0x15d   :  { %v852_v18 = vadd.f32 %v851_v8, %v850_v11  ;;  %v859_v62 = vadd.f32 %v858_v25, %v857_v54  ;;  %v550_v13 = vsel %vm166_vm3, %v518_v52, 0.0  ;;  %v541_v58 = vrot.slane %v540_v10, 1 }
 0x15e   :  { %v528_v32 = vadd.f32 %v527_v0, %v526_v22  ;;  %v535_v15 = vadd.f32 %v534_v3, %v533_v2  ;;  %v551_v20 = vrot.slane %v550_v13, 4  ;;  %v547_v36 = vadd.f32 %v546_v35, %v545_v1 }
 0x15f   :  { %v557_v40 = vsel %vm166_vm3, %v519_v59, 0.0  ;;  %v564_v43 = vsel %vm166_vm3, %v520_v33, 0.0  ;;  %v571_v47 = vsel %vm166_vm3, %v521_v6, 0.0  ;;  %v542_v49 = vadd.f32 %v541_v58, %v540_v10 }
 0x160   :  { %v552_v39 = vadd.f32 %v551_v20, %v550_v13  ;;  %v558_v31 = vrot.slane %v557_v40, 4  ;;  %v565_v41 = vrot.slane %v564_v43, 4  ;;  %v548_v17 = vrot.slane %v547_v36, 1 }
 0x161   :  { %v572_v61 = vrot.slane %v571_v47, 4  ;;  %v913_v52 = vsel %vm912_vm7, %v535_v15, %v528_v32  ;;  %v846_v44 = vmul.f32 %v4537_v24, %v4520_v23  ;;  %v847_v21 = vmul.f32 %v4537_v24, %v4530_v27 }
 0x162   :  { %v553_v55 = vrot.slane %v552_v39, 2  ;;  %v559_v9 = vadd.f32 %v558_v31, %v557_v40  ;;  %v566_v59 = vadd.f32 %v565_v41, %v564_v43  ;;  %v915_v33 = vsel %vm914_vm8, %v542_v49, %v913_v52 }
 0x163   :  { %v549_v56 = vadd.f32 %v548_v17, %v547_v36  ;;  %v573_v16 = vadd.f32 %v572_v61, %v571_v47  ;;  %v853_v42 = vrot.slane %v852_v18, 1  ;;  %v860_v26 = vrot.slane %v859_v62, 1 }
 0x164   :  { %v554_v45 = vadd.f32 %v553_v55, %v552_v39  ;;  %v560_v19 = vrot.slane %v559_v9, 2  ;;  %v567_v48 = vrot.slane %v566_v59, 2  ;;  %v866_v46 = vadd.f32 %v865_v38, %v864_v12 }
 0x165   :  { %v574_v57 = vrot.slane %v573_v16, 2  ;;  %v917_v23 = vsel %vm916_vm9, %v549_v56, %v915_v33  ;;  %v854_v50 = vadd.f32 %v853_v42, %v852_v18  ;;  %v861_v54 = vadd.f32 %v860_v26, %v859_v62 }
 0x166   :  { %v555_v63 = vrot.slane %v554_v45, 1  ;;  %v561_v6 = vadd.f32 %v560_v19, %v559_v9  ;;  %v568_v11 = vadd.f32 %v567_v48, %v566_v59  ;;  %v867_v22 = vrot.slane %v866_v46, 1 }
 0x167   :  { %v575_v60 = vadd.f32 %v574_v57, %v573_v16  ;;  %v872_v2 = vrot.slane %v871_v30, 2  ;;  %v878_v7 = vadd.f32 %v877_v4, %v4552_v51  ;;  %v883_v25 = vsel %vm166_vm3, %v4545_v14, 0.0 }
 0x168   :  { %v556_v27 = vadd.f32 %v555_v63, %v554_v45  ;;  %v562_v24 = vrot.slane %v561_v6, 1  ;;  %v569_v8 = vrot.slane %v568_v11, 1  ;;  %v868_v0 = vadd.f32 %v867_v22, %v866_v46 }
 0x169   :  { %v576_v1 = vrot.slane %v575_v60, 1  ;;  %v873_v3 = vadd.f32 %v872_v2, %v871_v30  ;;  %v879_v10 = vrot.slane %v878_v7, 2  ;;  %v884_v62 = vrot.slane %v883_v25, 4  ;;  %v3672_v2 = vld [vmem:[%s5679_s5 + $0x10] sm:$0xff] }
 0x16a   :  { %v563_v12 = vadd.f32 %v562_v24, %v561_v6  ;;  %v570_v38 = vadd.f32 %v569_v8, %v568_v11  ;;  %v919_v18 = vsel %vm918_vm10, %v556_v27, %v917_v23  ;;  %v890_v51 = vsel %vm166_vm3, %v846_v44, 0.0  ;;  %v3665_v23 = vld [vmem:[%s5673_s3 + $0x10] sm:$0xff]  ;;  %v944_v6 = vpop.permute.xlu0 %943  ;;  %v3668_v24 = vld [vmem:[%s5678_s4 + $0x1] ss:$0 sm:$0xff] }
 0x16b   :  { %v577_v35 = vadd.f32 %v576_v1, %v575_v60  ;;  %v874_v13 = vrot.slane %v873_v3, 1  ;;  %v880_v32 = vadd.f32 %v879_v10, %v878_v7  ;;  %v885_v15 = vadd.f32 %v884_v62, %v883_v25  ;;  %v3673_v7 = vld [vmem:[%s5679_s5 + $0x18] sm:$0x1] }
 0x16c   :  { %v921_v4 = vsel %vm920_vm11, %v563_v12, %v919_v18  ;;  %v891_v58 = vrot.slane %v890_v51, 4  ;;  %v897_v14 = vsel %vm166_vm3, %v847_v21, 0.0  ;;  %v934_v39 = vsel %vm912_vm7, %v861_v54, %v854_v50  ;;  %v3666_v50 = vld [vmem:[%s5673_s3 + $0x18] sm:$0x1]  ;;  %v946_v54 = vpop.permute.xlu1 %945 }
 0x16d   :  { %v923_v20 = vsel %vm922_vm12, %v570_v38, %v921_v4  ;;  %v875_v30 = vadd.f32 %v874_v13, %v873_v3  ;;  %v881_v36 = vrot.slane %v880_v32, 1  ;;  %v898_v40 = vrot.slane %v897_v14, 4 }
 0x16e   :  { %v925_v43 = vsel %vm924_vm13, %v577_v35, %v923_v20  ;;  %v886_v47 = vrot.slane %v885_v15, 2  ;;  %v892_v49 = vadd.f32 %v891_v58, %v890_v51  ;;  %v935_v17 = vsel %vm914_vm8, %v868_v0, %v934_v39 }
 0x16f   :  { %3752 = vmatprep.mubr.msk.f32.mxu0 %vm166_vm3, %v925_v43  ;;  %v882_v31 = vadd.f32 %v881_v36, %v880_v32  ;;  %v899_v41 = vadd.f32 %v898_v40, %v897_v14  ;;  %v936_v44 = vsel %vm916_vm9, %v875_v30, %v935_v17  ;;  %v3809_v46 = vpack.c.bf16 %v3666_v50, %v3665_v23 }
 0x170   :  { %v887_v61 = vadd.f32 %v886_v47, %v885_v15  ;;  %v893_v52 = vrot.slane %v892_v49, 2  ;;  %v3815_v27 = vpack.c.bf16 %v3673_v7, %v3672_v2  ;;  %v1545_v43 = vpop.permute.xlu1 %1544 }
 0x171   :  { %v900_v55 = vrot.slane %v899_v41, 2  ;;  %v937_v9 = vsel %vm918_vm10, %v882_v31, %v936_v44  ;;  %3811 = vmatprep.subr.msk.bf16.mxu1 %vm4191_vm5, %v3809_v46 }
 0x172   :  { %v888_v59 = vrot.slane %v887_v61, 1  ;;  %v894_v33 = vadd.f32 %v893_v52, %v892_v49  ;;  %3814 = vmatpush3.bf16.msk.msra.mxu1 %vm4191_vm5, %v3809_v46  ;;  %3817 = vmatprep.subr.msk.bf16.mxu0 %vm4191_vm5, %v3815_v27 }
 0x173   :  { %v901_v56 = vadd.f32 %v900_v55, %v899_v41 }
 0x174   :  { %v889_v16 = vadd.f32 %v888_v59, %v887_v61  ;;  %v895_v21 = vrot.slane %v894_v33, 1 }
 0x175   :  { %v902_v42 = vrot.slane %v901_v56, 1 }
 0x176   :  { %v896_v45 = vadd.f32 %v895_v21, %v894_v33  ;;  %v938_v19 = vsel %vm920_vm11, %v889_v16, %v937_v9 }
 0x177   :  { %v903_v48 = vadd.f32 %v902_v42, %v901_v56 }
 0x178   :  { %v939_v26 = vsel %vm922_vm12, %v896_v45, %v938_v19 }
 0x179   :  { %v940_v57 = vsel %vm924_vm13, %v903_v48, %v939_v26 }
 0x17a   :  { %3753 = vmatmul.mubr.msk.f32.vlgmr.msra.gmra.mrb[2].mxu0 %vm166_vm3, %v940_v57 }
 0x17b   :  { %3820 = vmatpush3.bf16.msk.msra.mxu0 %vm4191_vm5, %v3815_v27 }
 0x24d   :  { %v3754_v63 = vpop.f32.mrb[2].mxu0 }
 0x24e   :  { %v1022_v11 = vpop.f32.mrb[3].mxu0  ;;  %v1028_v22 = vadd.f32 %v3754_v63, %v946_v54 }
 0x24f   :  { %v1023_v60 = vadd.f32 %v1022_v11, %v944_v6 }
 0x251   :  { %3759 = vmatprep.mubr.msk.f32.mxu1 %vm166_vm3, %v1023_v60 }
 0x252   :  { %3760 = vmatmul.mubr.msk.f32.vlgmr.msra.gmra.mrb[2].mxu1 %vm166_vm3, %v1028_v22 }
 0x325   :  { %v3761_v8 = vpop.f32.mrb[2].mxu1 }
 0x326   :  { %v1123_v25 = vadd.f32 %v3761_v8, %v3668_v24  ;;  %v1117_v1 = vpop.f32.mrb[3].mxu1 }
 0x327   :  { %v1118_v0 = vadd.f32 %v3668_v24, %v1117_v1 }
 0x328   :  { %v1455_v3 = vcombine.high %v1123_v25, %v1123_v25  ;;  %v1462_v10 = vrot.slane %v1123_v25, %v4226_v29  ;;  %1817 = vrot.lane.b32.xlu1 %v1123_v25, %s4116_s7 }
 0x329   :  { %v1127_v12 = vcombine.high %v1118_v0, %v1118_v0  ;;  %v1134_v38 = vrot.slane %v1118_v0, %v4226_v29  ;;  %1815 = vrot.lane.b32.xlu0 %v1118_v0, %s4116_s7 }
 0x32a   :  { %v1469_v18 = vrot.slane %v1455_v3, %v4226_v29  ;;  %v1470_v62 = vcombine.high %v1462_v10, %v1462_v10  ;;  %v1478_v35 = vrot.slane %v1462_v10, %v4226_v29 }
 0x32b   :  { %v1141_v13 = vrot.slane %v1127_v12, %v4226_v29  ;;  %v1142_v32 = vcombine.high %v1134_v38, %v1134_v38  ;;  %v4617_v51 = vrot.slane %v1134_v38, %v4226_v29 }
 0x32c   :  { %v1471_v4 = vcombine.high %v1469_v18, %v1469_v18  ;;  %v1485_v15 = vrot.slane %v1469_v18, %v4226_v29  ;;  %v1492_v58 = vrot.slane %v1470_v62, %v4226_v29  ;;  %v1500_v14 = vcombine.high %v1478_v35, %v1478_v35  ;;  %2416 = vrot.lane.b32.xlu1 %v4230_v34, %s4120_s21 }
 0x32d   :  { %v1507_v20 = vrot.slane %v1478_v35, %v4233_v37  ;;  %v1143_v30 = vcombine.high %v1141_v13, %v1141_v13  ;;  %v4624_v36 = vrot.slane %v1141_v13, %v4226_v29  ;;  %v4627_v40 = vrot.slane %v1142_v32, %v4226_v29  ;;  %2088 = vrot.lane.b32.xlu0 %v4224_v28, %s4120_s21 }
 0x32e   :  { %v1499_v47 = vrot.slane %v1471_v4, %v4226_v29  ;;  %v1501_v49 = vcombine.high %v1485_v15, %v1485_v15  ;;  %v1502_v39 = vcombine.high %v1492_v58, %v1492_v58  ;;  %v1511_v31 = vrot.slane %v1492_v58, %v4233_v37 }
 0x32f   :  { %v1515_v41 = vrot.slane %v1500_v14, %v4233_v37  ;;  %v1523_v17 = vrot.slane %v1485_v15, %v4233_v37  ;;  %v1547_v61 = vmul.f32 %v1545_v43, %v1507_v20  ;;  %v4635_v52 = vrot.slane %v1143_v30, %v4226_v29 }
 0x330   :  { %v1503_v44 = vcombine.high %v1499_v47, %v1499_v47  ;;  %v1519_v55 = vrot.slane %v1502_v39, %v4233_v37  ;;  %v1527_v9 = vrot.slane %v1499_v47, %v4233_v37  ;;  %v1531_v59 = vrot.slane %v1501_v49, %v4233_v37  ;;  %2587 = vrot.lane.b32.xlu1 %v4230_v34, %s4121_s22 }
 0x331   :  { %v1548_v33 = vmul.f32 %v1545_v43, %v1511_v31  ;;  %v1549_v56 = vmul.f32 %v1545_v43, %v1515_v41  ;;  %v1551_v16 = vmul.f32 %v1545_v43, %v1523_v17  ;;  %v4642_v21 = vadd.f32 %v1547_v61, %v4255_v53  ;;  %2259 = vrot.lane.b32.xlu0 %v4224_v28, %s4121_s22 }
 0x332   :  { %v1535_v42 = vrot.slane %v1503_v44, %v4233_v37  ;;  %v1550_v45 = vmul.f32 %v1545_v43, %v1519_v55  ;;  %v1552_v19 = vmul.f32 %v1545_v43, %v1527_v9  ;;  %v1553_v48 = vmul.f32 %v1545_v43, %v1531_v59 }
 0x333   :  { %v4647_v26 = vadd.f32 %v1548_v33, %v4255_v53  ;;  %v4650_v57 = vadd.f32 %v1549_v56, %v4255_v53  ;;  %v4653_v23 = vadd.f32 %v1551_v16, %v4255_v53  ;;  %v1563_v50 = vsel %vm166_vm3, %v4642_v21, -inf }
 0x334   :  { %v1554_v46 = vmul.f32 %v1545_v43, %v1535_v42  ;;  %v4658_v63 = vadd.f32 %v1550_v45, %v4255_v53  ;;  %v4661_v6 = vadd.f32 %v1552_v19, %v4255_v53  ;;  %v4664_v11 = vadd.f32 %v1553_v48, %v4255_v53 }
 0x335   :  { %v1564_v54 = vrot.slane %v1563_v50, 4  ;;  %v1570_v60 = vsel %vm166_vm3, %v4647_v26, -inf  ;;  %v1577_v22 = vsel %vm166_vm3, %v4650_v57, -inf  ;;  %v1591_v2 = vsel %vm166_vm3, %v4653_v23, -inf }
 0x336   :  { %v4673_v7 = vadd.f32 %v1554_v46, %v4255_v53  ;;  %v1571_v27 = vrot.slane %v1570_v60, 4  ;;  %v1578_v24 = vrot.slane %v1577_v22, 4  ;;  %v1584_v8 = vsel %vm166_vm3, %v4658_v63, -inf }
 0x337   :  { %v1565_v25 = vmax.f32 %v1563_v50, %v1564_v54  ;;  %v1585_v1 = vrot.slane %v1584_v8, 4  ;;  %v1592_v0 = vrot.slane %v1591_v2, 4  ;;  %v1598_v3 = vsel %vm166_vm3, %v4661_v6, -inf }
 0x338   :  { %v1572_v10 = vmax.f32 %v1570_v60, %v1571_v27  ;;  %v1579_v12 = vmax.f32 %v1577_v22, %v1578_v24  ;;  %v1599_v38 = vrot.slane %v1598_v3, 4  ;;  %v1605_v18 = vsel %vm166_vm3, %v4664_v11, -inf }
 0x339   :  { %v1566_v62 = vrot.slane %v1565_v25, 2  ;;  %v1586_v35 = vmax.f32 %v1584_v8, %v1585_v1  ;;  %v1593_v13 = vmax.f32 %v1591_v2, %v1592_v0  ;;  %v1606_v32 = vrot.slane %v1605_v18, 4 }
 0x33a   :  { %v1573_v4 = vrot.slane %v1572_v10, 2  ;;  %v1580_v15 = vrot.slane %v1579_v12, 2  ;;  %v1600_v58 = vmax.f32 %v1598_v3, %v1599_v38  ;;  %v1612_v14 = vsel %vm166_vm3, %v4673_v7, -inf }
 0x33b   :  { %v1567_v20 = vmax.f32 %v1565_v25, %v1566_v62  ;;  %v1587_v30 = vrot.slane %v1586_v35, 2  ;;  %v1594_v43 = vrot.slane %v1593_v13, 2  ;;  %v1607_v47 = vmax.f32 %v1605_v18, %v1606_v32 }
 0x33c   :  { %v1574_v49 = vmax.f32 %v1572_v10, %v1573_v4  ;;  %v1581_v39 = vmax.f32 %v1579_v12, %v1580_v15  ;;  %v1601_v31 = vrot.slane %v1600_v58, 2  ;;  %v1613_v41 = vrot.slane %v1612_v14, 4 }
 0x33d   :  { %v1568_v17 = vrot.slane %v1567_v20, 1  ;;  %v1588_v61 = vmax.f32 %v1586_v35, %v1587_v30  ;;  %v1595_v44 = vmax.f32 %v1593_v13, %v1594_v43  ;;  %v1608_v55 = vrot.slane %v1607_v47, 2  ;;  %v1217_v43 = vpop.permute.xlu0 %1216 }
 0x33e   :  { %v1575_v9 = vrot.slane %v1574_v49, 1  ;;  %v1582_v59 = vrot.slane %v1581_v39, 1  ;;  %v1602_v33 = vmax.f32 %v1600_v58, %v1601_v31  ;;  %v1614_v56 = vmax.f32 %v1612_v14, %v1613_v41 }
 0x33f   :  { %v1569_v16 = vmax.f32 %v1567_v20, %v1568_v17  ;;  %v1589_v42 = vrot.slane %v1588_v61, 1  ;;  %v1596_v45 = vrot.slane %v1595_v44, 1  ;;  %v1609_v19 = vmax.f32 %v1607_v47, %v1608_v55 }
 0x340   :  { %v1576_v48 = vmax.f32 %v1574_v49, %v1575_v9  ;;  %v1583_v50 = vmax.f32 %v1581_v39, %v1582_v59  ;;  %v1603_v46 = vrot.slane %v1602_v33, 1  ;;  %v1615_v54 = vrot.slane %v1614_v56, 2 }
 0x341   :  { %v1590_v60 = vmax.f32 %v1588_v61, %v1589_v42  ;;  %v1597_v22 = vmax.f32 %v1595_v44, %v1596_v45  ;;  %v1610_v2 = vrot.slane %v1609_v19, 1  ;;  %v1619_v27 = vsub.f32 %v4642_v21, %v1569_v16 }
 0x342   :  { %v1604_v24 = vmax.f32 %v1602_v33, %v1603_v46  ;;  %v1616_v8 = vmax.f32 %v1614_v56, %v1615_v54  ;;  %v1620_v25 = vsub.f32 %v4647_v26, %v1576_v48  ;;  %v1621_v1 = vsub.f32 %v4650_v57, %v1583_v50 }
 0x343   :  { %v1611_v0 = vmax.f32 %v1609_v19, %v1610_v2  ;;  %v1622_v3 = vsub.f32 %v4658_v63, %v1590_v60  ;;  %v1623_v10 = vsub.f32 %v4653_v23, %v1597_v22  ;;  %v1627_v12 = vmul.f32 1.442695, %v1619_v27 }
 0x344   :  { %v1617_v38 = vrot.slane %v1616_v8, 1  ;;  %v1624_v18 = vsub.f32 %v4661_v6, %v1604_v24  ;;  %v1629_v62 = vmul.f32 1.442695, %v1620_v25  ;;  %v1631_v35 = vmul.f32 1.442695, %v1621_v1 }
 0x345   :  { %v1625_v13 = vsub.f32 %v4664_v11, %v1611_v0  ;;  %3921 = vpow2.f32 %v1627_v12  ;;  %v1633_v21 = vmul.f32 1.442695, %v1622_v3  ;;  %v1635_v32 = vmul.f32 1.442695, %v1623_v10 }
 0x346   :  { %v1618_v4 = vmax.f32 %v1616_v8, %v1617_v38  ;;  %3923 = vpow2.f32 %v1629_v62  ;;  %v1637_v26 = vmul.f32 1.442695, %v1624_v18  ;;  %v1172_v57 = vcombine.high %v4617_v51, %v4617_v51 }
 0x347   :  { %3925 = vpow2.f32 %v1631_v35  ;;  %v1639_v63 = vmul.f32 1.442695, %v1625_v13  ;;  %v1173_v23 = vcombine.high %v4624_v36, %v4624_v36  ;;  %v1174_v6 = vcombine.high %v4627_v40, %v4627_v40 }
 0x348   :  { %v1626_v15 = vsub.f32 %v4673_v7, %v1618_v4  ;;  %3927 = vpow2.f32 %v1633_v21  ;;  %v1175_v11 = vcombine.high %v4635_v52, %v4635_v52  ;;  %v1179_v58 = vrot.slane %v4617_v51, %v4233_v37 }
 0x349   :  { %3929 = vpow2.f32 %v1635_v32  ;;  %v1183_v14 = vrot.slane %v4627_v40, %v4233_v37  ;;  %v1187_v20 = vrot.slane %v1172_v57, %v4233_v37  ;;  %v1191_v30 = vrot.slane %v1174_v6, %v4233_v37 }
 0x34a   :  { %3931 = vpow2.f32 %v1637_v26  ;;  %v1641_v47 = vmul.f32 1.442695, %v1626_v15  ;;  %v1195_v7 = vrot.slane %v4624_v36, %v4233_v37  ;;  %v1199_v49 = vrot.slane %v4635_v52, %v4233_v37 }
 0x34b   :  { %3933 = vpow2.f32 %v1639_v63  ;;  %v1203_v51 = vrot.slane %v1173_v23, %v4233_v37  ;;  %v1207_v39 = vrot.slane %v1175_v11, %v4233_v37  ;;  %v1219_v31 = vmul.f32 %v1217_v43, %v1179_v58 }
 0x34c   :  { %3935 = vpow2.f32 %v1641_v47  ;;  %v1220_v40 = vmul.f32 %v1217_v43, %v1183_v14  ;;  %v1221_v41 = vmul.f32 %v1217_v43, %v1187_v20  ;;  %v1222_v17 = vmul.f32 %v1217_v43, %v1191_v30 }
 0x34d   :  { %v1223_v61 = vmul.f32 %v1217_v43, %v1195_v7  ;;  %v1224_v44 = vmul.f32 %v1217_v43, %v1199_v49  ;;  %v1225_v55 = vmul.f32 %v1217_v43, %v1203_v51  ;;  %v1226_v9 = vmul.f32 %v1217_v43, %v1207_v39 }
 0x34e   :  { %v4712_v59 = vadd.f32 %v1219_v31, %v4255_v53  ;;  %v4715_v36 = vadd.f32 %v1220_v40, %v4255_v53  ;;  %v4718_v52 = vadd.f32 %v1221_v41, %v4255_v53  ;;  %v4721_v33 = vadd.f32 %v1222_v17, %v4255_v53 }
 0x34f   :  { %v4723_v56 = vpop.eup %3921  ;;  %v4726_v16 = vadd.f32 %v1223_v61, %v4255_v53  ;;  %v4729_v42 = vadd.f32 %v1224_v44, %v4255_v53  ;;  %v4732_v45 = vadd.f32 %v1225_v55, %v4255_v53  ;;  %v4735_v19 = vadd.f32 %v1226_v9, %v4255_v53 }
 0x350   :  { %v4737_v48 = vpop.eup %3923  ;;  %v1643_v50 = vsel %vm166_vm3, %v4723_v56, 0.0  ;;  %v1235_v46 = vsel %vm166_vm3, %v4712_v59, -inf  ;;  %v1242_v54 = vsel %vm166_vm3, %v4715_v36, -inf  ;;  %v4747_v60 = vsel %vm166_vm3, %v4718_v52, -inf }
 0x351   :  { %v4749_v22 = vpop.eup %3925  ;;  %v1644_v2 = vrot.slane %v1643_v50, 4  ;;  %v1650_v27 = vsel %vm166_vm3, %v4737_v48, 0.0  ;;  %v1236_v24 = vrot.slane %v1235_v46, 4  ;;  %v1243_v8 = vrot.slane %v1242_v54, 4 }
 0x352   :  { %v4753_v25 = vpop.eup %3927  ;;  %v1651_v1 = vrot.slane %v1650_v27, 4  ;;  %v1657_v0 = vsel %vm166_vm3, %v4749_v22, 0.0  ;;  %v1250_v3 = vrot.slane %v4747_v60, 4  ;;  %v4760_v10 = vsel %vm166_vm3, %v4721_v33, -inf }
 0x353   :  { %v4762_v12 = vpop.eup %3929  ;;  %v1645_v38 = vadd.f32 %v1644_v2, %v1643_v50  ;;  %v1658_v18 = vrot.slane %v1657_v0, 4  ;;  %v1664_v62 = vsel %vm166_vm3, %v4753_v25, 0.0  ;;  %v1237_v35 = vmax.f32 %v1235_v46, %v1236_v24 }
 0x354   :  { %v4766_v13 = vpop.eup %3931  ;;  %v1652_v21 = vadd.f32 %v1651_v1, %v1650_v27  ;;  %v1665_v32 = vrot.slane %v1664_v62, 4  ;;  %v1671_v4 = vsel %vm166_vm3, %v4762_v12, 0.0  ;;  %v1244_v26 = vmax.f32 %v1242_v54, %v1243_v8 }
 0x355   :  { %v4770_v57 = vpop.eup %3933  ;;  %v1646_v63 = vrot.slane %v1645_v38, 2  ;;  %v1659_v23 = vadd.f32 %v1658_v18, %v1657_v0  ;;  %v1672_v6 = vrot.slane %v1671_v4, 4  ;;  %v1678_v15 = vsel %vm166_vm3, %v4766_v13, 0.0 }
 0x356   :  { %v4774_v11 = vpop.eup %3935  ;;  %v1653_v58 = vrot.slane %v1652_v21, 2  ;;  %v1666_v14 = vadd.f32 %v1665_v32, %v1664_v62  ;;  %v1679_v20 = vrot.slane %v1678_v15, 4  ;;  %v1685_v30 = vsel %vm166_vm3, %v4770_v57, 0.0 }
 0x357   :  { %v1647_v43 = vadd.f32 %v1646_v63, %v1645_v38  ;;  %v1660_v47 = vrot.slane %v1659_v23, 2  ;;  %v1673_v7 = vadd.f32 %v1672_v6, %v1671_v4  ;;  %v1686_v49 = vrot.slane %v1685_v30, 4 }
 0x358   :  { %v1654_v51 = vadd.f32 %v1653_v58, %v1652_v21  ;;  %v1667_v39 = vrot.slane %v1666_v14, 2  ;;  %v1680_v31 = vadd.f32 %v1679_v20, %v1678_v15  ;;  %v1692_v40 = vsel %vm166_vm3, %v4774_v11, 0.0 }
 0x359   :  { %v1648_v41 = vrot.slane %v1647_v43, 1  ;;  %v1661_v17 = vadd.f32 %v1660_v47, %v1659_v23  ;;  %v1674_v61 = vrot.slane %v1673_v7, 2  ;;  %v1687_v44 = vadd.f32 %v1686_v49, %v1685_v30 }
 0x35a   :  { %v1655_v55 = vrot.slane %v1654_v51, 1  ;;  %v1668_v9 = vadd.f32 %v1667_v39, %v1666_v14  ;;  %v1681_v50 = vrot.slane %v1680_v31, 2  ;;  %v1693_v46 = vrot.slane %v1692_v40, 4 }
 0x35b   :  { %v1649_v54 = vadd.f32 %v1648_v41, %v1647_v43  ;;  %v1662_v2 = vrot.slane %v1661_v17, 1  ;;  %v1675_v27 = vadd.f32 %v1674_v61, %v1673_v7  ;;  %v1688_v24 = vrot.slane %v1687_v44, 2 }
 0x35c   :  { %v1656_v8 = vadd.f32 %v1655_v55, %v1654_v51  ;;  %v1669_v1 = vrot.slane %v1668_v9, 1  ;;  %v4780_v0 = vadd.f32 %v1681_v50, %v1680_v31  ;;  %v4782_v38 = vadd.f32 %v1693_v46, %v1692_v40 }
 0x35d   :  { %v1663_v18 = vadd.f32 %v1662_v2, %v1661_v17  ;;  %v1676_v62 = vrot.slane %v1675_v27, 1  ;;  %v4784_v21 = vadd.f32 %v1688_v24, %v1687_v44  ;;  %3937 = vrcp.f32 %v1649_v54 }
 0x35e   :  { %v1670_v32 = vadd.f32 %v1669_v1, %v1668_v9  ;;  %v1683_v4 = vrot.slane %v4780_v0, 1  ;;  %3939 = vrcp.f32 %v1656_v8  ;;  %v1238_v63 = vrot.slane %v1237_v35, 2 }
 0x35f   :  { %v1677_v23 = vadd.f32 %v1676_v62, %v1675_v27  ;;  %3941 = vrcp.f32 %v1663_v18  ;;  %v1245_v6 = vrot.slane %v1244_v26, 2  ;;  %v1251_v15 = vmax.f32 %v4747_v60, %v1250_v3 }
 0x360   :  { %3943 = vrcp.f32 %v1670_v32  ;;  %v1239_v58 = vmax.f32 %v1237_v35, %v1238_v63  ;;  %v1257_v14 = vrot.slane %v4760_v10, 4  ;;  %v1263_v20 = vsel %vm166_vm3, %v4726_v16, -inf }
 0x361   :  { %3945 = vrcp.f32 %v1677_v23  ;;  %v1246_v30 = vmax.f32 %v1244_v26, %v1245_v6  ;;  %v1252_v43 = vrot.slane %v1251_v15, 2  ;;  %v1264_v47 = vrot.slane %v1263_v20, 4 }
 0x362   :  { %v1240_v7 = vrot.slane %v1239_v58, 1  ;;  %v1258_v49 = vmax.f32 %v4760_v10, %v1257_v14  ;;  %v1270_v51 = vsel %vm166_vm3, %v4729_v42, -inf  ;;  %v1277_v60 = vsel %vm166_vm3, %v4732_v45, -inf }
 0x363   :  { %v1247_v3 = vrot.slane %v1246_v30, 1  ;;  %v1253_v35 = vmax.f32 %v1251_v15, %v1252_v43  ;;  %v1265_v39 = vmax.f32 %v1263_v20, %v1264_v47  ;;  %v1271_v31 = vrot.slane %v1270_v51, 4  ;;  %v4801_v15 = vpop.permute.xlu1 %1715 }
 0x364   :  { %v1241_v40 = vmax.f32 %v1239_v58, %v1240_v7  ;;  %v1259_v41 = vrot.slane %v1258_v49, 2  ;;  %v1278_v17 = vrot.slane %v1277_v60, 4  ;;  %v1284_v26 = vsel %vm166_vm3, %v4735_v19, -inf }
 0x365   :  { %v1248_v61 = vmax.f32 %v1246_v30, %v1247_v3  ;;  %v1254_v44 = vrot.slane %v1253_v35, 1  ;;  %v1266_v55 = vrot.slane %v1265_v39, 2  ;;  %v1272_v10 = vmax.f32 %v1270_v51, %v1271_v31 }
 0x366   :  { %v1260_v9 = vmax.f32 %v1258_v49, %v1259_v41  ;;  %v1279_v50 = vmax.f32 %v1277_v60, %v1278_v17  ;;  %v1285_v46 = vrot.slane %v1284_v26, 4  ;;  %v1291_v54 = vsub.f32 %v4712_v59, %v1241_v40 }
 0x367   :  { %v3938_v2 = vpop.eup %3937  ;;  %v1255_v27 = vmax.f32 %v1253_v35, %v1254_v44  ;;  %v1267_v24 = vmax.f32 %v1265_v39, %v1266_v55  ;;  %v1273_v8 = vrot.slane %v1272_v10, 2  ;;  %v1292_v1 = vsub.f32 %v4715_v36, %v1248_v61 }
 0x368   :  { %v3940_v18 = vpop.eup %3939  ;;  %v1707_v62 = vmul.f32 %v3938_v2, %v4723_v56  ;;  %v1261_v32 = vrot.slane %v1260_v9, 1  ;;  %v1280_v63 = vrot.slane %v1279_v50, 2  ;;  %v1286_v23 = vmax.f32 %v1284_v26, %v1285_v46 }
 0x369   :  { %v3942_v6 = vpop.eup %3941  ;;  %v1708_v58 = vmul.f32 %v3940_v18, %v4737_v48  ;;  %v1268_v14 = vrot.slane %v1267_v24, 1  ;;  %v1274_v20 = vmax.f32 %v1272_v10, %v1273_v8  ;;  %v1293_v59 = vsub.f32 %v4718_v52, %v1255_v27 }
 0x36a   :  { %v3944_v30 = vpop.eup %3943  ;;  %v1709_v43 = vmul.f32 %v3942_v6, %v4749_v22  ;;  %v1718_v36 = vmul.f32 %v4801_v15, %v1707_v62  ;;  %v1262_v47 = vmax.f32 %v1260_v9, %v1261_v32  ;;  %v1281_v7 = vmax.f32 %v1279_v50, %v1280_v63 }
 0x36b   :  { %v3946_v56 = vpop.eup %3945  ;;  %v1269_v49 = vmax.f32 %v1267_v24, %v1268_v14  ;;  %v1275_v51 = vrot.slane %v1274_v20, 1  ;;  %v1287_v60 = vrot.slane %v1286_v23, 2  ;;  %v1299_v3 = vmul.f32 1.442695, %v1291_v54 }
 0x36c   :  { %v1282_v35 = vrot.slane %v1281_v7, 1  ;;  %v1294_v39 = vsub.f32 %v4721_v33, %v1262_v47  ;;  %v1301_v48 = vmul.f32 1.442695, %v1292_v1  ;;  %v1303_v31 = vmul.f32 1.442695, %v1293_v59 }
 0x36d   :  { %v1276_v40 = vmax.f32 %v1274_v20, %v1275_v51  ;;  %v1288_v41 = vmax.f32 %v1286_v23, %v1287_v60  ;;  %v1295_v52 = vsub.f32 %v4726_v16, %v1269_v49  ;;  %3947 = vpow2.f32 %v1299_v3 }
 0x36e   :  { %v1283_v22 = vmax.f32 %v1281_v7, %v1282_v35  ;;  %3949 = vpow2.f32 %v1301_v48  ;;  %v1305_v17 = vmul.f32 1.442695, %v1294_v39  ;;  %v1684_v26 = vadd.f32 %v1683_v4, %v4780_v0 }
 0x36f   :  { %v1289_v61 = vrot.slane %v1288_v41, 1  ;;  %v1296_v44 = vsub.f32 %v4729_v42, %v1276_v40  ;;  %3951 = vpow2.f32 %v1303_v31  ;;  %v1307_v55 = vmul.f32 1.442695, %v1295_v52 }
 0x370   :  { %v1297_v33 = vsub.f32 %v4732_v45, %v1283_v22  ;;  %3953 = vpow2.f32 %v1305_v17  ;;  %v1690_v10 = vrot.slane %v4784_v21, 1  ;;  %v1695_v16 = vrot.slane %v4782_v38, 2 }
 0x371   :  { %v1290_v9 = vmax.f32 %v1288_v41, %v1289_v61  ;;  %3955 = vpow2.f32 %v1307_v55  ;;  %v1309_v50 = vmul.f32 1.442695, %v1296_v44  ;;  %v1710_v46 = vmul.f32 %v3944_v30, %v4753_v25 }
 0x372   :  { %v1311_v54 = vmul.f32 1.442695, %v1297_v33  ;;  %v1691_v0 = vadd.f32 %v1690_v10, %v4784_v21  ;;  %v1696_v4 = vadd.f32 %v1695_v16, %v4782_v38  ;;  %3957 = vrcp.f32 %v1684_v26 }
 0x373   :  { %v1298_v42 = vsub.f32 %v4735_v19, %v1290_v9  ;;  %3959 = vpow2.f32 %v1309_v50  ;;  %v1711_v45 = vmul.f32 %v3946_v56, %v4762_v12  ;;  %v1719_v2 = vmul.f32 %v4801_v15, %v1708_v58 }
 0x374   :  { %3961 = vpow2.f32 %v1311_v54  ;;  %v1697_v27 = vrot.slane %v1696_v4, 1  ;;  %v1720_v24 = vmul.f32 %v4801_v15, %v1709_v43  ;;  %v1721_v8 = vmul.f32 %v4801_v15, %v1710_v46 }
 0x375   :  { %v1313_v25 = vmul.f32 1.442695, %v1298_v42  ;;  %3963 = vrcp.f32 %v1691_v0  ;;  %v4825_v21 = vmul.f32 %v4801_v15, %v1711_v45  ;;  %v1726_v38 = vsel %vm166_vm3, %v1718_v36, 0.0 }
 0x376   :  { %v1698_v1 = vadd.f32 %v1697_v27, %v1696_v4  ;;  %v1727_v19 = vrot.slane %v1726_v38, 4  ;;  %v1733_v18 = vsel %vm166_vm3, %v1719_v2, 0.0  ;;  %v1740_v12 = vsel %vm166_vm3, %v1720_v24, 0.0 }
 0x377   :  { %v4830_v62 = vpop.eup %3947  ;;  %3965 = vpow2.f32 %v1313_v25  ;;  %v1734_v32 = vrot.slane %v1733_v18, 4  ;;  %v1741_v63 = vrot.slane %v1740_v12, 4  ;;  %v1747_v23 = vsel %vm166_vm3, %v1721_v8, 0.0 }
 0x378   :  { %v4833_v6 = vpop.eup %3949  ;;  %v1315_v58 = vsel %vm166_vm3, %v4830_v62, 0.0  ;;  %3967 = vrcp.f32 %v1698_v1  ;;  %v1728_v14 = vadd.f32 %v1727_v19, %v1726_v38  ;;  %v1748_v20 = vrot.slane %v1747_v23, 4 }
 0x379   :  { %v4837_v59 = vpop.eup %3951  ;;  %v1316_v30 = vrot.slane %v1315_v58, 4  ;;  %v1322_v43 = vsel %vm166_vm3, %v4833_v6, 0.0  ;;  %v4841_v36 = vadd.f32 %v1734_v32, %v1733_v18  ;;  %v4843_v47 = vadd.f32 %v1741_v63, %v1740_v12 }
 0x37a   :  { %v4845_v7 = vpop.eup %3953  ;;  %v1323_v56 = vrot.slane %v1322_v43, 4  ;;  %v1329_v49 = vsel %vm166_vm3, %v4837_v59, 0.0  ;;  %v1729_v51 = vrot.slane %v1728_v14, 2  ;;  %v4849_v60 = vadd.f32 %v1748_v20, %v1747_v23 }
 0x37b   :  { %v4851_v3 = vpop.eup %3955  ;;  %v1317_v35 = vadd.f32 %v1316_v30, %v1315_v58  ;;  %v1330_v39 = vrot.slane %v1329_v49, 4  ;;  %v1336_v48 = vsel %vm166_vm3, %v4845_v7, 0.0  ;;  %v1736_v31 = vrot.slane %v4841_v36, 2 }
 0x37c   :  { %v3958_v40 = vpop.eup %3957  ;;  %v1324_v41 = vadd.f32 %v1323_v56, %v1322_v43  ;;  %v1337_v52 = vrot.slane %v1336_v48, 4  ;;  %v1343_v22 = vsel %vm166_vm3, %v4851_v3, 0.0  ;;  %v1730_v17 = vadd.f32 %v1729_v51, %v1728_v14 }
 0x37d   :  { %v4858_v26 = vpop.eup %3959  ;;  %v1318_v61 = vrot.slane %v1317_v35, 2  ;;  %v1331_v44 = vadd.f32 %v1330_v39, %v1329_v49  ;;  %v1344_v55 = vrot.slane %v1343_v22, 4  ;;  %v1712_v33 = vmul.f32 %v3958_v40, %v4766_v13 }
 0x37e   :  { %v4861_v10 = vpop.eup %3961  ;;  %v1325_v16 = vrot.slane %v1324_v41, 2  ;;  %v1338_v9 = vadd.f32 %v1337_v52, %v1336_v48  ;;  %v1350_v50 = vsel %vm166_vm3, %v4858_v26, 0.0  ;;  %v1731_v46 = vrot.slane %v1730_v17, 1 }
 0x37f   :  { %v3964_v54 = vpop.eup %3963  ;;  %v1319_v0 = vadd.f32 %v1318_v61, %v1317_v35  ;;  %v1332_v4 = vrot.slane %v1331_v44, 2  ;;  %v1345_v42 = vadd.f32 %v1344_v55, %v1343_v22  ;;  %v1351_v45 = vrot.slane %v1350_v50, 4 }
 0x380   :  { %v1326_v2 = vadd.f32 %v1325_v16, %v1324_v41  ;;  %v1339_v27 = vrot.slane %v1338_v9, 2  ;;  %v1357_v24 = vsel %vm166_vm3, %v4861_v10, 0.0  ;;  %v1713_v13 = vmul.f32 %v3964_v54, %v4770_v57 }
 0x381   :  { %v4868_v8 = vpop.eup %3965  ;;  %v1320_v25 = vrot.slane %v1319_v0, 1  ;;  %v1333_v38 = vadd.f32 %v1332_v4, %v1331_v44  ;;  %v1346_v1 = vrot.slane %v1345_v42, 2  ;;  %v1352_v19 = vadd.f32 %v1351_v45, %v1350_v50 }
 0x382   :  { %v3968_v18 = vpop.eup %3967  ;;  %v1327_v12 = vrot.slane %v1326_v2, 1  ;;  %v1340_v32 = vadd.f32 %v1339_v27, %v1338_v9  ;;  %v1358_v63 = vrot.slane %v1357_v24, 4  ;;  %v1364_v23 = vsel %vm166_vm3, %v4868_v8, 0.0 }
 0x383   :  { %v1321_v58 = vadd.f32 %v1320_v25, %v1319_v0  ;;  %v1334_v14 = vrot.slane %v1333_v38, 1  ;;  %v1347_v20 = vadd.f32 %v1346_v1, %v1345_v42  ;;  %v1353_v30 = vrot.slane %v1352_v19, 2 }
 0x384   :  { %v1328_v43 = vadd.f32 %v1327_v12, %v1326_v2  ;;  %v1341_v56 = vrot.slane %v1340_v32, 1  ;;  %v1359_v57 = vadd.f32 %v1358_v63, %v1357_v24  ;;  %v1365_v49 = vrot.slane %v1364_v23, 4 }
 0x385   :  { %v1335_v51 = vadd.f32 %v1334_v14, %v1333_v38  ;;  %v1348_v35 = vrot.slane %v1347_v20, 1  ;;  %v1354_v39 = vadd.f32 %v1353_v30, %v1352_v19  ;;  %3969 = vrcp.f32 %v1321_v58  ;;  %v1388_v14 = vpop.permute.xlu0 %1387 }
 0x386   :  { %v1342_v48 = vadd.f32 %v1341_v56, %v1340_v32  ;;  %v1360_v40 = vrot.slane %v1359_v57, 2  ;;  %3971 = vrcp.f32 %v1328_v43  ;;  %v1366_v41 = vadd.f32 %v1365_v49, %v1364_v23 }
 0x387   :  { %v1349_v52 = vadd.f32 %v1348_v35, %v1347_v20  ;;  %3973 = vrcp.f32 %v1335_v51  ;;  %v1355_v22 = vrot.slane %v1354_v39, 1  ;;  %v1714_v61 = vmul.f32 %v3968_v18, %v4774_v11 }
 0x388   :  { %3975 = vrcp.f32 %v1342_v48  ;;  %v1361_v44 = vadd.f32 %v1360_v40, %v1359_v57  ;;  %v1367_v55 = vrot.slane %v1366_v41, 2  ;;  %v1723_v16 = vmul.f32 %v4801_v15, %v1712_v33 }
 0x389   :  { %3977 = vrcp.f32 %v1349_v52  ;;  %v1356_v9 = vadd.f32 %v1355_v22, %v1354_v39  ;;  %v1724_v50 = vmul.f32 %v4801_v15, %v1713_v13  ;;  %v1725_v54 = vmul.f32 %v4801_v15, %v1714_v61 }
 0x38a   :  { %v1362_v0 = vrot.slane %v1361_v44, 1  ;;  %v1368_v4 = vadd.f32 %v1367_v55, %v1366_v41  ;;  %v4876_v42 = vadd.f32 %v1731_v46, %v1730_v17  ;;  %v1737_v45 = vadd.f32 %v1736_v31, %v4841_v36 }
 0x38b   :  { %3979 = vrcp.f32 %v1356_v9  ;;  %v1743_v11 = vrot.slane %v4843_v47, 2  ;;  %v1750_v2 = vrot.slane %v4849_v60, 2  ;;  %v1754_v33 = vsel %vm166_vm3, %v4825_v21, 0.0 }
 0x38c   :  { %v1363_v27 = vadd.f32 %v1362_v0, %v1361_v44  ;;  %v1369_v24 = vrot.slane %v1368_v4, 1  ;;  %v1738_v13 = vrot.slane %v1737_v45, 1  ;;  %v1755_v15 = vrot.slane %v1754_v33, 4 }
 0x38d   :  { %v1744_v25 = vadd.f32 %v1743_v11, %v4843_v47  ;;  %v1751_v17 = vadd.f32 %v1750_v2, %v4849_v60  ;;  %v1761_v46 = vsel %vm166_vm3, %v1723_v16, 0.0  ;;  %v1768_v36 = vsel %vm166_vm3, %v1724_v50, 0.0 }
 0x38e   :  { %v1370_v31 = vadd.f32 %v1369_v24, %v1368_v4  ;;  %3981 = vrcp.f32 %v1363_v27  ;;  %v4889_v38 = vadd.f32 %v1738_v13, %v1737_v45  ;;  %v1756_v1 = vadd.f32 %v1755_v15, %v1754_v33 }
 0x38f   :  { %v3970_v19 = vpop.eup %3969  ;;  %v1745_v18 = vrot.slane %v1744_v25, 1  ;;  %v1752_v21 = vrot.slane %v1751_v17, 1  ;;  %v1762_v12 = vrot.slane %v1761_v46, 4  ;;  %v1769_v32 = vrot.slane %v1768_v36, 4 }
 0x390   :  { %v3972_v63 = vpop.eup %3971  ;;  %v1379_v23 = vmul.f32 %v3970_v19, %v4830_v62  ;;  %3983 = vrcp.f32 %v1370_v31  ;;  %v1757_v47 = vrot.slane %v1756_v1, 2  ;;  %v4893_v60 = vsel %vm166_vm3, %v1725_v54, 0.0 }
 0x391   :  { %v3974_v58 = vpop.eup %3973  ;;  %v1380_v20 = vmul.f32 %v3972_v63, %v4833_v6  ;;  %v4896_v30 = vadd.f32 %v1745_v18, %v1744_v25  ;;  %v4898_v43 = vadd.f32 %v1752_v21, %v1751_v17  ;;  %v1763_v56 = vadd.f32 %v1762_v12, %v1761_v46 }
 0x392   :  { %v3976_v57 = vpop.eup %3975  ;;  %v1381_v49 = vmul.f32 %v3974_v58, %v4837_v59  ;;  %v1390_v51 = vmul.f32 %v1388_v14, %v1379_v23  ;;  %v1758_v35 = vadd.f32 %v1757_v47, %v1756_v1  ;;  %v4901_v62 = vadd.f32 %v1769_v32, %v1768_v36 }
 0x393   :  { %v3978_v39 = vpop.eup %3977  ;;  %v1382_v48 = vmul.f32 %v3976_v57, %v4845_v7  ;;  %v1391_v40 = vmul.f32 %v1388_v14, %v1380_v20  ;;  %v1764_v41 = vrot.slane %v1763_v56, 2  ;;  %v1776_v52 = vrot.slane %v4893_v60, 4 }
 0x394   :  { %v1383_v6 = vmul.f32 %v3978_v39, %v4851_v3  ;;  %v1392_v22 = vmul.f32 %v1388_v14, %v1381_v49  ;;  %v1398_v61 = vsel %vm166_vm3, %v1390_v51, 0.0  ;;  %v1759_v44 = vrot.slane %v1758_v35, 1 }
 0x395   :  { %v3980_v55 = vpop.eup %3979  ;;  %v1393_v16 = vmul.f32 %v1388_v14, %v1382_v48  ;;  %v1399_v59 = vrot.slane %v1398_v61, 4  ;;  %v1405_v9 = vsel %vm166_vm3, %v1391_v40, 0.0  ;;  %v1765_v50 = vadd.f32 %v1764_v41, %v1763_v56 }
 0x396   :  { %v1384_v54 = vmul.f32 %v3980_v55, %v4858_v26  ;;  %v1394_v0 = vmul.f32 %v1388_v14, %v1383_v6  ;;  %v1406_v7 = vrot.slane %v1405_v9, 4  ;;  %v1412_v4 = vsel %vm166_vm3, %v1392_v22, 0.0 }
 0x397   :  { %v1400_v45 = vadd.f32 %v1399_v59, %v1398_v61  ;;  %v1413_v11 = vrot.slane %v1412_v4, 4  ;;  %v1419_v3 = vsel %vm166_vm3, %v1393_v16, 0.0  ;;  %v4911_v2 = vadd.f32 %v1759_v44, %v1758_v35 }
 0x398   :  { %v3982_v33 = vpop.eup %3981  ;;  %v1395_v27 = vmul.f32 %v1388_v14, %v1384_v54  ;;  %v1407_v24 = vadd.f32 %v1406_v7, %v1405_v9  ;;  %v1420_v13 = vrot.slane %v1419_v3, 4  ;;  %v1426_v15 = vsel %vm166_vm3, %v1394_v0, 0.0 }
 0x399   :  { %v1385_v25 = vmul.f32 %v3982_v33, %v4861_v10  ;;  %v1401_v17 = vrot.slane %v1400_v45, 2  ;;  %v1414_v26 = vadd.f32 %v1413_v11, %v1412_v4  ;;  %v1427_v46 = vrot.slane %v1426_v15, 4 }
 0x39a   :  { %v3984_v36 = vpop.eup %3983  ;;  %v1408_v31 = vrot.slane %v1407_v24, 2  ;;  %v1421_v1 = vadd.f32 %v1420_v13, %v1419_v3  ;;  %v1433_v19 = vsel %vm166_vm3, %v1395_v27, 0.0  ;;  %v1766_v18 = vrot.slane %v1765_v50, 1 }
 0x39b   :  { %v1386_v21 = vmul.f32 %v3984_v36, %v4868_v8  ;;  %v1396_v12 = vmul.f32 %v1388_v14, %v1385_v25  ;;  %v1402_v32 = vadd.f32 %v1401_v17, %v1400_v45  ;;  %v1415_v63 = vrot.slane %v1414_v26, 2 }
 0x39c   :  { %v1409_v23 = vadd.f32 %v1408_v31, %v1407_v24  ;;  %v1422_v47 = vrot.slane %v1421_v1, 2  ;;  %v1428_v58 = vadd.f32 %v1427_v46, %v1426_v15  ;;  %v1434_v20 = vrot.slane %v1433_v19, 4 }
 0x39d   :  { %v1397_v56 = vmul.f32 %v1388_v14, %v1386_v21  ;;  %v1403_v10 = vrot.slane %v1402_v32, 1  ;;  %v1416_v57 = vadd.f32 %v1415_v63, %v1414_v26  ;;  %v1440_v49 = vsel %vm166_vm3, %v1396_v12, 0.0 }
 0x39e   :  { %v1410_v51 = vrot.slane %v1409_v23, 1  ;;  %v1423_v35 = vadd.f32 %v1422_v47, %v1421_v1  ;;  %v1429_v39 = vrot.slane %v1428_v58, 2  ;;  %v1435_v48 = vadd.f32 %v1434_v20, %v1433_v19 }
 0x39f   :  { %v1404_v40 = vadd.f32 %v1403_v10, %v1402_v32  ;;  %v1417_v41 = vrot.slane %v1416_v57, 1  ;;  %v1441_v6 = vrot.slane %v1440_v49, 4  ;;  %v1447_v8 = vsel %vm166_vm3, %v1397_v56, 0.0  ;;  %v3678_v10 = vld [vmem:[%s5673_s3 + $0x28] sm:$0x1] }
 0x3a0   :  { %v1411_v22 = vadd.f32 %v1410_v51, %v1409_v23  ;;  %v1424_v61 = vrot.slane %v1423_v35, 1  ;;  %v1430_v44 = vadd.f32 %v1429_v39, %v1428_v58  ;;  %v1436_v55 = vrot.slane %v1435_v48, 2  ;;  %v1816_v51 = vpop.permute.xlu0 %1815  ;;  %v1818_v39 = vpop.permute.xlu1 %1817 }
 0x3a1   :  { %v1418_v16 = vadd.f32 %v1417_v41, %v1416_v57  ;;  %v1442_v59 = vadd.f32 %v1441_v6, %v1440_v49  ;;  %v1448_v14 = vrot.slane %v1447_v8, 4  ;;  %v1767_v9 = vadd.f32 %v1766_v18, %v1765_v50  ;;  %v3684_v41 = vld [vmem:[%s5679_s5 + $0x20] sm:$0xff]  ;;  %v3685_v6 = vld [vmem:[%s5679_s5 + $0x28] sm:$0x1] }
 0x3a2   :  { %v1425_v54 = vadd.f32 %v1424_v61, %v1423_v35  ;;  %v1431_v0 = vrot.slane %v1430_v44, 1  ;;  %v1437_v7 = vadd.f32 %v1436_v55, %v1435_v48  ;;  %v1790_v4 = vsel %vm912_vm7, %v1411_v22, %v1404_v40  ;;  %v3680_v22 = vld [vmem:[%s5678_s4 + $0x2] ss:$0 sm:$0xff] }
 0x3a3   :  { %v1443_v45 = vrot.slane %v1442_v59, 2  ;;  %v1449_v11 = vadd.f32 %v1448_v14, %v1447_v8  ;;  %v1791_v3 = vsel %vm914_vm8, %v1418_v16, %v1790_v4  ;;  %v1771_v33 = vrot.slane %v4901_v62, 2 }
 0x3a4   :  { %v1432_v27 = vadd.f32 %v1431_v0, %v1430_v44  ;;  %v1438_v24 = vrot.slane %v1437_v7, 1  ;;  %v1792_v13 = vsel %vm916_vm9, %v1425_v54, %v1791_v3  ;;  %v1777_v15 = vadd.f32 %v1776_v52, %v4893_v60 }
 0x3a5   :  { %v1444_v50 = vadd.f32 %v1443_v45, %v1442_v59  ;;  %v1450_v25 = vrot.slane %v1449_v11, 2  ;;  %v1772_v17 = vadd.f32 %v1771_v33, %v4901_v62  ;;  %v1805_v26 = vsel %vm912_vm7, %v4889_v38, %v4876_v42 }
 0x3a6   :  { %v1439_v46 = vadd.f32 %v1438_v24, %v1437_v7  ;;  %v1793_v36 = vsel %vm918_vm10, %v1432_v27, %v1792_v13  ;;  %v1778_v31 = vrot.slane %v1777_v15, 2  ;;  %v1806_v1 = vsel %vm914_vm8, %v4896_v30, %v1805_v26  ;;  %v2417_v26 = vpop.permute.xlu1 %2416 }
 0x3a7   :  { %v1445_v19 = vrot.slane %v1444_v50, 1  ;;  %v1451_v18 = vadd.f32 %v1450_v25, %v1449_v11  ;;  %v1773_v21 = vrot.slane %v1772_v17, 1  ;;  %v1807_v60 = vsel %vm916_vm9, %v4898_v43, %v1806_v1 }
 0x3a8   :  { %v1794_v52 = vsel %vm920_vm11, %v1439_v46, %v1793_v36  ;;  %v1779_v62 = vadd.f32 %v1778_v31, %v1777_v15  ;;  %v1808_v12 = vsel %vm918_vm10, %v4911_v2, %v1807_v60  ;;  %v3677_v2 = vld [vmem:[%s5673_s3 + $0x20] sm:$0xff]  ;;  %v3827_v8 = vpack.c.bf16 %v3685_v6, %v3684_v41 }
 0x3a9   :  { %v1446_v42 = vadd.f32 %v1445_v19, %v1444_v50  ;;  %v1452_v38 = vrot.slane %v1451_v18, 1  ;;  %v1774_v32 = vadd.f32 %v1773_v21, %v1772_v17  ;;  %v1809_v63 = vsel %vm920_vm11, %v1767_v9, %v1808_v12 }
 0x3aa   :  { %v1780_v23 = vrot.slane %v1779_v62, 1  ;;  %v3821_v57 = vpack.c.bf16 %v3678_v10, %v3677_v2  ;;  %3829 = vmatprep.subr.msk.bf16.mxu0 %vm4191_vm5, %v3827_v8 }
 0x3ab   :  { %v1453_v47 = vadd.f32 %v1452_v38, %v1451_v18  ;;  %v1795_v30 = vsel %vm922_vm12, %v1446_v42, %v1794_v52  ;;  %v1810_v58 = vsel %vm922_vm12, %v1774_v32, %v1809_v63 }
 0x3ac   :  { %v1781_v20 = vadd.f32 %v1780_v23, %v1779_v62  ;;  %3823 = vmatprep.subr.msk.bf16.mxu1 %vm4191_vm5, %v3821_v57 }
 0x3ad   :  { %v1796_v43 = vsel %vm924_vm13, %v1453_v47, %v1795_v30  ;;  %3826 = vmatpush3.bf16.msk.msra.mxu1 %vm4191_vm5, %v3821_v57 }
 0x3ae   :  { %3766 = vmatprep.mubr.msk.f32.mxu0 %vm166_vm3, %v1796_v43  ;;  %v1811_v56 = vsel %vm924_vm13, %v1781_v20, %v1810_v58 }
 0x3af   :  { %3767 = vmatmul.mubr.msk.f32.vlgmr.msra.gmra.mrb[4].mxu0 %vm166_vm3, %v1811_v56 }
 0x3b0   :  { %3832 = vmatpush3.bf16.msk.msra.mxu0 %vm4191_vm5, %v3827_v8 }
 0x482   :  { %v3768_v49 = vpop.f32.mrb[4].mxu0 }
 0x483   :  { %v1894_v35 = vpop.f32.mrb[5].mxu0  ;;  %v1900_v40 = vadd.f32 %v3768_v49, %v1818_v39 }
 0x484   :  { %v1895_v48 = vadd.f32 %v1894_v35, %v1816_v51 }
 0x486   :  { %3773 = vmatprep.mubr.msk.f32.mxu1 %vm166_vm3, %v1895_v48 }
 0x487   :  { %3774 = vmatmul.mubr.msk.f32.vlgmr.msra.gmra.mrb[4].mxu1 %vm166_vm3, %v1900_v40 }
 0x55a   :  { %v3775_v61 = vpop.f32.mrb[4].mxu1 }
 0x55b   :  { %v1995_v44 = vadd.f32 %v3775_v61, %v3680_v22  ;;  %v1989_v55 = vpop.f32.mrb[5].mxu1 }
 0x55c   :  { %v1990_v16 = vadd.f32 %v3680_v22, %v1989_v55 }
 0x55d   :  { %v2327_v59 = vcombine.high %v1995_v44, %v1995_v44  ;;  %v2334_v14 = vrot.slane %v1995_v44, %v4226_v29  ;;  %2689 = vrot.lane.b32.xlu1 %v1995_v44, %s4116_s7 }
 0x55e   :  { %v1999_v9 = vcombine.high %v1990_v16, %v1990_v16  ;;  %v2006_v54 = vrot.slane %v1990_v16, %v4226_v29  ;;  %2687 = vrot.lane.b32.xlu0 %v1990_v16, %s4116_s7 }
 0x55f   :  { %v2341_v0 = vrot.slane %v2327_v59, %v4226_v29  ;;  %v2342_v7 = vcombine.high %v2334_v14, %v2334_v14  ;;  %v2350_v4 = vrot.slane %v2334_v14, %v4226_v29 }
 0x560   :  { %v2013_v45 = vrot.slane %v1999_v9, %v4226_v29  ;;  %v2014_v11 = vcombine.high %v2006_v54, %v2006_v54  ;;  %v4978_v3 = vrot.slane %v2006_v54, %v4226_v29 }
 0x561   :  { %v2343_v33 = vcombine.high %v2341_v0, %v2341_v0  ;;  %v2357_v27 = vrot.slane %v2341_v0, %v4226_v29  ;;  %v2364_v24 = vrot.slane %v2342_v7, %v4226_v29  ;;  %v2372_v13 = vcombine.high %v2350_v4, %v2350_v4  ;;  %3288 = vrot.lane.b32.xlu1 %v4230_v34, %s4122_s30 }
 0x562   :  { %v2379_v15 = vrot.slane %v2350_v4, %v4233_v37  ;;  %v2015_v50 = vcombine.high %v2013_v45, %v2013_v45  ;;  %v4985_v25 = vrot.slane %v2013_v45, %v4226_v29  ;;  %v4988_v17 = vrot.slane %v2014_v11, %v4226_v29  ;;  %2960 = vrot.lane.b32.xlu0 %v4224_v28, %s4122_s30 }
 0x563   :  { %v2371_v46 = vrot.slane %v2343_v33, %v4226_v29  ;;  %v2373_v36 = vcombine.high %v2357_v27, %v2357_v27  ;;  %v2374_v31 = vcombine.high %v2364_v24, %v2364_v24  ;;  %v2383_v1 = vrot.slane %v2364_v24, %v4233_v37 }
 0x564   :  { %v2387_v19 = vrot.slane %v2372_v13, %v4233_v37  ;;  %v2395_v18 = vrot.slane %v2357_v27, %v4233_v37  ;;  %v2419_v21 = vmul.f32 %v2417_v26, %v2379_v15  ;;  %v4996_v60 = vrot.slane %v2015_v50, %v4226_v29 }
 0x565   :  { %v2375_v52 = vcombine.high %v2371_v46, %v2371_v46  ;;  %v2391_v62 = vrot.slane %v2374_v31, %v4233_v37  ;;  %v2399_v12 = vrot.slane %v2371_v46, %v4233_v37  ;;  %v2403_v42 = vrot.slane %v2373_v36, %v4233_v37  ;;  %3459 = vrot.lane.b32.xlu1 %v4230_v34, %s4123_s10 }
 0x566   :  { %v2420_v38 = vmul.f32 %v2417_v26, %v2383_v1  ;;  %v2421_v32 = vmul.f32 %v2417_v26, %v2387_v19  ;;  %v2423_v63 = vmul.f32 %v2417_v26, %v2395_v18  ;;  %v5003_v23 = vadd.f32 %v2419_v21, %v4255_v53  ;;  %3131 = vrot.lane.b32.xlu0 %v4224_v28, %s4123_s10 }
 0x567   :  { %v2407_v47 = vrot.slane %v2375_v52, %v4233_v37  ;;  %v2422_v30 = vmul.f32 %v2417_v26, %v2391_v62  ;;  %v2424_v58 = vmul.f32 %v2417_v26, %v2399_v12  ;;  %v2425_v20 = vmul.f32 %v2417_v26, %v2403_v42 }
 0x568   :  { %v5008_v43 = vadd.f32 %v2420_v38, %v4255_v53  ;;  %v5011_v56 = vadd.f32 %v2421_v32, %v4255_v53  ;;  %v5014_v34 = vadd.f32 %v2423_v63, %v4255_v53  ;;  %v2435_v2 = vsel %vm166_vm3, %v5003_v23, -inf }
 0x569   :  { %v2426_v10 = vmul.f32 %v2417_v26, %v2407_v47  ;;  %v5019_v28 = vadd.f32 %v2422_v30, %v4255_v53  ;;  %v5022_v57 = vadd.f32 %v2424_v58, %v4255_v53  ;;  %v5025_v49 = vadd.f32 %v2425_v20, %v4255_v53 }
 0x56a   :  { %v2436_v51 = vrot.slane %v2435_v2, 4  ;;  %v2442_v35 = vsel %vm166_vm3, %v5008_v43, -inf  ;;  %v2449_v39 = vsel %vm166_vm3, %v5011_v56, -inf  ;;  %v2463_v48 = vsel %vm166_vm3, %v5014_v34, -inf }
 0x56b   :  { %v5034_v40 = vadd.f32 %v2426_v10, %v4255_v53  ;;  %v2443_v41 = vrot.slane %v2442_v35, 4  ;;  %v2450_v6 = vrot.slane %v2449_v39, 4  ;;  %v2456_v8 = vsel %vm166_vm3, %v5019_v28, -inf }
 0x56c   :  { %v2437_v22 = vmax.f32 %v2435_v2, %v2436_v51  ;;  %v2457_v61 = vrot.slane %v2456_v8, 4  ;;  %v2464_v44 = vrot.slane %v2463_v48, 4  ;;  %v2470_v55 = vsel %vm166_vm3, %v5022_v57, -inf }
 0x56d   :  { %v2444_v16 = vmax.f32 %v2442_v35, %v2443_v41  ;;  %v2451_v59 = vmax.f32 %v2449_v39, %v2450_v6  ;;  %v2471_v14 = vrot.slane %v2470_v55, 4  ;;  %v2477_v9 = vsel %vm166_vm3, %v5025_v49, -inf }
 0x56e   :  { %v2438_v54 = vrot.slane %v2437_v22, 2  ;;  %v2458_v0 = vmax.f32 %v2456_v8, %v2457_v61  ;;  %v2465_v7 = vmax.f32 %v2463_v48, %v2464_v44  ;;  %v2478_v4 = vrot.slane %v2477_v9, 4 }
 0x56f   :  { %v2445_v45 = vrot.slane %v2444_v16, 2  ;;  %v2452_v11 = vrot.slane %v2451_v59, 2  ;;  %v2472_v33 = vmax.f32 %v2470_v55, %v2471_v14  ;;  %v2484_v27 = vsel %vm166_vm3, %v5034_v40, -inf }
 0x570   :  { %v2439_v24 = vmax.f32 %v2437_v22, %v2438_v54  ;;  %v2459_v13 = vrot.slane %v2458_v0, 2  ;;  %v2466_v15 = vrot.slane %v2465_v7, 2  ;;  %v2479_v50 = vmax.f32 %v2477_v9, %v2478_v4 }
 0x571   :  { %v2446_v26 = vmax.f32 %v2444_v16, %v2445_v45  ;;  %v2453_v46 = vmax.f32 %v2451_v59, %v2452_v11  ;;  %v2473_v36 = vrot.slane %v2472_v33, 2  ;;  %v2485_v31 = vrot.slane %v2484_v27, 4 }
 0x572   :  { %v2440_v1 = vrot.slane %v2439_v24, 1  ;;  %v2460_v19 = vmax.f32 %v2458_v0, %v2459_v13  ;;  %v2467_v18 = vmax.f32 %v2465_v7, %v2466_v15  ;;  %v2480_v21 = vrot.slane %v2479_v50, 2 }
 0x573   :  { %v2447_v52 = vrot.slane %v2446_v26, 1  ;;  %v2454_v62 = vrot.slane %v2453_v46, 1  ;;  %v2474_v12 = vmax.f32 %v2472_v33, %v2473_v36  ;;  %v2486_v42 = vmax.f32 %v2484_v27, %v2485_v31 }
 0x574   :  { %v2441_v38 = vmax.f32 %v2439_v24, %v2440_v1  ;;  %v2461_v32 = vrot.slane %v2460_v19, 1  ;;  %v2468_v63 = vrot.slane %v2467_v18, 1  ;;  %v2481_v47 = vmax.f32 %v2479_v50, %v2480_v21  ;;  %v2089_v24 = vpop.permute.xlu0 %2088 }
 0x575   :  { %v2448_v30 = vmax.f32 %v2446_v26, %v2447_v52  ;;  %v2455_v58 = vmax.f32 %v2453_v46, %v2454_v62  ;;  %v2475_v20 = vrot.slane %v2474_v12, 1  ;;  %v2487_v2 = vrot.slane %v2486_v42, 2 }
 0x576   :  { %v2462_v10 = vmax.f32 %v2460_v19, %v2461_v32  ;;  %v2469_v51 = vmax.f32 %v2467_v18, %v2468_v63  ;;  %v2482_v35 = vrot.slane %v2481_v47, 1  ;;  %v2491_v39 = vsub.f32 %v5003_v23, %v2441_v38 }
 0x577   :  { %v2476_v48 = vmax.f32 %v2474_v12, %v2475_v20  ;;  %v2488_v41 = vmax.f32 %v2486_v42, %v2487_v2  ;;  %v2492_v6 = vsub.f32 %v5008_v43, %v2448_v30  ;;  %v2493_v8 = vsub.f32 %v5011_v56, %v2455_v58 }
 0x578   :  { %v2483_v22 = vmax.f32 %v2481_v47, %v2482_v35  ;;  %v2494_v61 = vsub.f32 %v5019_v28, %v2462_v10  ;;  %v2495_v44 = vsub.f32 %v5014_v34, %v2469_v51  ;;  %v2499_v55 = vmul.f32 1.442695, %v2491_v39 }
 0x579   :  { %v2489_v16 = vrot.slane %v2488_v41, 1  ;;  %v2496_v59 = vsub.f32 %v5022_v57, %v2476_v48  ;;  %v2501_v14 = vmul.f32 1.442695, %v2492_v6  ;;  %v2503_v9 = vmul.f32 1.442695, %v2493_v8 }
 0x57a   :  { %v2497_v54 = vsub.f32 %v5025_v49, %v2483_v22  ;;  %3985 = vpow2.f32 %v2499_v55  ;;  %v2505_v23 = vmul.f32 1.442695, %v2494_v61  ;;  %v2507_v0 = vmul.f32 1.442695, %v2495_v44 }
 0x57b   :  { %v2490_v7 = vmax.f32 %v2488_v41, %v2489_v16  ;;  %3987 = vpow2.f32 %v2501_v14  ;;  %v2509_v43 = vmul.f32 1.442695, %v2496_v59  ;;  %v2044_v56 = vcombine.high %v4978_v3, %v4978_v3 }
 0x57c   :  { %3989 = vpow2.f32 %v2503_v9  ;;  %v2511_v28 = vmul.f32 1.442695, %v2497_v54  ;;  %v2045_v34 = vcombine.high %v4985_v25, %v4985_v25  ;;  %v2046_v57 = vcombine.high %v4988_v17, %v4988_v17 }
 0x57d   :  { %v2498_v4 = vsub.f32 %v5034_v40, %v2490_v7  ;;  %3991 = vpow2.f32 %v2505_v23  ;;  %v2047_v49 = vcombine.high %v4996_v60, %v4996_v60  ;;  %v2051_v45 = vrot.slane %v4978_v3, %v4233_v37 }
 0x57e   :  { %3993 = vpow2.f32 %v2507_v0  ;;  %v2055_v11 = vrot.slane %v4988_v17, %v4233_v37  ;;  %v2059_v33 = vrot.slane %v2044_v56, %v4233_v37  ;;  %v2063_v27 = vrot.slane %v2046_v57, %v4233_v37 }
 0x57f   :  { %3995 = vpow2.f32 %v2509_v43  ;;  %v2513_v13 = vmul.f32 1.442695, %v2498_v4  ;;  %v2067_v40 = vrot.slane %v4985_v25, %v4233_v37  ;;  %v2071_v15 = vrot.slane %v4996_v60, %v4233_v37 }
 0x580   :  { %3997 = vpow2.f32 %v2511_v28  ;;  %v2075_v3 = vrot.slane %v2045_v34, %v4233_v37  ;;  %v2079_v50 = vrot.slane %v2047_v49, %v4233_v37  ;;  %v2091_v26 = vmul.f32 %v2089_v24, %v2051_v45 }
 0x581   :  { %3999 = vpow2.f32 %v2513_v13  ;;  %v2092_v17 = vmul.f32 %v2089_v24, %v2055_v11  ;;  %v2093_v46 = vmul.f32 %v2089_v24, %v2059_v33  ;;  %v2094_v36 = vmul.f32 %v2089_v24, %v2063_v27 }
 0x582   :  { %v2095_v31 = vmul.f32 %v2089_v24, %v2067_v40  ;;  %v2096_v1 = vmul.f32 %v2089_v24, %v2071_v15  ;;  %v2097_v19 = vmul.f32 %v2089_v24, %v2075_v3  ;;  %v2098_v18 = vmul.f32 %v2089_v24, %v2079_v50 }
 0x583   :  { %v5073_v21 = vadd.f32 %v2091_v26, %v4255_v53  ;;  %v5076_v25 = vadd.f32 %v2092_v17, %v4255_v53  ;;  %v5079_v60 = vadd.f32 %v2093_v46, %v4255_v53  ;;  %v5082_v52 = vadd.f32 %v2094_v36, %v4255_v53 }
 0x584   :  { %v5084_v62 = vpop.eup %3985  ;;  %v5087_v12 = vadd.f32 %v2095_v31, %v4255_v53  ;;  %v5090_v42 = vadd.f32 %v2096_v1, %v4255_v53  ;;  %v5093_v38 = vadd.f32 %v2097_v19, %v4255_v53  ;;  %v5096_v32 = vadd.f32 %v2098_v18, %v4255_v53 }
 0x585   :  { %v5098_v63 = vpop.eup %3987  ;;  %v2515_v47 = vsel %vm166_vm3, %v5084_v62, 0.0  ;;  %v2107_v30 = vsel %vm166_vm3, %v5073_v21, -inf  ;;  %v2114_v58 = vsel %vm166_vm3, %v5076_v25, -inf  ;;  %v5108_v20 = vsel %vm166_vm3, %v5079_v60, -inf }
 0x586   :  { %v5110_v2 = vpop.eup %3989  ;;  %v2516_v10 = vrot.slane %v2515_v47, 4  ;;  %v2522_v51 = vsel %vm166_vm3, %v5098_v63, 0.0  ;;  %v2108_v35 = vrot.slane %v2107_v30, 4  ;;  %v2115_v39 = vrot.slane %v2114_v58, 4 }
 0x587   :  { %v5114_v48 = vpop.eup %3991  ;;  %v2523_v41 = vrot.slane %v2522_v51, 4  ;;  %v2529_v6 = vsel %vm166_vm3, %v5110_v2, 0.0  ;;  %v2122_v8 = vrot.slane %v5108_v20, 4  ;;  %v5121_v22 = vsel %vm166_vm3, %v5082_v52, -inf }
 0x588   :  { %v5123_v61 = vpop.eup %3993  ;;  %v2517_v44 = vadd.f32 %v2516_v10, %v2515_v47  ;;  %v2530_v55 = vrot.slane %v2529_v6, 4  ;;  %v2536_v16 = vsel %vm166_vm3, %v5114_v48, 0.0  ;;  %v2109_v59 = vmax.f32 %v2107_v30, %v2108_v35 }
 0x589   :  { %v5127_v14 = vpop.eup %3995  ;;  %v2524_v9 = vadd.f32 %v2523_v41, %v2522_v51  ;;  %v2537_v54 = vrot.slane %v2536_v16, 4  ;;  %v2543_v23 = vsel %vm166_vm3, %v5123_v61, 0.0  ;;  %v2116_v0 = vmax.f32 %v2114_v58, %v2115_v39 }
 0x58a   :  { %v5131_v7 = vpop.eup %3997  ;;  %v2518_v43 = vrot.slane %v2517_v44, 2  ;;  %v2531_v56 = vadd.f32 %v2530_v55, %v2529_v6  ;;  %v2544_v28 = vrot.slane %v2543_v23, 4  ;;  %v2550_v34 = vsel %vm166_vm3, %v5127_v14, 0.0 }
 0x58b   :  { %v5135_v57 = vpop.eup %3999  ;;  %v2525_v4 = vrot.slane %v2524_v9, 2  ;;  %v2538_v49 = vadd.f32 %v2537_v54, %v2536_v16  ;;  %v2551_v45 = vrot.slane %v2550_v34, 4  ;;  %v2557_v11 = vsel %vm166_vm3, %v5131_v7, 0.0 }
 0x58c   :  { %v2519_v33 = vadd.f32 %v2518_v43, %v2517_v44  ;;  %v2532_v27 = vrot.slane %v2531_v56, 2  ;;  %v2545_v24 = vadd.f32 %v2544_v28, %v2543_v23  ;;  %v2558_v13 = vrot.slane %v2557_v11, 4 }
 0x58d   :  { %v2526_v40 = vadd.f32 %v2525_v4, %v2524_v9  ;;  %v2539_v15 = vrot.slane %v2538_v49, 2  ;;  %v2552_v3 = vadd.f32 %v2551_v45, %v2550_v34  ;;  %v2564_v50 = vsel %vm166_vm3, %v5135_v57, 0.0 }
 0x58e   :  { %v2520_v26 = vrot.slane %v2519_v33, 1  ;;  %v2533_v17 = vadd.f32 %v2532_v27, %v2531_v56  ;;  %v2546_v46 = vrot.slane %v2545_v24, 2  ;;  %v2559_v36 = vadd.f32 %v2558_v13, %v2557_v11 }
 0x58f   :  { %v2527_v31 = vrot.slane %v2526_v40, 1  ;;  %v2540_v1 = vadd.f32 %v2539_v15, %v2538_v49  ;;  %v2553_v19 = vrot.slane %v2552_v3, 2  ;;  %v2565_v18 = vrot.slane %v2564_v50, 4 }
 0x590   :  { %v2521_v47 = vadd.f32 %v2520_v26, %v2519_v33  ;;  %v2534_v30 = vrot.slane %v2533_v17, 1  ;;  %v2547_v58 = vadd.f32 %v2546_v46, %v2545_v24  ;;  %v2560_v10 = vrot.slane %v2559_v36, 2 }
 0x591   :  { %v2528_v51 = vadd.f32 %v2527_v31, %v2526_v40  ;;  %v2541_v35 = vrot.slane %v2540_v1, 1  ;;  %v5141_v39 = vadd.f32 %v2553_v19, %v2552_v3  ;;  %v5143_v41 = vadd.f32 %v2565_v18, %v2564_v50 }
 0x592   :  { %v2535_v6 = vadd.f32 %v2534_v30, %v2533_v17  ;;  %v2548_v44 = vrot.slane %v2547_v58, 1  ;;  %v5145_v55 = vadd.f32 %v2560_v10, %v2559_v36  ;;  %4001 = vrcp.f32 %v2521_v47 }
 0x593   :  { %v2542_v16 = vadd.f32 %v2541_v35, %v2540_v1  ;;  %v2555_v9 = vrot.slane %v5141_v39, 1  ;;  %4003 = vrcp.f32 %v2528_v51  ;;  %v2110_v54 = vrot.slane %v2109_v59, 2 }
 0x594   :  { %v2549_v23 = vadd.f32 %v2548_v44, %v2547_v58  ;;  %4005 = vrcp.f32 %v2535_v6  ;;  %v2117_v43 = vrot.slane %v2116_v0, 2  ;;  %v2123_v56 = vmax.f32 %v5108_v20, %v2122_v8 }
 0x595   :  { %4007 = vrcp.f32 %v2542_v16  ;;  %v2111_v28 = vmax.f32 %v2109_v59, %v2110_v54  ;;  %v2129_v34 = vrot.slane %v5121_v22, 4  ;;  %v2135_v4 = vsel %vm166_vm3, %v5087_v12, -inf }
 0x596   :  { %4009 = vrcp.f32 %v2549_v23  ;;  %v2118_v49 = vmax.f32 %v2116_v0, %v2117_v43  ;;  %v2124_v45 = vrot.slane %v2123_v56, 2  ;;  %v2136_v11 = vrot.slane %v2135_v4, 4  ;;  %v5162_v23 = vpop.permute.xlu1 %2587 }
 0x597   :  { %v2112_v33 = vrot.slane %v2111_v28, 1  ;;  %v2130_v27 = vmax.f32 %v5121_v22, %v2129_v34  ;;  %v2142_v24 = vsel %vm166_vm3, %v5090_v42, -inf  ;;  %v2149_v20 = vsel %vm166_vm3, %v5093_v38, -inf }
 0x598   :  { %v2119_v8 = vrot.slane %v2118_v49, 1  ;;  %v2125_v59 = vmax.f32 %v2123_v56, %v2124_v45  ;;  %v2137_v13 = vmax.f32 %v2135_v4, %v2136_v11  ;;  %v2143_v40 = vrot.slane %v2142_v24, 4 }
 0x599   :  { %v2113_v15 = vmax.f32 %v2111_v28, %v2112_v33  ;;  %v2131_v3 = vrot.slane %v2130_v27, 2  ;;  %v2150_v50 = vrot.slane %v2149_v20, 4  ;;  %v2156_v0 = vsel %vm166_vm3, %v5096_v32, -inf }
 0x59a   :  { %v2120_v26 = vmax.f32 %v2118_v49, %v2119_v8  ;;  %v2126_v17 = vrot.slane %v2125_v59, 1  ;;  %v2138_v46 = vrot.slane %v2137_v13, 2  ;;  %v2144_v22 = vmax.f32 %v2142_v24, %v2143_v40 }
 0x59b   :  { %v2132_v36 = vmax.f32 %v2130_v27, %v2131_v3  ;;  %v2151_v31 = vmax.f32 %v2149_v20, %v2150_v50  ;;  %v2157_v1 = vrot.slane %v2156_v0, 4  ;;  %v2163_v19 = vsub.f32 %v5073_v21, %v2113_v15 }
 0x59c   :  { %v4002_v18 = vpop.eup %4001  ;;  %v2127_v47 = vmax.f32 %v2125_v59, %v2126_v17  ;;  %v2139_v30 = vmax.f32 %v2137_v13, %v2138_v46  ;;  %v2145_v58 = vrot.slane %v2144_v22, 2  ;;  %v2164_v10 = vsub.f32 %v5076_v25, %v2120_v26 }
 0x59d   :  { %v4004_v51 = vpop.eup %4003  ;;  %v2579_v35 = vmul.f32 %v4002_v18, %v5084_v62  ;;  %v2133_v6 = vrot.slane %v2132_v36, 1  ;;  %v2152_v44 = vrot.slane %v2151_v31, 2  ;;  %v2158_v16 = vmax.f32 %v2156_v0, %v2157_v1 }
 0x59e   :  { %v4006_v54 = vpop.eup %4005  ;;  %v2580_v43 = vmul.f32 %v4004_v51, %v5098_v63  ;;  %v2140_v56 = vrot.slane %v2139_v30, 1  ;;  %v2146_v28 = vmax.f32 %v2144_v22, %v2145_v58  ;;  %v2165_v21 = vsub.f32 %v5079_v60, %v2127_v47 }
 0x59f   :  { %v4008_v34 = vpop.eup %4007  ;;  %v2581_v4 = vmul.f32 %v4006_v54, %v5110_v2  ;;  %v2590_v25 = vmul.f32 %v5162_v23, %v2579_v35  ;;  %v2134_v49 = vmax.f32 %v2132_v36, %v2133_v6  ;;  %v2153_v45 = vmax.f32 %v2151_v31, %v2152_v44 }
 0x5a0   :  { %v4010_v62 = vpop.eup %4009  ;;  %v2141_v11 = vmax.f32 %v2139_v30, %v2140_v56  ;;  %v2147_v33 = vrot.slane %v2146_v28, 1  ;;  %v2159_v27 = vrot.slane %v2158_v16, 2  ;;  %v2171_v24 = vmul.f32 1.442695, %v2163_v19 }
 0x5a1   :  { %v2154_v20 = vrot.slane %v2153_v45, 1  ;;  %v2166_v8 = vsub.f32 %v5082_v52, %v2134_v49  ;;  %v2173_v63 = vmul.f32 1.442695, %v2164_v10  ;;  %v2175_v59 = vmul.f32 1.442695, %v2165_v21 }
 0x5a2   :  { %v2148_v13 = vmax.f32 %v2146_v28, %v2147_v33  ;;  %v2160_v40 = vmax.f32 %v2158_v16, %v2159_v27  ;;  %v2167_v60 = vsub.f32 %v5087_v12, %v2141_v11  ;;  %4011 = vpow2.f32 %v2171_v24 }
 0x5a3   :  { %v2155_v2 = vmax.f32 %v2153_v45, %v2154_v20  ;;  %4013 = vpow2.f32 %v2173_v63  ;;  %v2177_v15 = vmul.f32 1.442695, %v2166_v8  ;;  %v2556_v3 = vadd.f32 %v2555_v9, %v5141_v39 }
 0x5a4   :  { %v2161_v50 = vrot.slane %v2160_v40, 1  ;;  %v2168_v0 = vsub.f32 %v5090_v42, %v2148_v13  ;;  %4015 = vpow2.f32 %v2175_v59  ;;  %v2179_v26 = vmul.f32 1.442695, %v2167_v60 }
 0x5a5   :  { %v2169_v52 = vsub.f32 %v5093_v38, %v2155_v2  ;;  %4017 = vpow2.f32 %v2177_v15  ;;  %v2562_v17 = vrot.slane %v5145_v55, 1  ;;  %v2567_v12 = vrot.slane %v5143_v41, 2 }
 0x5a6   :  { %v2162_v46 = vmax.f32 %v2160_v40, %v2161_v50  ;;  %4019 = vpow2.f32 %v2179_v26  ;;  %v2181_v22 = vmul.f32 1.442695, %v2168_v0  ;;  %v2582_v36 = vmul.f32 %v4008_v34, %v5114_v48 }
 0x5a7   :  { %v2183_v31 = vmul.f32 1.442695, %v2169_v52  ;;  %v2563_v39 = vadd.f32 %v2562_v17, %v5145_v55  ;;  %v2568_v9 = vadd.f32 %v2567_v12, %v5143_v41  ;;  %4021 = vrcp.f32 %v2556_v3 }
 0x5a8   :  { %v2170_v42 = vsub.f32 %v5096_v32, %v2162_v46  ;;  %4023 = vpow2.f32 %v2181_v22  ;;  %v2583_v38 = vmul.f32 %v4010_v62, %v5123_v61  ;;  %v2591_v1 = vmul.f32 %v5162_v23, %v2580_v43 }
 0x5a9   :  { %4025 = vpow2.f32 %v2183_v31  ;;  %v2569_v19 = vrot.slane %v2568_v9, 1  ;;  %v2592_v18 = vmul.f32 %v5162_v23, %v2581_v4  ;;  %v2593_v47 = vmul.f32 %v5162_v23, %v2582_v36 }
 0x5aa   :  { %v2185_v48 = vmul.f32 1.442695, %v2170_v42  ;;  %4027 = vrcp.f32 %v2563_v39  ;;  %v5186_v55 = vmul.f32 %v5162_v23, %v2583_v38  ;;  %v2598_v41 = vsel %vm166_vm3, %v2590_v25, 0.0 }
 0x5ab   :  { %v2570_v30 = vadd.f32 %v2569_v19, %v2568_v9  ;;  %v2599_v32 = vrot.slane %v2598_v41, 4  ;;  %v2605_v58 = vsel %vm166_vm3, %v2591_v1, 0.0  ;;  %v2612_v61 = vsel %vm166_vm3, %v2592_v18, 0.0 }
 0x5ac   :  { %v5191_v10 = vpop.eup %4011  ;;  %4029 = vpow2.f32 %v2185_v48  ;;  %v2606_v51 = vrot.slane %v2605_v58, 4  ;;  %v2613_v35 = vrot.slane %v2612_v61, 4  ;;  %v2619_v6 = vsel %vm166_vm3, %v2593_v47, 0.0 }
 0x5ad   :  { %v5194_v44 = vpop.eup %4013  ;;  %v2187_v16 = vsel %vm166_vm3, %v5191_v10, 0.0  ;;  %4031 = vrcp.f32 %v2570_v30  ;;  %v2600_v54 = vadd.f32 %v2599_v32, %v2598_v41  ;;  %v2620_v43 = vrot.slane %v2619_v6, 4 }
 0x5ae   :  { %v5198_v56 = vpop.eup %4015  ;;  %v2188_v28 = vrot.slane %v2187_v16, 4  ;;  %v2194_v21 = vsel %vm166_vm3, %v5194_v44, 0.0  ;;  %v5202_v34 = vadd.f32 %v2606_v51, %v2605_v58  ;;  %v5204_v4 = vadd.f32 %v2613_v35, %v2612_v61 }
 0x5af   :  { %v5206_v25 = vpop.eup %4017  ;;  %v2195_v49 = vrot.slane %v2194_v21, 4  ;;  %v2201_v45 = vsel %vm166_vm3, %v5198_v56, 0.0  ;;  %v2601_v62 = vrot.slane %v2600_v54, 2  ;;  %v5210_v11 = vadd.f32 %v2620_v43, %v2619_v6 }
 0x5b0   :  { %v5212_v33 = vpop.eup %4019  ;;  %v2189_v27 = vadd.f32 %v2188_v28, %v2187_v16  ;;  %v2202_v24 = vrot.slane %v2201_v45, 4  ;;  %v2208_v20 = vsel %vm166_vm3, %v5206_v25, 0.0  ;;  %v2608_v8 = vrot.slane %v5202_v34, 2 }
 0x5b1   :  { %v4022_v63 = vpop.eup %4021  ;;  %v2196_v59 = vadd.f32 %v2195_v49, %v2194_v21  ;;  %v2209_v13 = vrot.slane %v2208_v20, 4  ;;  %v2215_v40 = vsel %vm166_vm3, %v5212_v33, 0.0  ;;  %v2602_v60 = vadd.f32 %v2601_v62, %v2600_v54 }
 0x5b2   :  { %v5219_v2 = vpop.eup %4023  ;;  %v2190_v15 = vrot.slane %v2189_v27, 2  ;;  %v2203_v3 = vadd.f32 %v2202_v24, %v2201_v45  ;;  %v2216_v50 = vrot.slane %v2215_v40, 4  ;;  %v2584_v0 = vmul.f32 %v4022_v63, %v5127_v14 }
 0x5b3   :  { %v5222_v26 = vpop.eup %4025  ;;  %v2197_v52 = vrot.slane %v2196_v59, 2  ;;  %v2210_v17 = vadd.f32 %v2209_v13, %v2208_v20  ;;  %v2222_v12 = vsel %vm166_vm3, %v5219_v2, 0.0  ;;  %v2603_v46 = vrot.slane %v2602_v60, 1 }
 0x5b4   :  { %v4028_v22 = vpop.eup %4027  ;;  %v2191_v36 = vadd.f32 %v2190_v15, %v2189_v27  ;;  %v2204_v31 = vrot.slane %v2203_v3, 2  ;;  %v2217_v39 = vadd.f32 %v2216_v50, %v2215_v40  ;;  %v2223_v9 = vrot.slane %v2222_v12, 4 }
 0x5b5   :  { %v2198_v42 = vadd.f32 %v2197_v52, %v2196_v59  ;;  %v2211_v38 = vrot.slane %v2210_v17, 2  ;;  %v2229_v1 = vsel %vm166_vm3, %v5222_v26, 0.0  ;;  %v2585_v14 = vmul.f32 %v4028_v22, %v5131_v7 }
 0x5b6   :  { %v5229_v19 = vpop.eup %4029  ;;  %v2192_v18 = vrot.slane %v2191_v36, 1  ;;  %v2205_v47 = vadd.f32 %v2204_v31, %v2203_v3  ;;  %v2218_v48 = vrot.slane %v2217_v39, 2  ;;  %v2224_v41 = vadd.f32 %v2223_v9, %v2222_v12 }
 0x5b7   :  { %v4032_v30 = vpop.eup %4031  ;;  %v2199_v32 = vrot.slane %v2198_v42, 1  ;;  %v2212_v58 = vadd.f32 %v2211_v38, %v2210_v17  ;;  %v2230_v61 = vrot.slane %v2229_v1, 4  ;;  %v2236_v51 = vsel %vm166_vm3, %v5229_v19, 0.0 }
 0x5b8   :  { %v2193_v35 = vadd.f32 %v2192_v18, %v2191_v36  ;;  %v2206_v6 = vrot.slane %v2205_v47, 1  ;;  %v2219_v16 = vadd.f32 %v2218_v48, %v2217_v39  ;;  %v2225_v54 = vrot.slane %v2224_v41, 2 }
 0x5b9   :  { %v2200_v43 = vadd.f32 %v2199_v32, %v2198_v42  ;;  %v2213_v28 = vrot.slane %v2212_v58, 1  ;;  %v2231_v7 = vadd.f32 %v2230_v61, %v2229_v1  ;;  %v2237_v21 = vrot.slane %v2236_v51, 4 }
 0x5ba   :  { %v2207_v49 = vadd.f32 %v2206_v6, %v2205_v47  ;;  %v2220_v45 = vrot.slane %v2219_v16, 1  ;;  %v2226_v62 = vadd.f32 %v2225_v54, %v2224_v41  ;;  %4033 = vrcp.f32 %v2193_v35 }
 0x5bb   :  { %v2214_v27 = vadd.f32 %v2213_v28, %v2212_v58  ;;  %v2232_v24 = vrot.slane %v2231_v7, 2  ;;  %4035 = vrcp.f32 %v2200_v43  ;;  %v2238_v20 = vadd.f32 %v2237_v21, %v2236_v51  ;;  %v2260_v51 = vpop.permute.xlu0 %2259 }
 0x5bc   :  { %v2221_v63 = vadd.f32 %v2220_v45, %v2219_v16  ;;  %4037 = vrcp.f32 %v2207_v49  ;;  %v2227_v59 = vrot.slane %v2226_v62, 1  ;;  %v2586_v13 = vmul.f32 %v4032_v30, %v5135_v57 }
 0x5bd   :  { %4039 = vrcp.f32 %v2214_v27  ;;  %v2233_v40 = vadd.f32 %v2232_v24, %v2231_v7  ;;  %v2239_v15 = vrot.slane %v2238_v20, 2  ;;  %v2595_v3 = vmul.f32 %v5162_v23, %v2584_v0 }
 0x5be   :  { %4041 = vrcp.f32 %v2221_v63  ;;  %v2228_v50 = vadd.f32 %v2227_v59, %v2226_v62  ;;  %v2596_v52 = vmul.f32 %v5162_v23, %v2585_v14  ;;  %v2597_v17 = vmul.f32 %v5162_v23, %v2586_v13 }
 0x5bf   :  { %v2234_v12 = vrot.slane %v2233_v40, 1  ;;  %v2240_v22 = vadd.f32 %v2239_v15, %v2238_v20  ;;  %v5237_v36 = vadd.f32 %v2603_v46, %v2602_v60  ;;  %v2609_v31 = vadd.f32 %v2608_v8, %v5202_v34 }
 0x5c0   :  { %4043 = vrcp.f32 %v2228_v50  ;;  %v2615_v57 = vrot.slane %v5204_v4, 2  ;;  %v2622_v39 = vrot.slane %v5210_v11, 2  ;;  %v2626_v0 = vsel %vm166_vm3, %v5186_v55, 0.0 }
 0x5c1   :  { %v2235_v9 = vadd.f32 %v2234_v12, %v2233_v40  ;;  %v2241_v42 = vrot.slane %v2240_v22, 1  ;;  %v2610_v38 = vrot.slane %v2609_v31, 1  ;;  %v2627_v23 = vrot.slane %v2626_v0, 4 }
 0x5c2   :  { %v2616_v1 = vadd.f32 %v2615_v57, %v5204_v4  ;;  %v2623_v60 = vadd.f32 %v2622_v39, %v5210_v11  ;;  %v2633_v46 = vsel %vm166_vm3, %v2595_v3, 0.0  ;;  %v2640_v34 = vsel %vm166_vm3, %v2596_v52, 0.0 }
 0x5c3   :  { %v2242_v8 = vadd.f32 %v2241_v42, %v2240_v22  ;;  %4045 = vrcp.f32 %v2235_v9  ;;  %v5250_v14 = vadd.f32 %v2610_v38, %v2609_v31  ;;  %v2628_v18 = vadd.f32 %v2627_v23, %v2626_v0 }
 0x5c4   :  { %v4034_v47 = vpop.eup %4033  ;;  %v2617_v48 = vrot.slane %v2616_v1, 1  ;;  %v2624_v55 = vrot.slane %v2623_v60, 1  ;;  %v2634_v41 = vrot.slane %v2633_v46, 4  ;;  %v2641_v30 = vrot.slane %v2640_v34, 4 }
 0x5c5   :  { %v4036_v32 = vpop.eup %4035  ;;  %v2251_v58 = vmul.f32 %v4034_v47, %v5191_v10  ;;  %4047 = vrcp.f32 %v2242_v8  ;;  %v2629_v4 = vrot.slane %v2628_v18, 2  ;;  %v5254_v11 = vsel %vm166_vm3, %v2597_v17, 0.0 }
 0x5c6   :  { %v4038_v61 = vpop.eup %4037  ;;  %v2252_v35 = vmul.f32 %v4036_v32, %v5194_v44  ;;  %v5257_v6 = vadd.f32 %v2617_v48, %v2616_v1  ;;  %v5259_v16 = vadd.f32 %v2624_v55, %v2623_v60  ;;  %v2635_v54 = vadd.f32 %v2634_v41, %v2633_v46 }
 0x5c7   :  { %v4040_v43 = vpop.eup %4039  ;;  %v2253_v28 = vmul.f32 %v4038_v61, %v5198_v56  ;;  %v2262_v7 = vmul.f32 %v2260_v51, %v2251_v58  ;;  %v2630_v21 = vadd.f32 %v2629_v4, %v2628_v18  ;;  %v5262_v10 = vadd.f32 %v2641_v30, %v2640_v34 }
 0x5c8   :  { %v4042_v49 = vpop.eup %4041  ;;  %v2254_v45 = vmul.f32 %v4040_v43, %v5206_v25  ;;  %v2263_v62 = vmul.f32 %v2260_v51, %v2252_v35  ;;  %v2636_v27 = vrot.slane %v2635_v54, 2  ;;  %v2648_v24 = vrot.slane %v5254_v11, 4 }
 0x5c9   :  { %v2255_v44 = vmul.f32 %v4042_v49, %v5212_v33  ;;  %v2264_v20 = vmul.f32 %v2260_v51, %v2253_v28  ;;  %v2270_v63 = vsel %vm166_vm3, %v2262_v7, 0.0  ;;  %v2631_v59 = vrot.slane %v2630_v21, 1 }
 0x5ca   :  { %v4044_v13 = vpop.eup %4043  ;;  %v2265_v40 = vmul.f32 %v2260_v51, %v2254_v45  ;;  %v2271_v56 = vrot.slane %v2270_v63, 4  ;;  %v2277_v15 = vsel %vm166_vm3, %v2263_v62, 0.0  ;;  %v2637_v3 = vadd.f32 %v2636_v27, %v2635_v54 }
 0x5cb   :  { %v2256_v50 = vmul.f32 %v4044_v13, %v5219_v2  ;;  %v2266_v52 = vmul.f32 %v2260_v51, %v2255_v44  ;;  %v2278_v25 = vrot.slane %v2277_v15, 4  ;;  %v2284_v17 = vsel %vm166_vm3, %v2264_v20, 0.0 }
 0x5cc   :  { %v2272_v12 = vadd.f32 %v2271_v56, %v2270_v63  ;;  %v2285_v22 = vrot.slane %v2284_v17, 4  ;;  %v2291_v33 = vsel %vm166_vm3, %v2265_v40, 0.0  ;;  %v5272_v31 = vadd.f32 %v2631_v59, %v2630_v21 }
 0x5cd   :  { %v4046_v57 = vpop.eup %4045  ;;  %v2267_v39 = vmul.f32 %v2260_v51, %v2256_v50  ;;  %v2279_v0 = vadd.f32 %v2278_v25, %v2277_v15  ;;  %v2292_v9 = vrot.slane %v2291_v33, 4  ;;  %v2298_v42 = vsel %vm166_vm3, %v2266_v52, 0.0 }
 0x5ce   :  { %v2257_v38 = vmul.f32 %v4046_v57, %v5222_v26  ;;  %v2273_v23 = vrot.slane %v2272_v12, 2  ;;  %v2286_v2 = vadd.f32 %v2285_v22, %v2284_v17  ;;  %v2299_v1 = vrot.slane %v2298_v42, 4 }
 0x5cf   :  { %v4048_v60 = vpop.eup %4047  ;;  %v2280_v46 = vrot.slane %v2279_v0, 2  ;;  %v2293_v34 = vadd.f32 %v2292_v9, %v2291_v33  ;;  %v2305_v8 = vsel %vm166_vm3, %v2267_v39, 0.0  ;;  %v2638_v18 = vrot.slane %v2637_v3, 1 }
 0x5d0   :  { %v2258_v47 = vmul.f32 %v4048_v60, %v5229_v19  ;;  %v2268_v48 = vmul.f32 %v2260_v51, %v2257_v38  ;;  %v2274_v55 = vadd.f32 %v2273_v23, %v2272_v12  ;;  %v2287_v41 = vrot.slane %v2286_v2, 2 }
 0x5d1   :  { %v2281_v30 = vadd.f32 %v2280_v46, %v2279_v0  ;;  %v2294_v32 = vrot.slane %v2293_v34, 2  ;;  %v2300_v58 = vadd.f32 %v2299_v1, %v2298_v42  ;;  %v2306_v4 = vrot.slane %v2305_v8, 4 }
 0x5d2   :  { %v2269_v61 = vmul.f32 %v2260_v51, %v2258_v47  ;;  %v2275_v26 = vrot.slane %v2274_v55, 1  ;;  %v2288_v35 = vadd.f32 %v2287_v41, %v2286_v2  ;;  %v2312_v54 = vsel %vm166_vm3, %v2268_v48, 0.0 }
 0x5d3   :  { %v2282_v43 = vrot.slane %v2281_v30, 1  ;;  %v2295_v28 = vadd.f32 %v2294_v32, %v2293_v34  ;;  %v2301_v7 = vrot.slane %v2300_v58, 2  ;;  %v2307_v21 = vadd.f32 %v2306_v4, %v2305_v8  ;;  %v3690_v4 = vld [vmem:[%s5673_s3 + $0x38] sm:$0x1] }
 0x5d4   :  { %v2276_v49 = vadd.f32 %v2275_v26, %v2274_v55  ;;  %v2289_v45 = vrot.slane %v2288_v35, 1  ;;  %v2313_v62 = vrot.slane %v2312_v54, 4  ;;  %v2319_v19 = vsel %vm166_vm3, %v2269_v61, 0.0 }
 0x5d5   :  { %v2283_v27 = vadd.f32 %v2282_v43, %v2281_v30  ;;  %v2296_v44 = vrot.slane %v2295_v28, 1  ;;  %v2302_v20 = vadd.f32 %v2301_v7, %v2300_v58  ;;  %v2308_v63 = vrot.slane %v2307_v21, 2  ;;  %v2690_v43 = vpop.permute.xlu1 %2689 }
 0x5d6   :  { %v2290_v59 = vadd.f32 %v2289_v45, %v2288_v35  ;;  %v2314_v13 = vadd.f32 %v2313_v62, %v2312_v54  ;;  %v2320_v51 = vrot.slane %v2319_v19, 4  ;;  %v2639_v40 = vadd.f32 %v2638_v18, %v2637_v3  ;;  %v2688_v35 = vpop.permute.xlu0 %2687  ;;  %v3692_v62 = vld [vmem:[%s5678_s4 + $0x3] ss:$0 sm:$0xff] }
 0x5d7   :  { %v2297_v56 = vadd.f32 %v2296_v44, %v2295_v28  ;;  %v2303_v15 = vrot.slane %v2302_v20, 1  ;;  %v2309_v50 = vadd.f32 %v2308_v63, %v2307_v21  ;;  %v2662_v52 = vsel %vm912_vm7, %v2283_v27, %v2276_v49  ;;  %v3696_v21 = vld [vmem:[%s5679_s5 + $0x30] sm:$0xff]  ;;  %v3697_v49 = vld [vmem:[%s5679_s5 + $0x38] sm:$0x1] }
 0x5d8   :  { %v2315_v25 = vrot.slane %v2314_v13, 2  ;;  %v2321_v17 = vadd.f32 %v2320_v51, %v2319_v19  ;;  %v2663_v12 = vsel %vm914_vm8, %v2290_v59, %v2662_v52  ;;  %v2643_v22 = vrot.slane %v5262_v10, 2 }
 0x5d9   :  { %v2304_v33 = vadd.f32 %v2303_v15, %v2302_v20  ;;  %v2310_v57 = vrot.slane %v2309_v50, 1  ;;  %v2664_v39 = vsel %vm916_vm9, %v2297_v56, %v2663_v12  ;;  %v2649_v0 = vadd.f32 %v2648_v24, %v5254_v11 }
 0x5da   :  { %v2316_v3 = vadd.f32 %v2315_v25, %v2314_v13  ;;  %v2322_v9 = vrot.slane %v2321_v17, 2  ;;  %v2644_v42 = vadd.f32 %v2643_v22, %v5262_v10  ;;  %v2677_v38 = vsel %vm912_vm7, %v5250_v14, %v5237_v36 }
 0x5db   :  { %v2311_v23 = vadd.f32 %v2310_v57, %v2309_v50  ;;  %v2665_v2 = vsel %vm918_vm10, %v2304_v33, %v2664_v39  ;;  %v2650_v1 = vrot.slane %v2649_v0, 2  ;;  %v2678_v60 = vsel %vm914_vm8, %v5257_v6, %v2677_v38 }
 0x5dc   :  { %v2317_v46 = vrot.slane %v2316_v3, 1  ;;  %v2323_v34 = vadd.f32 %v2322_v9, %v2321_v17  ;;  %v2645_v8 = vrot.slane %v2644_v42, 1  ;;  %v2679_v11 = vsel %vm916_vm9, %v5259_v16, %v2678_v60 }
 0x5dd   :  { %v2666_v24 = vsel %vm920_vm11, %v2311_v23, %v2665_v2  ;;  %v2651_v10 = vadd.f32 %v2650_v1, %v2649_v0  ;;  %v2680_v18 = vsel %vm918_vm10, %v5272_v31, %v2679_v11  ;;  %v3689_v31 = vld [vmem:[%s5673_s3 + $0x30] sm:$0xff]  ;;  %v3839_v45 = vpack.c.bf16 %v3697_v49, %v3696_v21 }
 0x5de   :  { %v2318_v36 = vadd.f32 %v2317_v46, %v2316_v3  ;;  %v2324_v14 = vrot.slane %v2323_v34, 1  ;;  %v2646_v47 = vadd.f32 %v2645_v8, %v2644_v42  ;;  %v2681_v48 = vsel %vm920_vm11, %v2639_v40, %v2680_v18  ;;  %v3289_v3 = vpop.permute.xlu1 %3288 }
 0x5df   :  { %v2652_v55 = vrot.slane %v2651_v10, 1  ;;  %v3833_v61 = vpack.c.bf16 %v3690_v4, %v3689_v31  ;;  %3841 = vmatprep.subr.msk.bf16.mxu0 %vm4191_vm5, %v3839_v45 }
 0x5e0   :  { %v2325_v41 = vadd.f32 %v2324_v14, %v2323_v34  ;;  %v2667_v6 = vsel %vm922_vm12, %v2318_v36, %v2666_v24  ;;  %v2682_v30 = vsel %vm922_vm12, %v2646_v47, %v2681_v48 }
 0x5e1   :  { %v2653_v32 = vadd.f32 %v2652_v55, %v2651_v10  ;;  %3835 = vmatprep.subr.msk.bf16.mxu1 %vm4191_vm5, %v3833_v61 }
 0x5e2   :  { %v2668_v16 = vsel %vm924_vm13, %v2325_v41, %v2667_v6  ;;  %3838 = vmatpush3.bf16.msk.msra.mxu1 %vm4191_vm5, %v3833_v61 }
 0x5e3   :  { %3780 = vmatprep.mubr.msk.f32.mxu0 %vm166_vm3, %v2668_v16  ;;  %v2683_v58 = vsel %vm924_vm13, %v2653_v32, %v2682_v30 }
 0x5e4   :  { %3781 = vmatmul.mubr.msk.f32.vlgmr.msra.gmra.mrb[6].mxu0 %vm166_vm3, %v2683_v58 }
 0x5e5   :  { %3844 = vmatpush3.bf16.msk.msra.mxu0 %vm4191_vm5, %v3839_v45 }
 0x6b7   :  { %v3782_v26 = vpop.f32.mrb[6].mxu0 }
 0x6b8   :  { %v2766_v54 = vpop.f32.mrb[7].mxu0  ;;  %v2772_v7 = vadd.f32 %v3782_v26, %v2690_v43 }
 0x6b9   :  { %v2767_v28 = vadd.f32 %v2766_v54, %v2688_v35 }
 0x6bb   :  { %3787 = vmatprep.mubr.msk.f32.mxu1 %vm166_vm3, %v2767_v28 }
 0x6bc   :  { %3788 = vmatmul.mubr.msk.f32.vlgmr.msra.gmra.mrb[6].mxu1 %vm166_vm3, %v2772_v7 }
 0x78f   :  { %v3789_v19 = vpop.f32.mrb[6].mxu1 }
 0x790   :  { %v2867_v27 = vadd.f32 %v3789_v19, %v3692_v62  ;;  %v2861_v44 = vpop.f32.mrb[7].mxu1 }
 0x791   :  { %v2862_v20 = vadd.f32 %v3692_v62, %v2861_v44 }
 0x792   :  { %v3199_v63 = vcombine.high %v2867_v27, %v2867_v27  ;;  %v3206_v59 = vrot.slane %v2867_v27, %v4226_v29  ;;  %3561 = vrot.lane.b32.xlu1 %v2867_v27, %s4116_s7 }
 0x793   :  { %v2871_v13 = vcombine.high %v2862_v20, %v2862_v20  ;;  %v2878_v51 = vrot.slane %v2862_v20, %v4226_v29  ;;  %3559 = vrot.lane.b32.xlu0 %v2862_v20, %s4116_s7 }
 0x794   :  { %v3213_v5 = vrot.slane %v3199_v63, %v4226_v29  ;;  %v3214_v40 = vcombine.high %v3206_v59, %v3206_v59  ;;  %v3222_v56 = vrot.slane %v3206_v59, %v4226_v29 }
 0x795   :  { %v2885_v15 = vrot.slane %v2871_v13, %v4226_v29  ;;  %v2886_v50 = vcombine.high %v2878_v51, %v2878_v51  ;;  %v5339_v52 = vrot.slane %v2878_v51, %v4226_v29 }
 0x796   :  { %v3215_v25 = vcombine.high %v3213_v5, %v3213_v5  ;;  %v3229_v17 = vrot.slane %v3213_v5, %v4226_v29  ;;  %v3236_v12 = vrot.slane %v3214_v40, %v4226_v29  ;;  %v3244_v22 = vcombine.high %v3222_v56, %v3222_v56 }
 0x797   :  { %v3251_v33 = vrot.slane %v3222_v56, %v4233_v37  ;;  %v2887_v57 = vcombine.high %v2885_v15, %v2885_v15  ;;  %v5345_v39 = vrot.slane %v2885_v15, %v4226_v29  ;;  %v5348_v0 = vrot.slane %v2886_v50, %v4226_v29 }
 0x798   :  { %v3243_v9 = vrot.slane %v3215_v25, %v4226_v29  ;;  %v3245_v42 = vcombine.high %v3229_v17, %v3229_v17  ;;  %v3246_v38 = vcombine.high %v3236_v12, %v3236_v12  ;;  %v3255_v23 = vrot.slane %v3236_v12, %v4233_v37 }
 0x799   :  { %v3259_v2 = vrot.slane %v3244_v22, %v4233_v37  ;;  %v3267_v1 = vrot.slane %v3229_v17, %v4233_v37  ;;  %v3291_v60 = vmul.f32 %v3289_v3, %v3251_v33  ;;  %v5355_v46 = vrot.slane %v2887_v57, %v4226_v29 }
 0x79a   :  { %v3247_v34 = vcombine.high %v3243_v9, %v3243_v9  ;;  %v3263_v8 = vrot.slane %v3246_v38, %v4233_v37  ;;  %v3271_v11 = vrot.slane %v3243_v9, %v4233_v37  ;;  %v3275_v24 = vrot.slane %v3245_v42, %v4233_v37 }
 0x79b   :  { %v3292_v10 = vmul.f32 %v3289_v3, %v3255_v23  ;;  %v3293_v18 = vmul.f32 %v3289_v3, %v3259_v2  ;;  %v3295_v36 = vmul.f32 %v3289_v3, %v3267_v1  ;;  %v5361_v14 = vadd.f32 %v3291_v60, %v4255_v53 }
 0x79c   :  { %v3279_v47 = vrot.slane %v3247_v34, %v4233_v37  ;;  %v3294_v48 = vmul.f32 %v3289_v3, %v3263_v8  ;;  %v3296_v55 = vmul.f32 %v3289_v3, %v3271_v11  ;;  %v3297_v41 = vmul.f32 %v3289_v3, %v3275_v24 }
 0x79d   :  { %v5365_v29 = vadd.f32 %v3292_v10, %v4255_v53  ;;  %v5368_v6 = vadd.f32 %v3293_v18, %v4255_v53  ;;  %v5371_v30 = vadd.f32 %v3295_v36, %v4255_v53  ;;  %v3307_v32 = vsel %vm166_vm3, %v5361_v14, -inf }
 0x79e   :  { %v3298_v16 = vmul.f32 %v3289_v3, %v3279_v47  ;;  %v5376_v58 = vadd.f32 %v3294_v48, %v4255_v53  ;;  %v5379_v31 = vadd.f32 %v3296_v55, %v4255_v53  ;;  %v5382_v4 = vadd.f32 %v3297_v41, %v4255_v53 }
 0x79f   :  { %v3308_v61 = vrot.slane %v3307_v32, 4  ;;  %v3314_v26 = vsel %vm166_vm3, %v5365_v29, -inf  ;;  %v3321_v35 = vsel %vm166_vm3, %v5368_v6, -inf  ;;  %v3335_v54 = vsel %vm166_vm3, %v5371_v30, -inf }
 0x7a0   :  { %v5391_v43 = vadd.f32 %v3298_v16, %v4255_v53  ;;  %v3315_v28 = vrot.slane %v3314_v26, 4  ;;  %v3322_v7 = vrot.slane %v3321_v35, 4  ;;  %v3328_v21 = vsel %vm166_vm3, %v5376_v58, -inf }
 0x7a1   :  { %v3309_v49 = vmax.f32 %v3307_v32, %v3308_v61  ;;  %v3329_v45 = vrot.slane %v3328_v21, 4  ;;  %v3336_v62 = vrot.slane %v3335_v54, 4  ;;  %v3342_v19 = vsel %vm166_vm3, %v5379_v31, -inf }
 0x7a2   :  { %v3316_v27 = vmax.f32 %v3314_v26, %v3315_v28  ;;  %v3323_v44 = vmax.f32 %v3321_v35, %v3322_v7  ;;  %v3343_v20 = vrot.slane %v3342_v19, 4  ;;  %v3349_v63 = vsel %vm166_vm3, %v5382_v4, -inf }
 0x7a3   :  { %v3310_v59 = vrot.slane %v3309_v49, 2  ;;  %v3330_v13 = vmax.f32 %v3328_v21, %v3329_v45  ;;  %v3337_v51 = vmax.f32 %v3335_v54, %v3336_v62  ;;  %v3350_v5 = vrot.slane %v3349_v63, 4 }
 0x7a4   :  { %v3317_v40 = vrot.slane %v3316_v27, 2  ;;  %v3324_v56 = vrot.slane %v3323_v44, 2  ;;  %v3344_v15 = vmax.f32 %v3342_v19, %v3343_v20  ;;  %v3356_v50 = vsel %vm166_vm3, %v5391_v43, -inf }
 0x7a5   :  { %v3311_v25 = vmax.f32 %v3309_v49, %v3310_v59  ;;  %v3331_v17 = vrot.slane %v3330_v13, 2  ;;  %v3338_v12 = vrot.slane %v3337_v51, 2  ;;  %v3351_v22 = vmax.f32 %v3349_v63, %v3350_v5 }
 0x7a6   :  { %v3318_v33 = vmax.f32 %v3316_v27, %v3317_v40  ;;  %v3325_v57 = vmax.f32 %v3323_v44, %v3324_v56  ;;  %v3345_v3 = vrot.slane %v3344_v15, 2  ;;  %v3357_v9 = vrot.slane %v3356_v50, 4 }
 0x7a7   :  { %v3312_v42 = vrot.slane %v3311_v25, 1  ;;  %v3332_v38 = vmax.f32 %v3330_v13, %v3331_v17  ;;  %v3339_v23 = vmax.f32 %v3337_v51, %v3338_v12  ;;  %v3352_v2 = vrot.slane %v3351_v22, 2 }
 0x7a8   :  { %v3319_v1 = vrot.slane %v3318_v33, 1  ;;  %v3326_v60 = vrot.slane %v3325_v57, 1  ;;  %v3346_v34 = vmax.f32 %v3344_v15, %v3345_v3  ;;  %v3358_v8 = vmax.f32 %v3356_v50, %v3357_v9  ;;  %v2961_v15 = vpop.permute.xlu0 %2960 }
 0x7a9   :  { %v3313_v11 = vmax.f32 %v3311_v25, %v3312_v42  ;;  %v3333_v24 = vrot.slane %v3332_v38, 1  ;;  %v3340_v10 = vrot.slane %v3339_v23, 1  ;;  %v3353_v18 = vmax.f32 %v3351_v22, %v3352_v2 }
 0x7aa   :  { %v3320_v36 = vmax.f32 %v3318_v33, %v3319_v1  ;;  %v3327_v47 = vmax.f32 %v3325_v57, %v3326_v60  ;;  %v3347_v48 = vrot.slane %v3346_v34, 1  ;;  %v3359_v55 = vrot.slane %v3358_v8, 2 }
 0x7ab   :  { %v3334_v41 = vmax.f32 %v3332_v38, %v3333_v24  ;;  %v3341_v32 = vmax.f32 %v3339_v23, %v3340_v10  ;;  %v3354_v16 = vrot.slane %v3353_v18, 1  ;;  %v3363_v61 = vsub.f32 %v5361_v14, %v3313_v11 }
 0x7ac   :  { %v3348_v26 = vmax.f32 %v3346_v34, %v3347_v48  ;;  %v3360_v35 = vmax.f32 %v3358_v8, %v3359_v55  ;;  %v3364_v54 = vsub.f32 %v5365_v29, %v3320_v36  ;;  %v3365_v28 = vsub.f32 %v5368_v6, %v3327_v47 }
 0x7ad   :  { %v3355_v7 = vmax.f32 %v3353_v18, %v3354_v16  ;;  %v3366_v21 = vsub.f32 %v5376_v58, %v3334_v41  ;;  %v3367_v49 = vsub.f32 %v5371_v30, %v3341_v32  ;;  %v3371_v45 = vmul.f32 1.442695, %v3363_v61 }
 0x7ae   :  { %v3361_v62 = vrot.slane %v3360_v35, 1  ;;  %v3368_v19 = vsub.f32 %v5379_v31, %v3348_v26  ;;  %v3373_v27 = vmul.f32 1.442695, %v3364_v54  ;;  %v3375_v44 = vmul.f32 1.442695, %v3365_v28 }
 0x7af   :  { %v3369_v20 = vsub.f32 %v5382_v4, %v3355_v7  ;;  %4049 = vpow2.f32 %v3371_v45  ;;  %v3377_v14 = vmul.f32 1.442695, %v3366_v21  ;;  %v3379_v63 = vmul.f32 1.442695, %v3367_v49 }
 0x7b0   :  { %v3362_v59 = vmax.f32 %v3360_v35, %v3361_v62  ;;  %4051 = vpow2.f32 %v3373_v27  ;;  %v3381_v29 = vmul.f32 1.442695, %v3368_v19  ;;  %v2916_v6 = vcombine.high %v5339_v52, %v5339_v52 }
 0x7b1   :  { %4053 = vpow2.f32 %v3375_v44  ;;  %v3383_v58 = vmul.f32 1.442695, %v3369_v20  ;;  %v2917_v30 = vcombine.high %v5345_v39, %v5345_v39  ;;  %v2918_v31 = vcombine.high %v5348_v0, %v5348_v0 }
 0x7b2   :  { %v3370_v13 = vsub.f32 %v5391_v43, %v3362_v59  ;;  %4055 = vpow2.f32 %v3377_v14  ;;  %v2919_v4 = vcombine.high %v5355_v46, %v5355_v46  ;;  %v2923_v51 = vrot.slane %v5339_v52, %v4233_v37 }
 0x7b3   :  { %4057 = vpow2.f32 %v3379_v63  ;;  %v2927_v5 = vrot.slane %v5348_v0, %v4233_v37  ;;  %v2931_v40 = vrot.slane %v2916_v6, %v4233_v37  ;;  %v2935_v56 = vrot.slane %v2918_v31, %v4233_v37 }
 0x7b4   :  { %4059 = vpow2.f32 %v3381_v29  ;;  %v3385_v50 = vmul.f32 1.442695, %v3370_v13  ;;  %v2939_v43 = vrot.slane %v5345_v39, %v4233_v37  ;;  %v2943_v25 = vrot.slane %v5355_v46, %v4233_v37 }
 0x7b5   :  { %4061 = vpow2.f32 %v3383_v58  ;;  %v2947_v52 = vrot.slane %v2917_v30, %v4233_v37  ;;  %v2951_v17 = vrot.slane %v2919_v4, %v4233_v37  ;;  %v2963_v12 = vmul.f32 %v2961_v15, %v2923_v51 }
 0x7b6   :  { %4063 = vpow2.f32 %v3385_v50  ;;  %v2964_v0 = vmul.f32 %v2961_v15, %v2927_v5  ;;  %v2965_v22 = vmul.f32 %v2961_v15, %v2931_v40  ;;  %v2966_v33 = vmul.f32 %v2961_v15, %v2935_v56 }
 0x7b7   :  { %v2967_v57 = vmul.f32 %v2961_v15, %v2939_v43  ;;  %v2968_v3 = vmul.f32 %v2961_v15, %v2943_v25  ;;  %v2969_v9 = vmul.f32 %v2961_v15, %v2947_v52  ;;  %v2970_v42 = vmul.f32 %v2961_v15, %v2951_v17 }
 0x7b8   :  { %v5430_v38 = vadd.f32 %v2963_v12, %v4255_v53  ;;  %v5433_v39 = vadd.f32 %v2964_v0, %v4255_v53  ;;  %v5436_v46 = vadd.f32 %v2965_v22, %v4255_v53  ;;  %v5439_v37 = vadd.f32 %v2966_v33, %v4255_v53 }
 0x7b9   :  { %v5441_v23 = vpop.eup %4049  ;;  %v5444_v2 = vadd.f32 %v2967_v57, %v4255_v53  ;;  %v5447_v1 = vadd.f32 %v2968_v3, %v4255_v53  ;;  %v5450_v60 = vadd.f32 %v2969_v9, %v4255_v53  ;;  %v5453_v34 = vadd.f32 %v2970_v42, %v4255_v53 }
 0x7ba   :  { %v5455_v8 = vpop.eup %4051  ;;  %v3387_v11 = vsel %vm166_vm3, %v5441_v23, 0.0  ;;  %v2979_v24 = vsel %vm166_vm3, %v5430_v38, -inf  ;;  %v2986_v10 = vsel %vm166_vm3, %v5433_v39, -inf  ;;  %v5465_v18 = vsel %vm166_vm3, %v5436_v46, -inf }
 0x7bb   :  { %v5467_v36 = vpop.eup %4053  ;;  %v3388_v47 = vrot.slane %v3387_v11, 4  ;;  %v3394_v53 = vsel %vm166_vm3, %v5455_v8, 0.0  ;;  %v2980_v48 = vrot.slane %v2979_v24, 4  ;;  %v2987_v55 = vrot.slane %v2986_v10, 4 }
 0x7bc   :  { %v5471_v41 = vpop.eup %4055  ;;  %v3395_v32 = vrot.slane %v3394_v53, 4  ;;  %v3401_v16 = vsel %vm166_vm3, %v5467_v36, 0.0  ;;  %v2994_v61 = vrot.slane %v5465_v18, 4  ;;  %v5478_v26 = vsel %vm166_vm3, %v5439_v37, -inf }
 0x7bd   :  { %v5480_v35 = vpop.eup %4057  ;;  %v3389_v54 = vadd.f32 %v3388_v47, %v3387_v11  ;;  %v3402_v28 = vrot.slane %v3401_v16, 4  ;;  %v3408_v7 = vsel %vm166_vm3, %v5471_v41, 0.0  ;;  %v2981_v21 = vmax.f32 %v2979_v24, %v2980_v48 }
 0x7be   :  { %v5484_v49 = vpop.eup %4059  ;;  %v3396_v45 = vadd.f32 %v3395_v32, %v3394_v53  ;;  %v3409_v62 = vrot.slane %v3408_v7, 4  ;;  %v3415_v19 = vsel %vm166_vm3, %v5480_v35, 0.0  ;;  %v2988_v27 = vmax.f32 %v2986_v10, %v2987_v55 }
 0x7bf   :  { %v5488_v44 = vpop.eup %4061  ;;  %v3390_v20 = vrot.slane %v3389_v54, 2  ;;  %v3403_v14 = vadd.f32 %v3402_v28, %v3401_v16  ;;  %v3416_v63 = vrot.slane %v3415_v19, 4  ;;  %v3422_v59 = vsel %vm166_vm3, %v5484_v49, 0.0 }
 0x7c0   :  { %v5492_v29 = vpop.eup %4063  ;;  %v3397_v6 = vrot.slane %v3396_v45, 2  ;;  %v3410_v58 = vadd.f32 %v3409_v62, %v3408_v7  ;;  %v3423_v30 = vrot.slane %v3422_v59, 4  ;;  %v3429_v31 = vsel %vm166_vm3, %v5488_v44, 0.0 }
 0x7c1   :  { %v3391_v13 = vadd.f32 %v3390_v20, %v3389_v54  ;;  %v3404_v4 = vrot.slane %v3403_v14, 2  ;;  %v3417_v51 = vadd.f32 %v3416_v63, %v3415_v19  ;;  %v3430_v5 = vrot.slane %v3429_v31, 4 }
 0x7c2   :  { %v3398_v40 = vadd.f32 %v3397_v6, %v3396_v45  ;;  %v3411_v56 = vrot.slane %v3410_v58, 2  ;;  %v3424_v15 = vadd.f32 %v3423_v30, %v3422_v59  ;;  %v3436_v50 = vsel %vm166_vm3, %v5492_v29, 0.0 }
 0x7c3   :  { %v3392_v43 = vrot.slane %v3391_v13, 1  ;;  %v3405_v25 = vadd.f32 %v3404_v4, %v3403_v14  ;;  %v3418_v52 = vrot.slane %v3417_v51, 2  ;;  %v3431_v17 = vadd.f32 %v3430_v5, %v3429_v31 }
 0x7c4   :  { %v3399_v12 = vrot.slane %v3398_v40, 1  ;;  %v3412_v0 = vadd.f32 %v3411_v56, %v3410_v58  ;;  %v3425_v22 = vrot.slane %v3424_v15, 2  ;;  %v3437_v33 = vrot.slane %v3436_v50, 4 }
 0x7c5   :  { %v3393_v57 = vadd.f32 %v3392_v43, %v3391_v13  ;;  %v3406_v3 = vrot.slane %v3405_v25, 1  ;;  %v3419_v9 = vadd.f32 %v3418_v52, %v3417_v51  ;;  %v3432_v42 = vrot.slane %v3431_v17, 2 }
 0x7c6   :  { %v3400_v11 = vadd.f32 %v3399_v12, %v3398_v40  ;;  %v3413_v24 = vrot.slane %v3412_v0, 1  ;;  %v5498_v10 = vadd.f32 %v3425_v22, %v3424_v15  ;;  %v5500_v47 = vadd.f32 %v3437_v33, %v3436_v50 }
 0x7c7   :  { %v3407_v53 = vadd.f32 %v3406_v3, %v3405_v25  ;;  %v3420_v48 = vrot.slane %v3419_v9, 1  ;;  %v5502_v55 = vadd.f32 %v3432_v42, %v3431_v17  ;;  %4065 = vrcp.f32 %v3393_v57 }
 0x7c8   :  { %v3414_v32 = vadd.f32 %v3413_v24, %v3412_v0  ;;  %v3427_v16 = vrot.slane %v5498_v10, 1  ;;  %4067 = vrcp.f32 %v3400_v11  ;;  %v2982_v54 = vrot.slane %v2981_v21, 2 }
 0x7c9   :  { %v3421_v28 = vadd.f32 %v3420_v48, %v3419_v9  ;;  %4069 = vrcp.f32 %v3407_v53  ;;  %v2989_v7 = vrot.slane %v2988_v27, 2  ;;  %v2995_v45 = vmax.f32 %v5465_v18, %v2994_v61  ;;  %v5519_v53 = vpop.permute.xlu1 %3459 }
 0x7ca   :  { %4071 = vrcp.f32 %v3414_v32  ;;  %v2983_v62 = vmax.f32 %v2981_v21, %v2982_v54  ;;  %v3001_v19 = vrot.slane %v5478_v26, 4  ;;  %v3007_v20 = vsel %vm166_vm3, %v5444_v2, -inf }
 0x7cb   :  { %4073 = vrcp.f32 %v3421_v28  ;;  %v2990_v14 = vmax.f32 %v2988_v27, %v2989_v7  ;;  %v2996_v63 = vrot.slane %v2995_v45, 2  ;;  %v3008_v59 = vrot.slane %v3007_v20, 4 }
 0x7cc   :  { %v2984_v6 = vrot.slane %v2983_v62, 1  ;;  %v3002_v58 = vmax.f32 %v5478_v26, %v3001_v19  ;;  %v3014_v30 = vsel %vm166_vm3, %v5447_v1, -inf  ;;  %v3021_v18 = vsel %vm166_vm3, %v5450_v60, -inf }
 0x7cd   :  { %v2991_v61 = vrot.slane %v2990_v14, 1  ;;  %v2997_v21 = vmax.f32 %v2995_v45, %v2996_v63  ;;  %v3009_v31 = vmax.f32 %v3007_v20, %v3008_v59  ;;  %v3015_v13 = vrot.slane %v3014_v30, 4 }
 0x7ce   :  { %v2985_v4 = vmax.f32 %v2983_v62, %v2984_v6  ;;  %v3003_v51 = vrot.slane %v3002_v58, 2  ;;  %v3022_v5 = vrot.slane %v3021_v18, 4  ;;  %v3028_v27 = vsel %vm166_vm3, %v5453_v34, -inf }
 0x7cf   :  { %v2992_v40 = vmax.f32 %v2990_v14, %v2991_v61  ;;  %v2998_v56 = vrot.slane %v2997_v21, 1  ;;  %v3010_v15 = vrot.slane %v3009_v31, 2  ;;  %v3016_v26 = vmax.f32 %v3014_v30, %v3015_v13 }
 0x7d0   :  { %v3004_v50 = vmax.f32 %v3002_v58, %v3003_v51  ;;  %v3023_v43 = vmax.f32 %v3021_v18, %v3022_v5  ;;  %v3029_v25 = vrot.slane %v3028_v27, 4  ;;  %v3035_v52 = vsub.f32 %v5430_v38, %v2985_v4 }
 0x7d1   :  { %v4066_v17 = vpop.eup %4065  ;;  %v2999_v12 = vmax.f32 %v2997_v21, %v2998_v56  ;;  %v3011_v0 = vmax.f32 %v3009_v31, %v3010_v15  ;;  %v3017_v22 = vrot.slane %v3016_v26, 2  ;;  %v3036_v33 = vsub.f32 %v5433_v39, %v2992_v40 }
 0x7d2   :  { %v4068_v57 = vpop.eup %4067  ;;  %v3451_v3 = vmul.f32 %v4066_v17, %v5441_v23  ;;  %v3005_v9 = vrot.slane %v3004_v50, 1  ;;  %v3024_v42 = vrot.slane %v3023_v43, 2  ;;  %v3030_v11 = vmax.f32 %v3028_v27, %v3029_v25 }
 0x7d3   :  { %v4070_v24 = vpop.eup %4069  ;;  %v3452_v48 = vmul.f32 %v4068_v57, %v5455_v8  ;;  %v3012_v32 = vrot.slane %v3011_v0, 1  ;;  %v3018_v54 = vmax.f32 %v3016_v26, %v3017_v22  ;;  %v3037_v38 = vsub.f32 %v5436_v46, %v2999_v12 }
 0x7d4   :  { %v4072_v28 = vpop.eup %4071  ;;  %v3453_v7 = vmul.f32 %v4070_v24, %v5467_v36  ;;  %v3462_v39 = vmul.f32 %v5519_v53, %v3451_v3  ;;  %v3006_v45 = vmax.f32 %v3004_v50, %v3005_v9  ;;  %v3025_v62 = vmax.f32 %v3023_v43, %v3024_v42 }
 0x7d5   :  { %v4074_v23 = vpop.eup %4073  ;;  %v3013_v19 = vmax.f32 %v3011_v0, %v3012_v32  ;;  %v3019_v20 = vrot.slane %v3018_v54, 1  ;;  %v3031_v14 = vrot.slane %v3030_v11, 2  ;;  %v3043_v63 = vmul.f32 1.442695, %v3035_v52 }
 0x7d6   :  { %v3026_v59 = vrot.slane %v3025_v62, 1  ;;  %v3038_v6 = vsub.f32 %v5439_v37, %v3006_v45  ;;  %v3045_v8 = vmul.f32 1.442695, %v3036_v33  ;;  %v3047_v58 = vmul.f32 1.442695, %v3037_v38 }
 0x7d7   :  { %v3020_v30 = vmax.f32 %v3018_v54, %v3019_v20  ;;  %v3032_v18 = vmax.f32 %v3030_v11, %v3031_v14  ;;  %v3039_v46 = vsub.f32 %v5444_v2, %v3013_v19  ;;  %4075 = vpow2.f32 %v3043_v63 }
 0x7d8   :  { %v3027_v36 = vmax.f32 %v3025_v62, %v3026_v59  ;;  %4077 = vpow2.f32 %v3045_v8  ;;  %v3049_v61 = vmul.f32 1.442695, %v3038_v6  ;;  %v3428_v21 = vadd.f32 %v3427_v16, %v5498_v10 }
 0x7d9   :  { %v3033_v31 = vrot.slane %v3032_v18, 1  ;;  %v3040_v13 = vsub.f32 %v5447_v1, %v3020_v30  ;;  %4079 = vpow2.f32 %v3047_v58  ;;  %v3051_v4 = vmul.f32 1.442695, %v3039_v46 }
 0x7da   :  { %v3041_v37 = vsub.f32 %v5450_v60, %v3027_v36  ;;  %4081 = vpow2.f32 %v3049_v61  ;;  %v3434_v51 = vrot.slane %v5502_v55, 1  ;;  %v3439_v2 = vrot.slane %v5500_v47, 2 }
 0x7db   :  { %v3034_v5 = vmax.f32 %v3032_v18, %v3033_v31  ;;  %4083 = vpow2.f32 %v3051_v4  ;;  %v3053_v27 = vmul.f32 1.442695, %v3040_v13  ;;  %v3454_v40 = vmul.f32 %v4072_v28, %v5471_v41 }
 0x7dc   :  { %v3055_v56 = vmul.f32 1.442695, %v3041_v37  ;;  %v3435_v10 = vadd.f32 %v3434_v51, %v5502_v55  ;;  %v3440_v16 = vadd.f32 %v3439_v2, %v5500_v47  ;;  %4085 = vrcp.f32 %v3428_v21 }
 0x7dd   :  { %v3042_v1 = vsub.f32 %v5453_v34, %v3034_v5  ;;  %4087 = vpow2.f32 %v3053_v27  ;;  %v3455_v60 = vmul.f32 %v4074_v23, %v5480_v35  ;;  %v3463_v15 = vmul.f32 %v5519_v53, %v3452_v48 }
 0x7de   :  { %4089 = vpow2.f32 %v3055_v56  ;;  %v3441_v26 = vrot.slane %v3440_v16, 1  ;;  %v3464_v50 = vmul.f32 %v5519_v53, %v3453_v7  ;;  %v3465_v43 = vmul.f32 %v5519_v53, %v3454_v40 }
 0x7df   :  { %v3057_v41 = vmul.f32 1.442695, %v3042_v1  ;;  %4091 = vrcp.f32 %v3435_v10  ;;  %v5543_v55 = vmul.f32 %v5519_v53, %v3455_v60  ;;  %v3470_v47 = vsel %vm166_vm3, %v3462_v39, 0.0 }
 0x7e0   :  { %v3442_v25 = vadd.f32 %v3441_v26, %v3440_v16  ;;  %v3471_v34 = vrot.slane %v3470_v47, 4  ;;  %v3477_v52 = vsel %vm166_vm3, %v3463_v15, 0.0  ;;  %v3484_v35 = vsel %vm166_vm3, %v3464_v50, 0.0 }
 0x7e1   :  { %v5548_v17 = vpop.eup %4075  ;;  %4093 = vpow2.f32 %v3057_v41  ;;  %v3478_v12 = vrot.slane %v3477_v52, 4  ;;  %v3485_v0 = vrot.slane %v3484_v35, 4  ;;  %v3491_v22 = vsel %vm166_vm3, %v3465_v43, 0.0 }
 0x7e2   :  { %v5551_v33 = vpop.eup %4077  ;;  %v3059_v57 = vsel %vm166_vm3, %v5548_v17, 0.0  ;;  %4095 = vrcp.f32 %v3442_v25  ;;  %v3472_v3 = vadd.f32 %v3471_v34, %v3470_v47  ;;  %v3492_v9 = vrot.slane %v3491_v22, 4 }
 0x7e3   :  { %v5555_v42 = vpop.eup %4079  ;;  %v3060_v11 = vrot.slane %v3059_v57, 4  ;;  %v3066_v24 = vsel %vm166_vm3, %v5551_v33, 0.0  ;;  %v5559_v48 = vadd.f32 %v3478_v12, %v3477_v52  ;;  %v5561_v32 = vadd.f32 %v3485_v0, %v3484_v35 }
 0x7e4   :  { %v5563_v54 = vpop.eup %4081  ;;  %v3067_v38 = vrot.slane %v3066_v24, 4  ;;  %v3073_v28 = vsel %vm166_vm3, %v5555_v42, 0.0  ;;  %v3473_v7 = vrot.slane %v3472_v3, 2  ;;  %v5567_v39 = vadd.f32 %v3492_v9, %v3491_v22 }
 0x7e5   :  { %v5569_v45 = vpop.eup %4083  ;;  %v3061_v62 = vadd.f32 %v3060_v11, %v3059_v57  ;;  %v3074_v23 = vrot.slane %v3073_v28, 4  ;;  %v3080_v19 = vsel %vm166_vm3, %v5563_v54, 0.0  ;;  %v3480_v20 = vrot.slane %v5559_v48, 2 }
 0x7e6   :  { %v4086_v14 = vpop.eup %4085  ;;  %v3068_v63 = vadd.f32 %v3067_v38, %v3066_v24  ;;  %v3081_v59 = vrot.slane %v3080_v19, 4  ;;  %v3087_v6 = vsel %vm166_vm3, %v5569_v45, 0.0  ;;  %v3474_v8 = vadd.f32 %v3473_v7, %v3472_v3 }
 0x7e7   :  { %v5576_v58 = vpop.eup %4087  ;;  %v3062_v30 = vrot.slane %v3061_v62, 2  ;;  %v3075_v18 = vadd.f32 %v3074_v23, %v3073_v28  ;;  %v3088_v46 = vrot.slane %v3087_v6, 4  ;;  %v3456_v36 = vmul.f32 %v4086_v14, %v5484_v49 }
 0x7e8   :  { %v5579_v61 = vpop.eup %4089  ;;  %v3069_v21 = vrot.slane %v3068_v63, 2  ;;  %v3082_v31 = vadd.f32 %v3081_v59, %v3080_v19  ;;  %v3094_v13 = vsel %vm166_vm3, %v5576_v58, 0.0  ;;  %v3475_v4 = vrot.slane %v3474_v8, 1 }
 0x7e9   :  { %v4092_v37 = vpop.eup %4091  ;;  %v3063_v51 = vadd.f32 %v3062_v30, %v3061_v62  ;;  %v3076_v2 = vrot.slane %v3075_v18, 2  ;;  %v3089_v5 = vadd.f32 %v3088_v46, %v3087_v6  ;;  %v3095_v27 = vrot.slane %v3094_v13, 4 }
 0x7ea   :  { %v3070_v40 = vadd.f32 %v3069_v21, %v3068_v63  ;;  %v3083_v56 = vrot.slane %v3082_v31, 2  ;;  %v3101_v10 = vsel %vm166_vm3, %v5579_v61, 0.0  ;;  %v3457_v49 = vmul.f32 %v4092_v37, %v5488_v44 }
 0x7eb   :  { %v5586_v16 = vpop.eup %4093  ;;  %v3064_v1 = vrot.slane %v3063_v51, 1  ;;  %v3077_v60 = vadd.f32 %v3076_v2, %v3075_v18  ;;  %v3090_v15 = vrot.slane %v3089_v5, 2  ;;  %v3096_v26 = vadd.f32 %v3095_v27, %v3094_v13 }
 0x7ec   :  { %v4096_v50 = vpop.eup %4095  ;;  %v3071_v43 = vrot.slane %v3070_v40, 1  ;;  %v3084_v41 = vadd.f32 %v3083_v56, %v3082_v31  ;;  %v3102_v47 = vrot.slane %v3101_v10, 4  ;;  %v3108_v25 = vsel %vm166_vm3, %v5586_v16, 0.0 }
 0x7ed   :  { %v3065_v34 = vadd.f32 %v3064_v1, %v3063_v51  ;;  %v3078_v52 = vrot.slane %v3077_v60, 1  ;;  %v3091_v35 = vadd.f32 %v3090_v15, %v3089_v5  ;;  %v3097_v12 = vrot.slane %v3096_v26, 2 }
 0x7ee   :  { %v3072_v0 = vadd.f32 %v3071_v43, %v3070_v40  ;;  %v3085_v22 = vrot.slane %v3084_v41, 1  ;;  %v3103_v44 = vadd.f32 %v3102_v47, %v3101_v10  ;;  %v3109_v57 = vrot.slane %v3108_v25, 4 }
 0x7ef   :  { %v3079_v3 = vadd.f32 %v3078_v52, %v3077_v60  ;;  %v3092_v9 = vrot.slane %v3091_v35, 1  ;;  %v3098_v11 = vadd.f32 %v3097_v12, %v3096_v26  ;;  %4097 = vrcp.f32 %v3065_v34 }
 0x7f0   :  { %v3086_v24 = vadd.f32 %v3085_v22, %v3084_v41  ;;  %v3104_v38 = vrot.slane %v3103_v44, 2  ;;  %4099 = vrcp.f32 %v3072_v0  ;;  %v3110_v28 = vadd.f32 %v3109_v57, %v3108_v25 }
 0x7f1   :  { %v3093_v7 = vadd.f32 %v3092_v9, %v3091_v35  ;;  %4101 = vrcp.f32 %v3079_v3  ;;  %v3099_v62 = vrot.slane %v3098_v11, 1  ;;  %v3458_v23 = vmul.f32 %v4096_v50, %v5492_v29  ;;  %v3132_v50 = vpop.permute.xlu0 %3131 }
 0x7f2   :  { %4103 = vrcp.f32 %v3086_v24  ;;  %v3105_v19 = vadd.f32 %v3104_v38, %v3103_v44  ;;  %v3111_v14 = vrot.slane %v3110_v28, 2  ;;  %v3467_v63 = vmul.f32 %v5519_v53, %v3456_v36 }
 0x7f3   :  { %4105 = vrcp.f32 %v3093_v7  ;;  %v3100_v59 = vadd.f32 %v3099_v62, %v3098_v11  ;;  %v3468_v6 = vmul.f32 %v5519_v53, %v3457_v49  ;;  %v3469_v30 = vmul.f32 %v5519_v53, %v3458_v23 }
 0x7f4   :  { %v3106_v18 = vrot.slane %v3105_v19, 1  ;;  %v3112_v46 = vadd.f32 %v3111_v14, %v3110_v28  ;;  %v5594_v21 = vadd.f32 %v3475_v4, %v3474_v8  ;;  %v3481_v31 = vadd.f32 %v3480_v20, %v5559_v48 }
 0x7f5   :  { %4107 = vrcp.f32 %v3100_v59  ;;  %v3487_v29 = vrot.slane %v5561_v32, 2  ;;  %v3494_v13 = vrot.slane %v5567_v39, 2  ;;  %v3498_v36 = vsel %vm166_vm3, %v5543_v55, 0.0 }
 0x7f6   :  { %v3107_v37 = vadd.f32 %v3106_v18, %v3105_v19  ;;  %v3113_v51 = vrot.slane %v3112_v46, 1  ;;  %v3482_v2 = vrot.slane %v3481_v31, 1  ;;  %v3499_v53 = vrot.slane %v3498_v36, 4 }
 0x7f7   :  { %v3488_v5 = vadd.f32 %v3487_v29, %v5561_v32  ;;  %v3495_v8 = vadd.f32 %v3494_v13, %v5567_v39  ;;  %v3505_v4 = vsel %vm166_vm3, %v3467_v63, 0.0  ;;  %v3512_v48 = vsel %vm166_vm3, %v3468_v6, 0.0 }
 0x7f8   :  { %v3114_v20 = vadd.f32 %v3113_v51, %v3112_v46  ;;  %4109 = vrcp.f32 %v3107_v37  ;;  %v5607_v27 = vadd.f32 %v3482_v2, %v3481_v31  ;;  %v3500_v40 = vadd.f32 %v3499_v53, %v3498_v36 }
 0x7f9   :  { %v4098_v56 = vpop.eup %4097  ;;  %v3489_v10 = vrot.slane %v3488_v5, 1  ;;  %v3496_v55 = vrot.slane %v3495_v8, 1  ;;  %v3506_v49 = vrot.slane %v3505_v4, 4  ;;  %v3513_v1 = vrot.slane %v3512_v48, 4 }
 0x7fa   :  { %v4100_v60 = vpop.eup %4099  ;;  %v3123_v15 = vmul.f32 %v4098_v56, %v5548_v17  ;;  %4111 = vrcp.f32 %v3114_v20  ;;  %v3501_v32 = vrot.slane %v3500_v40, 2  ;;  %v5611_v39 = vsel %vm166_vm3, %v3469_v30, 0.0 }
 0x7fb   :  { %v4102_v26 = vpop.eup %4101  ;;  %v3124_v43 = vmul.f32 %v4100_v60, %v5551_v33  ;;  %v5614_v41 = vadd.f32 %v3489_v10, %v3488_v5  ;;  %v5616_v47 = vadd.f32 %v3496_v55, %v3495_v8  ;;  %v3507_v25 = vadd.f32 %v3506_v49, %v3505_v4 }
 0x7fc   :  { %v4104_v34 = vpop.eup %4103  ;;  %v3125_v52 = vmul.f32 %v4102_v26, %v5555_v42  ;;  %v3134_v35 = vmul.f32 %v3132_v50, %v3123_v15  ;;  %v3502_v12 = vadd.f32 %v3501_v32, %v3500_v40  ;;  %v5619_v17 = vadd.f32 %v3513_v1, %v3512_v48 }
 0x7fd   :  { %v4106_v0 = vpop.eup %4105  ;;  %v3126_v22 = vmul.f32 %v4104_v34, %v5563_v54  ;;  %v3135_v44 = vmul.f32 %v3132_v50, %v3124_v43  ;;  %v3508_v57 = vrot.slane %v3507_v25, 2  ;;  %v3520_v3 = vrot.slane %v5611_v39, 4 }
 0x7fe   :  { %v3127_v33 = vmul.f32 %v4106_v0, %v5569_v45  ;;  %v3136_v9 = vmul.f32 %v3132_v50, %v3125_v52  ;;  %v3142_v11 = vsel %vm166_vm3, %v3134_v35, 0.0  ;;  %v3503_v24 = vrot.slane %v3502_v12, 1 }
 0x7ff   :  { %v4108_v38 = vpop.eup %4107  ;;  %v3137_v28 = vmul.f32 %v3132_v50, %v3126_v22  ;;  %v3143_v42 = vrot.slane %v3142_v11, 4  ;;  %v3149_v7 = vsel %vm166_vm3, %v3135_v44, 0.0  ;;  %v3509_v62 = vadd.f32 %v3508_v57, %v3507_v25 }
 0x800   :  { %v3128_v23 = vmul.f32 %v4108_v38, %v5576_v58  ;;  %v3138_v19 = vmul.f32 %v3132_v50, %v3127_v33  ;;  %v3150_v54 = vrot.slane %v3149_v7, 4  ;;  %v3156_v14 = vsel %vm166_vm3, %v3136_v9, 0.0 }
 0x801   :  { %v3144_v63 = vadd.f32 %v3143_v42, %v3142_v11  ;;  %v3157_v59 = vrot.slane %v3156_v14, 4  ;;  %v3163_v45 = vsel %vm166_vm3, %v3137_v28, 0.0  ;;  %v5629_v6 = vadd.f32 %v3503_v24, %v3502_v12 }
 0x802   :  { %v4110_v30 = vpop.eup %4109  ;;  %v3139_v18 = vmul.f32 %v3132_v50, %v3128_v23  ;;  %v3151_v46 = vadd.f32 %v3150_v54, %v3149_v7  ;;  %v3164_v31 = vrot.slane %v3163_v45, 4  ;;  %v3170_v29 = vsel %vm166_vm3, %v3138_v19, 0.0 }
 0x803   :  { %v3129_v13 = vmul.f32 %v4110_v30, %v5579_v61  ;;  %v3145_v36 = vrot.slane %v3144_v63, 2  ;;  %v3158_v58 = vadd.f32 %v3157_v59, %v3156_v14  ;;  %v3171_v37 = vrot.slane %v3170_v29, 4 }
 0x804   :  { %v4112_v51 = vpop.eup %4111  ;;  %v3152_v2 = vrot.slane %v3151_v46, 2  ;;  %v3165_v53 = vadd.f32 %v3164_v31, %v3163_v45  ;;  %v3177_v5 = vsel %vm166_vm3, %v3139_v18, 0.0  ;;  %v3510_v8 = vrot.slane %v3509_v62, 1 }
 0x805   :  { %v3130_v4 = vmul.f32 %v4112_v51, %v5586_v16  ;;  %v3140_v48 = vmul.f32 %v3132_v50, %v3129_v13  ;;  %v3146_v20 = vadd.f32 %v3145_v36, %v3144_v63  ;;  %v3159_v40 = vrot.slane %v3158_v58, 2 }
 0x806   :  { %v3153_v56 = vadd.f32 %v3152_v2, %v3151_v46  ;;  %v3166_v10 = vrot.slane %v3165_v53, 2  ;;  %v3172_v55 = vadd.f32 %v3171_v37, %v3170_v29  ;;  %v3178_v49 = vrot.slane %v3177_v5, 4 }
 0x807   :  { %v3141_v1 = vmul.f32 %v3132_v50, %v3130_v4  ;;  %v3147_v61 = vrot.slane %v3146_v20, 1  ;;  %v3160_v60 = vadd.f32 %v3159_v40, %v3158_v58  ;;  %v3184_v15 = vsel %vm166_vm3, %v3140_v48, 0.0 }
 0x808   :  { %v3154_v32 = vrot.slane %v3153_v56, 1  ;;  %v3167_v26 = vadd.f32 %v3166_v10, %v3165_v53  ;;  %v3173_v43 = vrot.slane %v3172_v55, 2  ;;  %v3179_v25 = vadd.f32 %v3178_v49, %v3177_v5 }
 0x809   :  { %v3148_v34 = vadd.f32 %v3147_v61, %v3146_v20  ;;  %v3161_v52 = vrot.slane %v3160_v60, 1  ;;  %v3185_v35 = vrot.slane %v3184_v15, 4  ;;  %v3191_v16 = vsel %vm166_vm3, %v3141_v1, 0.0 }
 0x80a   :  { %v3155_v12 = vadd.f32 %v3154_v32, %v3153_v56  ;;  %v3168_v0 = vrot.slane %v3167_v26, 1  ;;  %v3174_v22 = vadd.f32 %v3173_v43, %v3172_v55  ;;  %v3180_v44 = vrot.slane %v3179_v25, 2  ;;  %v3560_v56 = vpop.permute.xlu0 %3559 }
 0x80b   :  { %v3162_v57 = vadd.f32 %v3161_v52, %v3160_v60  ;;  %v3186_v33 = vadd.f32 %v3185_v35, %v3184_v15  ;;  %v3192_v50 = vrot.slane %v3191_v16, 4  ;;  %v3511_v9 = vadd.f32 %v3510_v8, %v3509_v62 }
 0x80c   :  { %v3169_v11 = vadd.f32 %v3168_v0, %v3167_v26  ;;  %v3175_v24 = vrot.slane %v3174_v22, 1  ;;  %v3181_v38 = vadd.f32 %v3180_v44, %v3179_v25  ;;  %v3534_v28 = vsel %vm912_vm7, %v3155_v12, %v3148_v34 }
 0x80d   :  { %v3187_v42 = vrot.slane %v3186_v33, 2  ;;  %v3193_v7 = vadd.f32 %v3192_v50, %v3191_v16  ;;  %v3535_v23 = vsel %vm914_vm8, %v3162_v57, %v3534_v28  ;;  %v3515_v19 = vrot.slane %v5619_v17, 2 }
 0x80e   :  { %v3176_v54 = vadd.f32 %v3175_v24, %v3174_v22  ;;  %v3182_v14 = vrot.slane %v3181_v38, 1  ;;  %v3536_v63 = vsel %vm916_vm9, %v3169_v11, %v3535_v23  ;;  %v3521_v59 = vadd.f32 %v3520_v3, %v5611_v39 }
 0x80f   :  { %v3188_v62 = vadd.f32 %v3187_v42, %v3186_v33  ;;  %v3194_v45 = vrot.slane %v3193_v7, 2  ;;  %v3516_v30 = vadd.f32 %v3515_v19, %v5619_v17  ;;  %v3549_v18 = vsel %vm912_vm7, %v5607_v27, %v5594_v21 }
 0x810   :  { %v3183_v46 = vadd.f32 %v3182_v14, %v3181_v38  ;;  %v3537_v31 = vsel %vm918_vm10, %v3176_v54, %v3536_v63  ;;  %v3522_v29 = vrot.slane %v3521_v59, 2  ;;  %v3550_v13 = vsel %vm914_vm8, %v5614_v41, %v3549_v18 }
 0x811   :  { %v3189_v36 = vrot.slane %v3188_v62, 1  ;;  %v3195_v58 = vadd.f32 %v3194_v45, %v3193_v7  ;;  %v3517_v37 = vrot.slane %v3516_v30, 1  ;;  %v3551_v39 = vsel %vm916_vm9, %v5616_v47, %v3550_v13 }
 0x812   :  { %v3538_v3 = vsel %vm920_vm11, %v3183_v46, %v3537_v31  ;;  %v3523_v17 = vadd.f32 %v3522_v29, %v3521_v59  ;;  %v3552_v51 = vsel %vm918_vm10, %v5629_v6, %v3551_v39  ;;  %v3562_v6 = vpop.permute.xlu1 %3561 }
 0x813   :  { %v3190_v21 = vadd.f32 %v3189_v36, %v3188_v62  ;;  %v3196_v27 = vrot.slane %v3195_v58, 1  ;;  %v3518_v2 = vadd.f32 %v3517_v37, %v3516_v30  ;;  %v3553_v53 = vsel %vm920_vm11, %v3511_v9, %v3552_v51 }
 0x814   :  { %v3524_v5 = vrot.slane %v3523_v17, 1 }
 0x815   :  { %v3197_v8 = vadd.f32 %v3196_v27, %v3195_v58  ;;  %v3539_v41 = vsel %vm922_vm12, %v3190_v21, %v3538_v3  ;;  %v3554_v4 = vsel %vm922_vm12, %v3518_v2, %v3553_v53 }
 0x816   :  { %v3525_v48 = vadd.f32 %v3524_v5, %v3523_v17 }
 0x817   :  { %v3540_v47 = vsel %vm924_vm13, %v3197_v8, %v3539_v41 }
 0x818   :  { %3794 = vmatprep.mubr.msk.f32.mxu0 %vm166_vm3, %v3540_v47  ;;  %v3555_v20 = vsel %vm924_vm13, %v3525_v48, %v3554_v4 }
 0x819   :  { %3795 = vmatmul.mubr.msk.f32.vlgmr.msra.gmra.mrb[8].mxu0 %vm166_vm3, %v3555_v20 }
 0x8ec   :  { %v3796_v40 = vpop.f32.mrb[8].mxu0 }
 0x8ed   :  { %v3644_v10 = vadd.f32 %v3796_v40, %v3562_v6  ;;  %v3638_v55 = vpop.f32.mrb[9].mxu0 }
 0x8ee   :  { %v3639_v49 = vadd.f32 %v3638_v55, %v3560_v56 }
 0x8ef   :  { %3648 = vst.msk [vmem:[%s5680_s9 + $0x8] sm:$0xff] %vm166_vm3, %v3644_v10 }
 0x8f0   :  { %3647 = vst.msk [vmem:[%s5680_s9] sm:$0xff] %vm166_vm3, %v3639_v49 }

</bundles_post_ra>
